<compile_context>
chip_gen: v6e
topology: v6e:2x2x1
jax: 0.10.0
libtpu: 0.0.40
codegen_flags: <defaults>
</compile_context>

<pallas_src>
import functools
import math

import jax
import jax.numpy as jnp
from jax.experimental import pallas as pl
from jax.experimental.pallas import tpu as pltpu


# ----------------------------------------------------------------------------
# Fused kernel: patch-embed prologue + all encoder layers + seq-pool + head
# ----------------------------------------------------------------------------

def _cct_kernel(p_ref, wconv_ref,
                ln1g_ref, ln1b_ref, wqkv_ref, bqkv_ref, wo_ref, bo_ref,
                ln2g_ref, ln2b_ref, wm1_ref, bm1_ref, wm2_ref, bm2_ref,
                lnfg_ref, lnfb_ref,
                cos_ref, sin_ref, med_ref,
                wpool_ref, bpool_ref, wfc_ref, bfc_ref,
                o_ref, *,
                num_layers, num_heads, num_windows, seq_len, batch_blk, eps):
    S = seq_len
    Bblk = batch_blk
    Wn = num_windows
    D = wconv_ref.shape[1]
    dh = D // num_heads
    N = Bblk * S

    # Constant ones matrices: row reductions go through the (idle) MXU.
    ones_d = jnp.ones((D, D), jnp.float32)
    ones_s = jnp.ones((S, S), jnp.float32)
    ones_1s = jnp.ones((1, S), jnp.float32)
    inv_d = 1.0 / float(D)

    def layer_norm(t, g, b):
        mean = jnp.dot(t, ones_d, preferred_element_type=jnp.float32) * inv_d
        tc = t - mean
        var = jnp.dot(tc * tc, ones_d, preferred_element_type=jnp.float32) * inv_d
        return tc * jax.lax.rsqrt(var + eps) * g + b

    # ---- fused patch embedding: conv-as-matmul + ReLU + MaxPool window-max ----
    # rows of p_ref are ordered (window, batch, token) so the pool-max is a
    # simple strided reduce over contiguous [N, D] row groups (no reshapes).
    y = jnp.dot(p_ref[...], wconv_ref[...], preferred_element_type=jnp.float32)
    y = jnp.maximum(y, 0.0)                                   # ReLU
    x = y[0:N]
    for w in range(1, Wn):                                    # MaxPool over windows
        x = jnp.maximum(x, y[w * N:(w + 1) * N])              # tokens [Bblk*S, D]

    cos = cos_ref[...]            # [Bblk*S, D]  heads concatenated on the lane axis
    sin = sin_ref[...]
    med = med_ref[...]            # [S, S]       mediator with 1/sqrt(dh) folded in

    # ---- encoder layers (pre-norm transformer) ----
    for l in range(num_layers):
        # --- attention block ---
        h = layer_norm(x, ln1g_ref[l], ln1b_ref[l])
        # QKV with rotate-half pre-folded: columns are [q, q@P, k, k@P, v]
        qkv = jnp.dot(h, wqkv_ref[l], preferred_element_type=jnp.float32) + bqkv_ref[l]
        q = qkv[:, 0 * D:1 * D] * cos + qkv[:, 1 * D:2 * D] * sin
        k = qkv[:, 2 * D:3 * D] * cos + qkv[:, 3 * D:4 * D] * sin
        v = qkv[:, 4 * D:5 * D]
        wo_l = wo_ref[l]

        attn_rows = []
        for b in range(Bblk):                       # sublane-aligned row slices
            r0 = b * S
            q_b = q[r0:r0 + S]
            k_b = k[r0:r0 + S]
            v_b = v[r0:r0 + S]
            acc_b = None
            for hd in range(num_heads):             # heads sliced on the lane axis
                sl = slice(hd * dh, (hd + 1) * dh)
                s = jax.lax.dot_general(            # q_h @ k_hᵀ without an XLU .T
                    q_b[:, sl], k_b[:, sl], (((1,), (1,)), ((), ())),
                    preferred_element_type=jnp.float32)          # [S, S]
                s = s * med                                       # mediator * scale
                s = s - jnp.max(s, axis=-1, keepdims=True)
                p = jnp.exp(s)
                den = jnp.dot(p, ones_s, preferred_element_type=jnp.float32)
                p = p * pl.reciprocal(den, approx=True)           # EUP reciprocal
                o_h = jnp.dot(p, v_b[:, sl], preferred_element_type=jnp.float32)
                c = jnp.dot(o_h, wo_l[sl, :], preferred_element_type=jnp.float32)
                acc_b = c if acc_b is None else acc_b + c         # fused out-proj
            attn_rows.append(acc_b)
        attn = attn_rows[0] if Bblk == 1 else jnp.concatenate(attn_rows, axis=0)
        x = x + attn + bo_ref[l]

        # --- MLP block ---
        h = layer_norm(x, ln2g_ref[l], ln2b_ref[l])
        m = jnp.dot(h, wm1_ref[l], preferred_element_type=jnp.float32) + bm1_ref[l]
        # TODO(synk): torch nn.GELU default is exact erf; tanh approx kept (EUP-friendly)
        m = jax.nn.gelu(m, approximate=True)
        x = x + jnp.dot(m, wm2_ref[l], preferred_element_type=jnp.float32) + bm2_ref[l]

    x = layer_norm(x, lnfg_ref[...], lnfb_ref[...])

    # ---- seq-pool (softmax gate over sequence) + classifier (lane-dense out) ----
    lg = jnp.dot(x, wpool_ref[...], preferred_element_type=jnp.float32) + bpool_ref[...]
    out_rows = []
    for b in range(Bblk):
        r0 = b * S
        xb = x[r0:r0 + S]                                       # [S, D]
        lg_b = lg[r0:r0 + S]                                    # [S, 1]
        lg_b = lg_b - jnp.max(lg_b, axis=0, keepdims=True)
        gexp = jnp.exp(lg_b)
        gate = gexp * pl.reciprocal(jnp.sum(gexp, axis=0, keepdims=True), approx=True)
        aggr = jnp.dot(ones_1s, gate * xb, preferred_element_type=jnp.float32)   # [1, D]
        out_rows.append(
            jnp.dot(aggr, wfc_ref[...], preferred_element_type=jnp.float32) + bfc_ref[...])
    out = out_rows[0] if Bblk == 1 else jnp.concatenate(out_rows, axis=0)
    o_ref[0] = out.astype(o_ref.dtype)                          # [Bblk, Cp] full vst


# ----------------------------------------------------------------------------
# Host-side precompute: im2col, weight packing, positional tables, mediator
# ----------------------------------------------------------------------------

def _build_im2col_patches(pixel_values, kh, kw, num_blocks):
    """im2col patches ordered (grid_block, window, batch_in_block, token)."""
    B, C, H, W = pixel_values.shape
    Hc, Wc = H - kh + 1, W - kw + 1
    ph, pw = Hc // kh, Wc // kw
    S = ph * pw
    K = kh * kw * C
    Wn = kh * kw

    x = jnp.transpose(pixel_values, (0, 2, 3, 1))               # NCHW -> NHWC
    cols = [x[:, di:di + Hc, dj:dj + Wc, :] for di in range(kh) for dj in range(kw)]
    patches = jnp.concatenate(cols, axis=-1)                    # [B, Hc, Wc, K]
    patches = patches[:, :ph * kh, :pw * kw, :]                 # floor-mode pool trim
    patches = patches.reshape(B, ph, kh, pw, kw, K)
    patches = jnp.transpose(patches, (0, 2, 4, 1, 3, 5))        # [B, kh, kw, ph, pw, K]
    patches = patches.reshape(B, Wn, S, K)

    Kp = ((K + 7) // 8) * 8                                     # pad 27 -> 32 (sublane)
    if Kp != K:
        patches = jnp.pad(patches, ((0, 0), (0, 0), (0, 0), (0, Kp - K)))

    Bblk = B // num_blocks
    patches = patches.reshape(num_blocks, Bblk, Wn, S, Kp)
    patches = jnp.transpose(patches, (0, 2, 1, 3, 4))           # window-major per block
    patches = patches.reshape(num_blocks * Wn * Bblk * S, Kp)
    return patches, S, Kp


def _conv_weight_matrix(conv_w, Kp):
    """torch [dim, C, kh, kw] -> [(di,dj,c), dim], zero-padded to Kp rows."""
    dim, C, kh, kw = conv_w.shape
    w = jnp.transpose(conv_w, (2, 3, 1, 0)).reshape(kh * kw * C, dim)
    if Kp != w.shape[0]:
        w = jnp.pad(w, ((0, Kp - w.shape[0]), (0, 0)))
    return w


def _make_rotation_tables(num_heads, dh, S):
    """Deterministic per-head algebraic maps in cos/sin form, heads concatenated
    along the feature (lane) axis: returns [S, num_heads*dh] each."""
    half = dh // 2
    h_idx = jnp.arange(num_heads, dtype=jnp.float32)[:, None]
    r_idx = jnp.arange(half, dtype=jnp.float32)[None, :]
    theta = (h_idx * half + r_idx + 1.0) * (math.pi / 17.0)     # [H, half]
    pos = jnp.arange(S, dtype=jnp.float32)
    ang = pos[None, :, None] * theta[:, None, :]                # [H, S, half]
    cos = jnp.concatenate([jnp.cos(ang), jnp.cos(ang)], axis=-1)
    sin = jnp.concatenate([jnp.sin(ang), jnp.sin(ang)], axis=-1)
    cos = jnp.transpose(cos, (1, 0, 2)).reshape(S, num_heads * dh)
    sin = jnp.transpose(sin, (1, 0, 2)).reshape(S, num_heads * dh)
    return cos, sin


def _make_rot_matrix(num_heads, dh):
    """[D, D] block-diagonal signed permutation: (t @ P)_h = [-t_h2, t_h1]."""
    half = dh // 2
    idx = jnp.arange(half)
    m = jnp.zeros((dh, dh), jnp.float32)
    m = m.at[idx, idx + half].set(1.0)
    m = m.at[idx + half, idx].set(-1.0)
    return jnp.kron(jnp.eye(num_heads, dtype=jnp.float32), m)


def _pack_qkv_rotated(w_qkv, b_qkv, rotp):
    """Fold rotate-half into QKV: columns [Wq, Wq@P, Wk, Wk@P, Wv] (and biases)."""
    L, D, _ = w_qkv.shape
    wq, wk, wv = w_qkv[:, :, :D], w_qkv[:, :, D:2 * D], w_qkv[:, :, 2 * D:]
    bq, bk, bv = b_qkv[:, :, :D], b_qkv[:, :, D:2 * D], b_qkv[:, :, 2 * D:]
    wq_r = jnp.einsum('lde,ef->ldf', wq, rotp)
    wk_r = jnp.einsum('lde,ef->ldf', wk, rotp)
    bq_r = jnp.einsum('lde,ef->ldf', bq, rotp)
    bk_r = jnp.einsum('lde,ef->ldf', bk, rotp)
    w5 = jnp.concatenate([wq, wq_r, wk, wk_r, wv], axis=-1)
    b5 = jnp.concatenate([bq, bq_r, bk, bk_r, bv], axis=-1)
    return w5, b5


# ----------------------------------------------------------------------------
# Forward wrapper (single pallas_call)
# ----------------------------------------------------------------------------

def algebraic_seq_cct_forward(pixel_values, params, *, num_heads, kernel_size,
                              num_grid_blocks=1):
    """num_grid_blocks=1 -> whole batch resident in one block (best on the
    single-TensorCore v5e/v6e).  On v7x pass num_grid_blocks=2 (B even) so the
    'parallel' grid axis shards across both TensorCores."""
    kh, kw = kernel_size
    B = pixel_values.shape[0]
    if B % num_grid_blocks != 0:
        raise ValueError("batch must be divisible by num_grid_blocks")
    Bblk = B // num_grid_blocks
    Wn = kh * kw

    dim = params["conv_w"].shape[0]
    L = params["w_qkv"].shape[0]
    Hd = params["w_mlp1"].shape[2]
    C = params["w_fc"].shape[1]
    dh = dim // num_heads

    patches, S, Kp = _build_im2col_patches(pixel_values, kh, kw, num_grid_blocks)
    wconv = _conv_weight_matrix(params["conv_w"], Kp)

    cos, sin = _make_rotation_tables(num_heads, dh, S)          # [S, dim]
    cos = jnp.tile(cos, (Bblk, 1))                              # rows ordered (b, s)
    sin = jnp.tile(sin, (Bblk, 1))

    # mediator 0.98**|i-j| with the 1/sqrt(dh) attention scale folded in
    pos = jnp.arange(S)
    med = jnp.power(0.98, jnp.abs(pos[:, None] - pos[None, :]).astype(jnp.float32))
    med = med * (1.0 / math.sqrt(dh))

    rotp = _make_rot_matrix(num_heads, dh)
    w_qkv5, b_qkv5 = _pack_qkv_rotated(params["w_qkv"], params["b_qkv"], rotp)

    # lane-dense classifier head: zero-pad num_classes up to a full 128-lane block
    Cp = ((C + 127) // 128) * 128
    w_fc = jnp.pad(params["w_fc"], ((0, 0), (0, Cp - C)))
    b_fc = jnp.pad(params["b_fc"], ((0, 0), (0, Cp - C)))

    c2 = lambda i: (0, 0)
    c3 = lambda i: (0, 0, 0)

    kernel = functools.partial(
        _cct_kernel, num_layers=L, num_heads=num_heads, num_windows=Wn,
        seq_len=S, batch_blk=Bblk, eps=1e-5)

    out = pl.pallas_call(
        kernel,
        out_shape=jax.ShapeDtypeStruct((num_grid_blocks, Bblk, Cp), jnp.float32),
        grid=(num_grid_blocks,),
        in_specs=[
            pl.BlockSpec((Wn * Bblk * S, Kp), lambda i: (i, 0)),   # im2col patches
            pl.BlockSpec((Kp, dim), c2),                           # conv weight
            pl.BlockSpec((L, 1, dim), c3),                         # ln1_g
            pl.BlockSpec((L, 1, dim), c3),                         # ln1_b
            pl.BlockSpec((L, dim, 5 * dim), c3),                   # w_qkv (rot folded)
            pl.BlockSpec((L, 1, 5 * dim), c3),                     # b_qkv (rot folded)
            pl.BlockSpec((L, dim, dim), c3),                       # w_o
            pl.BlockSpec((L, 1, dim), c3),                         # b_o
            pl.BlockSpec((L, 1, dim), c3),                         # ln2_g
            pl.BlockSpec((L, 1, dim), c3),                         # ln2_b
            pl.BlockSpec((L, dim, Hd), c3),                        # w_mlp1
            pl.BlockSpec((L, 1, Hd), c3),                          # b_mlp1
            pl.BlockSpec((L, Hd, dim), c3),                        # w_mlp2
            pl.BlockSpec((L, 1, dim), c3),                         # b_mlp2
            pl.BlockSpec((1, dim), c2),                            # lnf_g
            pl.BlockSpec((1, dim), c2),                            # lnf_b
            pl.BlockSpec((Bblk * S, dim), c2),                     # cos (tiled)
            pl.BlockSpec((Bblk * S, dim), c2),                     # sin (tiled)
            pl.BlockSpec((S, S), c2),                              # mediator * scale
            pl.BlockSpec((dim, 1), c2),                            # w_pool
            pl.BlockSpec((1, 1), c2),                              # b_pool
            pl.BlockSpec((dim, Cp), c2),                           # w_fc (padded)
            pl.BlockSpec((1, Cp), c2),                             # b_fc (padded)
        ],
        out_specs=pl.BlockSpec((1, Bblk, Cp), lambda i: (i, 0, 0)),
        compiler_params=pltpu.CompilerParams(dimension_semantics=("parallel",)),
    )(patches, wconv,
      params["ln1_g"], params["ln1_b"], w_qkv5, b_qkv5,
      params["w_o"], params["b_o"], params["ln2_g"], params["ln2_b"],
      params["w_mlp1"], params["b_mlp1"], params["w_mlp2"], params["b_mlp2"],
      params["lnf_g"], params["lnf_b"],
      cos, sin, med,
      params["w_pool"], params["b_pool"], w_fc, b_fc)

    return out.reshape(B, Cp)[:, :C]


# ----------------------------------------------------------------------------
# Parameter init and demo
# ----------------------------------------------------------------------------

def init_params(key, dim, num_layers, num_heads, in_channels, kernel_size,
                num_classes, mlp_ratio):
    kh, kw = kernel_size
    hidden = dim * mlp_ratio
    L = num_layers
    ks = jax.random.split(key, 7)

    def nrm(k, shape, fan_in):
        return jax.random.normal(k, shape, jnp.float32) * (1.0 / math.sqrt(fan_in))

    return {
        "conv_w": nrm(ks[0], (dim, in_channels, kh, kw), in_channels * kh * kw),
        "ln1_g": jnp.ones((L, 1, dim), jnp.float32),
        "ln1_b": jnp.zeros((L, 1, dim), jnp.float32),
        "w_qkv": nrm(ks[1], (L, dim, 3 * dim), dim),
        "b_qkv": jnp.zeros((L, 1, 3 * dim), jnp.float32),
        "w_o": nrm(ks[2], (L, dim, dim), dim),
        "b_o": jnp.zeros((L, 1, dim), jnp.float32),
        "ln2_g": jnp.ones((L, 1, dim), jnp.float32),
        "ln2_b": jnp.zeros((L, 1, dim), jnp.float32),
        "w_mlp1": nrm(ks[3], (L, dim, hidden), dim),
        "b_mlp1": jnp.zeros((L, 1, hidden), jnp.float32),
        "w_mlp2": nrm(ks[4], (L, hidden, dim), hidden),
        "b_mlp2": jnp.zeros((L, 1, dim), jnp.float32),
        "lnf_g": jnp.ones((1, dim), jnp.float32),
        "lnf_b": jnp.zeros((1, dim), jnp.float32),
        "w_pool": nrm(ks[5], (dim, 1), dim),
        "b_pool": jnp.zeros((1, 1), jnp.float32),
        "w_fc": nrm(ks[6], (dim, num_classes), dim),
        "b_fc": jnp.zeros((1, num_classes), jnp.float32),
    }


if __name__ == "__main__":
    B, C, H, W = 2, 3, 16, 16
    DIM, LAYERS, HEADS, CLASSES, MLP = 32, 2, 4, 10, 2
    KS = (3, 3)   # conv 3x3 stride 1 -> 14x14; maxpool 3 -> 4x4 -> S = 16 tokens

    key = jax.random.PRNGKey(0)
    kx, kp = jax.random.split(key)
    x = jax.random.normal(kx, (B, C, H, W), jnp.float32)
    params = init_params(kp, DIM, LAYERS, HEADS, C, KS, CLASSES, MLP)

    fwd = jax.jit(functools.partial(algebraic_seq_cct_forward,
                                    num_heads=HEADS, kernel_size=KS,
                                    num_grid_blocks=1))
    out = fwd(x, params)
    jax.block_until_ready(out)
    assert out.shape == (B, CLASSES), out.shape
    print("KERNEL_OK")
</pallas_src>

<mosaic_0001>
module attributes {stable_mosaic.version = 11 : i64} {
  func.func @_cct_kernel(%arg0: i32, %arg1: memref<288x32xf32, #tpu.memory_space<vmem>>, %arg2: memref<32x32xf32, #tpu.memory_space<vmem>>, %arg3: memref<2x1x32xf32, #tpu.memory_space<vmem>>, %arg4: memref<2x1x32xf32, #tpu.memory_space<vmem>>, %arg5: memref<2x32x160xf32, #tpu.memory_space<vmem>>, %arg6: memref<2x1x160xf32, #tpu.memory_space<vmem>>, %arg7: memref<2x32x32xf32, #tpu.memory_space<vmem>>, %arg8: memref<2x1x32xf32, #tpu.memory_space<vmem>>, %arg9: memref<2x1x32xf32, #tpu.memory_space<vmem>>, %arg10: memref<2x1x32xf32, #tpu.memory_space<vmem>>, %arg11: memref<2x32x64xf32, #tpu.memory_space<vmem>>, %arg12: memref<2x1x64xf32, #tpu.memory_space<vmem>>, %arg13: memref<2x64x32xf32, #tpu.memory_space<vmem>>, %arg14: memref<2x1x32xf32, #tpu.memory_space<vmem>>, %arg15: memref<1x32xf32, #tpu.memory_space<vmem>>, %arg16: memref<1x32xf32, #tpu.memory_space<vmem>>, %arg17: memref<32x32xf32, #tpu.memory_space<vmem>>, %arg18: memref<32x32xf32, #tpu.memory_space<vmem>>, %arg19: memref<16x16xf32, #tpu.memory_space<vmem>>, %arg20: memref<32x1xf32, #tpu.memory_space<vmem>>, %arg21: memref<1x1xf32, #tpu.memory_space<vmem>>, %arg22: memref<32x128xf32, #tpu.memory_space<vmem>>, %arg23: memref<1x128xf32, #tpu.memory_space<vmem>>, %arg24: memref<1x2x128xf32, #tpu.memory_space<vmem>>) attributes {dimension_semantics = [#tpu.dimension_semantics<parallel>], iteration_bounds = array<i64: 1>, scalar_prefetch = 0 : i64, scratch_operands = 0 : i64, tpu.core_type = #tpu.core_type<tc>, window_params = [{transform_indices = @transform_0, window_bounds = array<i64: 288, 32>}, {pipeline_mode = #tpu.pipeline_mode<synchronous>, transform_indices = @transform_1, window_bounds = array<i64: 32, 32>}, {pipeline_mode = #tpu.pipeline_mode<synchronous>, transform_indices = @transform_2, window_bounds = array<i64: 2, 1, 32>}, {pipeline_mode = #tpu.pipeline_mode<synchronous>, transform_indices = @transform_3, window_bounds = array<i64: 2, 1, 32>}, {pipeline_mode = #tpu.pipeline_mode<synchronous>, transform_indices = @transform_4, window_bounds = array<i64: 2, 32, 160>}, {pipeline_mode = #tpu.pipeline_mode<synchronous>, transform_indices = @transform_5, window_bounds = array<i64: 2, 1, 160>}, {pipeline_mode = #tpu.pipeline_mode<synchronous>, transform_indices = @transform_6, window_bounds = array<i64: 2, 32, 32>}, {pipeline_mode = #tpu.pipeline_mode<synchronous>, transform_indices = @transform_7, window_bounds = array<i64: 2, 1, 32>}, {pipeline_mode = #tpu.pipeline_mode<synchronous>, transform_indices = @transform_8, window_bounds = array<i64: 2, 1, 32>}, {pipeline_mode = #tpu.pipeline_mode<synchronous>, transform_indices = @transform_9, window_bounds = array<i64: 2, 1, 32>}, {pipeline_mode = #tpu.pipeline_mode<synchronous>, transform_indices = @transform_10, window_bounds = array<i64: 2, 32, 64>}, {pipeline_mode = #tpu.pipeline_mode<synchronous>, transform_indices = @transform_11, window_bounds = array<i64: 2, 1, 64>}, {pipeline_mode = #tpu.pipeline_mode<synchronous>, transform_indices = @transform_12, window_bounds = array<i64: 2, 64, 32>}, {pipeline_mode = #tpu.pipeline_mode<synchronous>, transform_indices = @transform_13, window_bounds = array<i64: 2, 1, 32>}, {pipeline_mode = #tpu.pipeline_mode<synchronous>, transform_indices = @transform_14, window_bounds = array<i64: 1, 32>}, {pipeline_mode = #tpu.pipeline_mode<synchronous>, transform_indices = @transform_15, window_bounds = array<i64: 1, 32>}, {pipeline_mode = #tpu.pipeline_mode<synchronous>, transform_indices = @transform_16, window_bounds = array<i64: 32, 32>}, {pipeline_mode = #tpu.pipeline_mode<synchronous>, transform_indices = @transform_17, window_bounds = array<i64: 32, 32>}, {pipeline_mode = #tpu.pipeline_mode<synchronous>, transform_indices = @transform_18, window_bounds = array<i64: 16, 16>}, {pipeline_mode = #tpu.pipeline_mode<synchronous>, transform_indices = @transform_19, window_bounds = array<i64: 32, 1>}, {pipeline_mode = #tpu.pipeline_mode<synchronous>, transform_indices = @transform_20, window_bounds = array<i64: 1, 1>}, {pipeline_mode = #tpu.pipeline_mode<synchronous>, transform_indices = @transform_21, window_bounds = array<i64: 32, 128>}, {pipeline_mode = #tpu.pipeline_mode<synchronous>, transform_indices = @transform_22, window_bounds = array<i64: 1, 128>}, {transform_indices = @transform_23, window_bounds = array<i64: 1, 2, 128>}]} {
    %cst = arith.constant 1.000000e+00 : f32
    %0 = vector.broadcast %cst : f32 to vector<32x32xf32>
    %cst_0 = arith.constant 1.000000e+00 : f32
    %1 = vector.broadcast %cst_0 : f32 to vector<16x16xf32>
    %cst_1 = arith.constant 1.000000e+00 : f32
    %2 = vector.broadcast %cst_1 : f32 to vector<1x16xf32>
    %c0 = arith.constant 0 : index
    %c0_2 = arith.constant 0 : index
    %3 = vector.load %arg1[%c0, %c0_2] : memref<288x32xf32, #tpu.memory_space<vmem>>, vector<288x32xf32>
    %c0_3 = arith.constant 0 : index
    %c0_4 = arith.constant 0 : index
    %4 = vector.load %arg2[%c0_3, %c0_4] : memref<32x32xf32, #tpu.memory_space<vmem>>, vector<32x32xf32>
    %cst_5 = arith.constant dense<0.000000e+00> : vector<288x32xf32>
    %5 = tpu.matmul %3, %4, %cst_5 {dimension_numbers = #tpu.dot_dimension_numbers<[1], [0], [0], [1], [0, 0, 1, 1], [], []>} : vector<288x32xf32>, vector<32x32xf32>, vector<288x32xf32> -> vector<288x32xf32>
    %cst_6 = arith.constant 0.000000e+00 : f32
    %6 = vector.broadcast %cst_6 : f32 to vector<288x32xf32>
    %7 = arith.maximumf %5, %6 : vector<288x32xf32>
    %8 = vector.extract_strided_slice %7 {offsets = [0, 0], sizes = [32, 32], strides = [1, 1]} : vector<288x32xf32> to vector<32x32xf32>
    %9 = vector.extract_strided_slice %7 {offsets = [32, 0], sizes = [32, 32], strides = [1, 1]} : vector<288x32xf32> to vector<32x32xf32>
    %10 = arith.maximumf %8, %9 : vector<32x32xf32>
    %11 = vector.extract_strided_slice %7 {offsets = [64, 0], sizes = [32, 32], strides = [1, 1]} : vector<288x32xf32> to vector<32x32xf32>
    %12 = arith.maximumf %10, %11 : vector<32x32xf32>
    %13 = vector.extract_strided_slice %7 {offsets = [96, 0], sizes = [32, 32], strides = [1, 1]} : vector<288x32xf32> to vector<32x32xf32>
    %14 = arith.maximumf %12, %13 : vector<32x32xf32>
    %15 = vector.extract_strided_slice %7 {offsets = [128, 0], sizes = [32, 32], strides = [1, 1]} : vector<288x32xf32> to vector<32x32xf32>
    %16 = arith.maximumf %14, %15 : vector<32x32xf32>
    %17 = vector.extract_strided_slice %7 {offsets = [160, 0], sizes = [32, 32], strides = [1, 1]} : vector<288x32xf32> to vector<32x32xf32>
    %18 = arith.maximumf %16, %17 : vector<32x32xf32>
    %19 = vector.extract_strided_slice %7 {offsets = [192, 0], sizes = [32, 32], strides = [1, 1]} : vector<288x32xf32> to vector<32x32xf32>
    %20 = arith.maximumf %18, %19 : vector<32x32xf32>
    %21 = vector.extract_strided_slice %7 {offsets = [224, 0], sizes = [32, 32], strides = [1, 1]} : vector<288x32xf32> to vector<32x32xf32>
    %22 = arith.maximumf %20, %21 : vector<32x32xf32>
    %23 = vector.extract_strided_slice %7 {offsets = [256, 0], sizes = [32, 32], strides = [1, 1]} : vector<288x32xf32> to vector<32x32xf32>
    %24 = arith.maximumf %22, %23 : vector<32x32xf32>
    %c0_7 = arith.constant 0 : index
    %c0_8 = arith.constant 0 : index
    %25 = vector.load %arg17[%c0_7, %c0_8] : memref<32x32xf32, #tpu.memory_space<vmem>>, vector<32x32xf32>
    %c0_9 = arith.constant 0 : index
    %c0_10 = arith.constant 0 : index
    %26 = vector.load %arg18[%c0_9, %c0_10] : memref<32x32xf32, #tpu.memory_space<vmem>>, vector<32x32xf32>
    %c0_11 = arith.constant 0 : index
    %c0_12 = arith.constant 0 : index
    %27 = vector.load %arg19[%c0_11, %c0_12] : memref<16x16xf32, #tpu.memory_space<vmem>>, vector<16x16xf32>
    %c0_13 = arith.constant 0 : index
    %c0_14 = arith.constant 0 : index
    %c0_15 = arith.constant 0 : index
    %28 = vector.load %arg3[%c0_13, %c0_14, %c0_15] : memref<2x1x32xf32, #tpu.memory_space<vmem>>, vector<1x1x32xf32>
    %29 = vector.shape_cast %28 : vector<1x1x32xf32> to vector<1x32xf32>
    %c0_16 = arith.constant 0 : index
    %c0_17 = arith.constant 0 : index
    %c0_18 = arith.constant 0 : index
    %30 = vector.load %arg4[%c0_16, %c0_17, %c0_18] : memref<2x1x32xf32, #tpu.memory_space<vmem>>, vector<1x1x32xf32>
    %31 = vector.shape_cast %30 : vector<1x1x32xf32> to vector<1x32xf32>
    %cst_19 = arith.constant dense<0.000000e+00> : vector<32x32xf32>
    %32 = tpu.matmul %24, %0, %cst_19 {dimension_numbers = #tpu.dot_dimension_numbers<[1], [0], [0], [1], [0, 0, 1, 1], [], []>} : vector<32x32xf32>, vector<32x32xf32>, vector<32x32xf32> -> vector<32x32xf32>
    %cst_20 = arith.constant 3.125000e-02 : f32
    %33 = vector.broadcast %cst_20 : f32 to vector<32x32xf32>
    %34 = arith.mulf %32, %33 : vector<32x32xf32>
    %35 = arith.subf %24, %34 : vector<32x32xf32>
    %36 = arith.mulf %35, %35 : vector<32x32xf32>
    %cst_21 = arith.constant dense<0.000000e+00> : vector<32x32xf32>
    %37 = tpu.matmul %36, %0, %cst_21 {dimension_numbers = #tpu.dot_dimension_numbers<[1], [0], [0], [1], [0, 0, 1, 1], [], []>} : vector<32x32xf32>, vector<32x32xf32>, vector<32x32xf32> -> vector<32x32xf32>
    %cst_22 = arith.constant 3.125000e-02 : f32
    %38 = vector.broadcast %cst_22 : f32 to vector<32x32xf32>
    %39 = arith.mulf %37, %38 : vector<32x32xf32>
    %cst_23 = arith.constant 9.99999974E-6 : f32
    %40 = vector.broadcast %cst_23 : f32 to vector<32x32xf32>
    %41 = arith.addf %39, %40 : vector<32x32xf32>
    %42 = math.rsqrt %41 : vector<32x32xf32>
    %43 = arith.mulf %35, %42 : vector<32x32xf32>
    %44 = vector.broadcast %29 : vector<1x32xf32> to vector<32x32xf32>
    %45 = arith.mulf %43, %44 : vector<32x32xf32>
    %46 = vector.broadcast %31 : vector<1x32xf32> to vector<32x32xf32>
    %47 = arith.addf %45, %46 : vector<32x32xf32>
    %c0_24 = arith.constant 0 : index
    %c0_25 = arith.constant 0 : index
    %c0_26 = arith.constant 0 : index
    %48 = vector.load %arg5[%c0_24, %c0_25, %c0_26] : memref<2x32x160xf32, #tpu.memory_space<vmem>>, vector<1x32x160xf32>
    %49 = vector.shape_cast %48 : vector<1x32x160xf32> to vector<32x160xf32>
    %cst_27 = arith.constant dense<0.000000e+00> : vector<32x160xf32>
    %50 = tpu.matmul %47, %49, %cst_27 {dimension_numbers = #tpu.dot_dimension_numbers<[1], [0], [0], [1], [0, 0, 1, 1], [], []>} : vector<32x32xf32>, vector<32x160xf32>, vector<32x160xf32> -> vector<32x160xf32>
    %c0_28 = arith.constant 0 : index
    %c0_29 = arith.constant 0 : index
    %c0_30 = arith.constant 0 : index
    %51 = vector.load %arg6[%c0_28, %c0_29, %c0_30] : memref<2x1x160xf32, #tpu.memory_space<vmem>>, vector<1x1x160xf32>
    %52 = vector.shape_cast %51 : vector<1x1x160xf32> to vector<1x160xf32>
    %53 = vector.broadcast %52 : vector<1x160xf32> to vector<32x160xf32>
    %54 = arith.addf %50, %53 : vector<32x160xf32>
    %55 = vector.extract_strided_slice %54 {offsets = [0, 0], sizes = [32, 32], strides = [1, 1]} : vector<32x160xf32> to vector<32x32xf32>
    %56 = arith.mulf %55, %25 : vector<32x32xf32>
    %57 = vector.extract_strided_slice %54 {offsets = [0, 32], sizes = [32, 32], strides = [1, 1]} : vector<32x160xf32> to vector<32x32xf32>
    %58 = arith.mulf %57, %26 : vector<32x32xf32>
    %59 = arith.addf %56, %58 : vector<32x32xf32>
    %60 = vector.extract_strided_slice %54 {offsets = [0, 64], sizes = [32, 32], strides = [1, 1]} : vector<32x160xf32> to vector<32x32xf32>
    %61 = arith.mulf %60, %25 : vector<32x32xf32>
    %62 = vector.extract_strided_slice %54 {offsets = [0, 96], sizes = [32, 32], strides = [1, 1]} : vector<32x160xf32> to vector<32x32xf32>
    %63 = arith.mulf %62, %26 : vector<32x32xf32>
    %64 = arith.addf %61, %63 : vector<32x32xf32>
    %65 = vector.extract_strided_slice %54 {offsets = [0, 128], sizes = [32, 32], strides = [1, 1]} : vector<32x160xf32> to vector<32x32xf32>
    %c0_31 = arith.constant 0 : index
    %c0_32 = arith.constant 0 : index
    %c0_33 = arith.constant 0 : index
    %66 = vector.load %arg7[%c0_31, %c0_32, %c0_33] : memref<2x32x32xf32, #tpu.memory_space<vmem>>, vector<1x32x32xf32>
    %67 = vector.shape_cast %66 : vector<1x32x32xf32> to vector<32x32xf32>
    %68 = vector.extract_strided_slice %59 {offsets = [0, 0], sizes = [16, 32], strides = [1, 1]} : vector<32x32xf32> to vector<16x32xf32>
    %69 = vector.extract_strided_slice %64 {offsets = [0, 0], sizes = [16, 32], strides = [1, 1]} : vector<32x32xf32> to vector<16x32xf32>
    %70 = vector.extract_strided_slice %65 {offsets = [0, 0], sizes = [16, 32], strides = [1, 1]} : vector<32x32xf32> to vector<16x32xf32>
    %71 = vector.extract_strided_slice %68 {offsets = [0, 0], sizes = [16, 8], strides = [1, 1]} : vector<16x32xf32> to vector<16x8xf32>
    %72 = vector.extract_strided_slice %69 {offsets = [0, 0], sizes = [16, 8], strides = [1, 1]} : vector<16x32xf32> to vector<16x8xf32>
    %cst_34 = arith.constant dense<0.000000e+00> : vector<16x16xf32>
    %73 = tpu.matmul %71, %72, %cst_34 {dimension_numbers = #tpu.dot_dimension_numbers<[1], [1], [0], [0], [0, 0, 1, 0], [], []>} : vector<16x8xf32>, vector<16x8xf32>, vector<16x16xf32> -> vector<16x16xf32>
    %74 = arith.mulf %73, %27 : vector<16x16xf32>
    %cst_35 = arith.constant dense<0xFF800000> : vector<16xf32>
    %75 = vector.multi_reduction <maximumf>, %74, %cst_35 [1] : vector<16x16xf32> to vector<16xf32>
    %76 = vector.shape_cast %75 : vector<16xf32> to vector<16x1xf32>
    %77 = vector.broadcast %76 : vector<16x1xf32> to vector<16x16xf32>
    %78 = arith.subf %74, %77 : vector<16x16xf32>
    %79 = math.exp %78 : vector<16x16xf32>
    %cst_36 = arith.constant dense<0.000000e+00> : vector<16x16xf32>
    %80 = tpu.matmul %79, %1, %cst_36 {dimension_numbers = #tpu.dot_dimension_numbers<[1], [0], [0], [1], [0, 0, 1, 1], [], []>} : vector<16x16xf32>, vector<16x16xf32>, vector<16x16xf32> -> vector<16x16xf32>
    %81 = tpu.reciprocal %80 {approx = true} : vector<16x16xf32> -> vector<16x16xf32>
    %82 = arith.mulf %79, %81 : vector<16x16xf32>
    %83 = vector.extract_strided_slice %70 {offsets = [0, 0], sizes = [16, 8], strides = [1, 1]} : vector<16x32xf32> to vector<16x8xf32>
    %cst_37 = arith.constant dense<0.000000e+00> : vector<16x8xf32>
    %84 = tpu.matmul %82, %83, %cst_37 {dimension_numbers = #tpu.dot_dimension_numbers<[1], [0], [0], [1], [0, 0, 1, 1], [], []>} : vector<16x16xf32>, vector<16x8xf32>, vector<16x8xf32> -> vector<16x8xf32>
    %85 = vector.extract_strided_slice %67 {offsets = [0, 0], sizes = [8, 32], strides = [1, 1]} : vector<32x32xf32> to vector<8x32xf32>
    %cst_38 = arith.constant dense<0.000000e+00> : vector<16x32xf32>
    %86 = tpu.matmul %84, %85, %cst_38 {dimension_numbers = #tpu.dot_dimension_numbers<[1], [0], [0], [1], [0, 0, 1, 1], [], []>} : vector<16x8xf32>, vector<8x32xf32>, vector<16x32xf32> -> vector<16x32xf32>
    %87 = vector.extract_strided_slice %68 {offsets = [0, 8], sizes = [16, 8], strides = [1, 1]} : vector<16x32xf32> to vector<16x8xf32>
    %88 = vector.extract_strided_slice %69 {offsets = [0, 8], sizes = [16, 8], strides = [1, 1]} : vector<16x32xf32> to vector<16x8xf32>
    %cst_39 = arith.constant dense<0.000000e+00> : vector<16x16xf32>
    %89 = tpu.matmul %87, %88, %cst_39 {dimension_numbers = #tpu.dot_dimension_numbers<[1], [1], [0], [0], [0, 0, 1, 0], [], []>} : vector<16x8xf32>, vector<16x8xf32>, vector<16x16xf32> -> vector<16x16xf32>
    %90 = arith.mulf %89, %27 : vector<16x16xf32>
    %cst_40 = arith.constant dense<0xFF800000> : vector<16xf32>
    %91 = vector.multi_reduction <maximumf>, %90, %cst_40 [1] : vector<16x16xf32> to vector<16xf32>
    %92 = vector.shape_cast %91 : vector<16xf32> to vector<16x1xf32>
    %93 = vector.broadcast %92 : vector<16x1xf32> to vector<16x16xf32>
    %94 = arith.subf %90, %93 : vector<16x16xf32>
    %95 = math.exp %94 : vector<16x16xf32>
    %cst_41 = arith.constant dense<0.000000e+00> : vector<16x16xf32>
    %96 = tpu.matmul %95, %1, %cst_41 {dimension_numbers = #tpu.dot_dimension_numbers<[1], [0], [0], [1], [0, 0, 1, 1], [], []>} : vector<16x16xf32>, vector<16x16xf32>, vector<16x16xf32> -> vector<16x16xf32>
    %97 = tpu.reciprocal %96 {approx = true} : vector<16x16xf32> -> vector<16x16xf32>
    %98 = arith.mulf %95, %97 : vector<16x16xf32>
    %99 = vector.extract_strided_slice %70 {offsets = [0, 8], sizes = [16, 8], strides = [1, 1]} : vector<16x32xf32> to vector<16x8xf32>
    %cst_42 = arith.constant dense<0.000000e+00> : vector<16x8xf32>
    %100 = tpu.matmul %98, %99, %cst_42 {dimension_numbers = #tpu.dot_dimension_numbers<[1], [0], [0], [1], [0, 0, 1, 1], [], []>} : vector<16x16xf32>, vector<16x8xf32>, vector<16x8xf32> -> vector<16x8xf32>
    %101 = vector.extract_strided_slice %67 {offsets = [8, 0], sizes = [8, 32], strides = [1, 1]} : vector<32x32xf32> to vector<8x32xf32>
    %cst_43 = arith.constant dense<0.000000e+00> : vector<16x32xf32>
    %102 = tpu.matmul %100, %101, %cst_43 {dimension_numbers = #tpu.dot_dimension_numbers<[1], [0], [0], [1], [0, 0, 1, 1], [], []>} : vector<16x8xf32>, vector<8x32xf32>, vector<16x32xf32> -> vector<16x32xf32>
    %103 = arith.addf %86, %102 : vector<16x32xf32>
    %104 = vector.extract_strided_slice %68 {offsets = [0, 16], sizes = [16, 8], strides = [1, 1]} : vector<16x32xf32> to vector<16x8xf32>
    %105 = vector.extract_strided_slice %69 {offsets = [0, 16], sizes = [16, 8], strides = [1, 1]} : vector<16x32xf32> to vector<16x8xf32>
    %cst_44 = arith.constant dense<0.000000e+00> : vector<16x16xf32>
    %106 = tpu.matmul %104, %105, %cst_44 {dimension_numbers = #tpu.dot_dimension_numbers<[1], [1], [0], [0], [0, 0, 1, 0], [], []>} : vector<16x8xf32>, vector<16x8xf32>, vector<16x16xf32> -> vector<16x16xf32>
    %107 = arith.mulf %106, %27 : vector<16x16xf32>
    %cst_45 = arith.constant dense<0xFF800000> : vector<16xf32>
    %108 = vector.multi_reduction <maximumf>, %107, %cst_45 [1] : vector<16x16xf32> to vector<16xf32>
    %109 = vector.shape_cast %108 : vector<16xf32> to vector<16x1xf32>
    %110 = vector.broadcast %109 : vector<16x1xf32> to vector<16x16xf32>
    %111 = arith.subf %107, %110 : vector<16x16xf32>
    %112 = math.exp %111 : vector<16x16xf32>
    %cst_46 = arith.constant dense<0.000000e+00> : vector<16x16xf32>
    %113 = tpu.matmul %112, %1, %cst_46 {dimension_numbers = #tpu.dot_dimension_numbers<[1], [0], [0], [1], [0, 0, 1, 1], [], []>} : vector<16x16xf32>, vector<16x16xf32>, vector<16x16xf32> -> vector<16x16xf32>
    %114 = tpu.reciprocal %113 {approx = true} : vector<16x16xf32> -> vector<16x16xf32>
    %115 = arith.mulf %112, %114 : vector<16x16xf32>
    %116 = vector.extract_strided_slice %70 {offsets = [0, 16], sizes = [16, 8], strides = [1, 1]} : vector<16x32xf32> to vector<16x8xf32>
    %cst_47 = arith.constant dense<0.000000e+00> : vector<16x8xf32>
    %117 = tpu.matmul %115, %116, %cst_47 {dimension_numbers = #tpu.dot_dimension_numbers<[1], [0], [0], [1], [0, 0, 1, 1], [], []>} : vector<16x16xf32>, vector<16x8xf32>, vector<16x8xf32> -> vector<16x8xf32>
    %118 = vector.extract_strided_slice %67 {offsets = [16, 0], sizes = [8, 32], strides = [1, 1]} : vector<32x32xf32> to vector<8x32xf32>
    %cst_48 = arith.constant dense<0.000000e+00> : vector<16x32xf32>
    %119 = tpu.matmul %117, %118, %cst_48 {dimension_numbers = #tpu.dot_dimension_numbers<[1], [0], [0], [1], [0, 0, 1, 1], [], []>} : vector<16x8xf32>, vector<8x32xf32>, vector<16x32xf32> -> vector<16x32xf32>
    %120 = arith.addf %103, %119 : vector<16x32xf32>
    %121 = vector.extract_strided_slice %68 {offsets = [0, 24], sizes = [16, 8], strides = [1, 1]} : vector<16x32xf32> to vector<16x8xf32>
    %122 = vector.extract_strided_slice %69 {offsets = [0, 24], sizes = [16, 8], strides = [1, 1]} : vector<16x32xf32> to vector<16x8xf32>
    %cst_49 = arith.constant dense<0.000000e+00> : vector<16x16xf32>
    %123 = tpu.matmul %121, %122, %cst_49 {dimension_numbers = #tpu.dot_dimension_numbers<[1], [1], [0], [0], [0, 0, 1, 0], [], []>} : vector<16x8xf32>, vector<16x8xf32>, vector<16x16xf32> -> vector<16x16xf32>
    %124 = arith.mulf %123, %27 : vector<16x16xf32>
    %cst_50 = arith.constant dense<0xFF800000> : vector<16xf32>
    %125 = vector.multi_reduction <maximumf>, %124, %cst_50 [1] : vector<16x16xf32> to vector<16xf32>
    %126 = vector.shape_cast %125 : vector<16xf32> to vector<16x1xf32>
    %127 = vector.broadcast %126 : vector<16x1xf32> to vector<16x16xf32>
    %128 = arith.subf %124, %127 : vector<16x16xf32>
    %129 = math.exp %128 : vector<16x16xf32>
    %cst_51 = arith.constant dense<0.000000e+00> : vector<16x16xf32>
    %130 = tpu.matmul %129, %1, %cst_51 {dimension_numbers = #tpu.dot_dimension_numbers<[1], [0], [0], [1], [0, 0, 1, 1], [], []>} : vector<16x16xf32>, vector<16x16xf32>, vector<16x16xf32> -> vector<16x16xf32>
    %131 = tpu.reciprocal %130 {approx = true} : vector<16x16xf32> -> vector<16x16xf32>
    %132 = arith.mulf %129, %131 : vector<16x16xf32>
    %133 = vector.extract_strided_slice %70 {offsets = [0, 24], sizes = [16, 8], strides = [1, 1]} : vector<16x32xf32> to vector<16x8xf32>
    %cst_52 = arith.constant dense<0.000000e+00> : vector<16x8xf32>
    %134 = tpu.matmul %132, %133, %cst_52 {dimension_numbers = #tpu.dot_dimension_numbers<[1], [0], [0], [1], [0, 0, 1, 1], [], []>} : vector<16x16xf32>, vector<16x8xf32>, vector<16x8xf32> -> vector<16x8xf32>
    %135 = vector.extract_strided_slice %67 {offsets = [24, 0], sizes = [8, 32], strides = [1, 1]} : vector<32x32xf32> to vector<8x32xf32>
    %cst_53 = arith.constant dense<0.000000e+00> : vector<16x32xf32>
    %136 = tpu.matmul %134, %135, %cst_53 {dimension_numbers = #tpu.dot_dimension_numbers<[1], [0], [0], [1], [0, 0, 1, 1], [], []>} : vector<16x8xf32>, vector<8x32xf32>, vector<16x32xf32> -> vector<16x32xf32>
    %137 = arith.addf %120, %136 : vector<16x32xf32>
    %138 = vector.extract_strided_slice %59 {offsets = [16, 0], sizes = [16, 32], strides = [1, 1]} : vector<32x32xf32> to vector<16x32xf32>
    %139 = vector.extract_strided_slice %64 {offsets = [16, 0], sizes = [16, 32], strides = [1, 1]} : vector<32x32xf32> to vector<16x32xf32>
    %140 = vector.extract_strided_slice %65 {offsets = [16, 0], sizes = [16, 32], strides = [1, 1]} : vector<32x32xf32> to vector<16x32xf32>
    %141 = vector.extract_strided_slice %138 {offsets = [0, 0], sizes = [16, 8], strides = [1, 1]} : vector<16x32xf32> to vector<16x8xf32>
    %142 = vector.extract_strided_slice %139 {offsets = [0, 0], sizes = [16, 8], strides = [1, 1]} : vector<16x32xf32> to vector<16x8xf32>
    %cst_54 = arith.constant dense<0.000000e+00> : vector<16x16xf32>
    %143 = tpu.matmul %141, %142, %cst_54 {dimension_numbers = #tpu.dot_dimension_numbers<[1], [1], [0], [0], [0, 0, 1, 0], [], []>} : vector<16x8xf32>, vector<16x8xf32>, vector<16x16xf32> -> vector<16x16xf32>
    %144 = arith.mulf %143, %27 : vector<16x16xf32>
    %cst_55 = arith.constant dense<0xFF800000> : vector<16xf32>
    %145 = vector.multi_reduction <maximumf>, %144, %cst_55 [1] : vector<16x16xf32> to vector<16xf32>
    %146 = vector.shape_cast %145 : vector<16xf32> to vector<16x1xf32>
    %147 = vector.broadcast %146 : vector<16x1xf32> to vector<16x16xf32>
    %148 = arith.subf %144, %147 : vector<16x16xf32>
    %149 = math.exp %148 : vector<16x16xf32>
    %cst_56 = arith.constant dense<0.000000e+00> : vector<16x16xf32>
    %150 = tpu.matmul %149, %1, %cst_56 {dimension_numbers = #tpu.dot_dimension_numbers<[1], [0], [0], [1], [0, 0, 1, 1], [], []>} : vector<16x16xf32>, vector<16x16xf32>, vector<16x16xf32> -> vector<16x16xf32>
    %151 = tpu.reciprocal %150 {approx = true} : vector<16x16xf32> -> vector<16x16xf32>
    %152 = arith.mulf %149, %151 : vector<16x16xf32>
    %153 = vector.extract_strided_slice %140 {offsets = [0, 0], sizes = [16, 8], strides = [1, 1]} : vector<16x32xf32> to vector<16x8xf32>
    %cst_57 = arith.constant dense<0.000000e+00> : vector<16x8xf32>
    %154 = tpu.matmul %152, %153, %cst_57 {dimension_numbers = #tpu.dot_dimension_numbers<[1], [0], [0], [1], [0, 0, 1, 1], [], []>} : vector<16x16xf32>, vector<16x8xf32>, vector<16x8xf32> -> vector<16x8xf32>
    %155 = vector.extract_strided_slice %67 {offsets = [0, 0], sizes = [8, 32], strides = [1, 1]} : vector<32x32xf32> to vector<8x32xf32>
    %cst_58 = arith.constant dense<0.000000e+00> : vector<16x32xf32>
    %156 = tpu.matmul %154, %155, %cst_58 {dimension_numbers = #tpu.dot_dimension_numbers<[1], [0], [0], [1], [0, 0, 1, 1], [], []>} : vector<16x8xf32>, vector<8x32xf32>, vector<16x32xf32> -> vector<16x32xf32>
    %157 = vector.extract_strided_slice %138 {offsets = [0, 8], sizes = [16, 8], strides = [1, 1]} : vector<16x32xf32> to vector<16x8xf32>
    %158 = vector.extract_strided_slice %139 {offsets = [0, 8], sizes = [16, 8], strides = [1, 1]} : vector<16x32xf32> to vector<16x8xf32>
    %cst_59 = arith.constant dense<0.000000e+00> : vector<16x16xf32>
    %159 = tpu.matmul %157, %158, %cst_59 {dimension_numbers = #tpu.dot_dimension_numbers<[1], [1], [0], [0], [0, 0, 1, 0], [], []>} : vector<16x8xf32>, vector<16x8xf32>, vector<16x16xf32> -> vector<16x16xf32>
    %160 = arith.mulf %159, %27 : vector<16x16xf32>
    %cst_60 = arith.constant dense<0xFF800000> : vector<16xf32>
    %161 = vector.multi_reduction <maximumf>, %160, %cst_60 [1] : vector<16x16xf32> to vector<16xf32>
    %162 = vector.shape_cast %161 : vector<16xf32> to vector<16x1xf32>
    %163 = vector.broadcast %162 : vector<16x1xf32> to vector<16x16xf32>
    %164 = arith.subf %160, %163 : vector<16x16xf32>
    %165 = math.exp %164 : vector<16x16xf32>
    %cst_61 = arith.constant dense<0.000000e+00> : vector<16x16xf32>
    %166 = tpu.matmul %165, %1, %cst_61 {dimension_numbers = #tpu.dot_dimension_numbers<[1], [0], [0], [1], [0, 0, 1, 1], [], []>} : vector<16x16xf32>, vector<16x16xf32>, vector<16x16xf32> -> vector<16x16xf32>
    %167 = tpu.reciprocal %166 {approx = true} : vector<16x16xf32> -> vector<16x16xf32>
    %168 = arith.mulf %165, %167 : vector<16x16xf32>
    %169 = vector.extract_strided_slice %140 {offsets = [0, 8], sizes = [16, 8], strides = [1, 1]} : vector<16x32xf32> to vector<16x8xf32>
    %cst_62 = arith.constant dense<0.000000e+00> : vector<16x8xf32>
    %170 = tpu.matmul %168, %169, %cst_62 {dimension_numbers = #tpu.dot_dimension_numbers<[1], [0], [0], [1], [0, 0, 1, 1], [], []>} : vector<16x16xf32>, vector<16x8xf32>, vector<16x8xf32> -> vector<16x8xf32>
    %171 = vector.extract_strided_slice %67 {offsets = [8, 0], sizes = [8, 32], strides = [1, 1]} : vector<32x32xf32> to vector<8x32xf32>
    %cst_63 = arith.constant dense<0.000000e+00> : vector<16x32xf32>
    %172 = tpu.matmul %170, %171, %cst_63 {dimension_numbers = #tpu.dot_dimension_numbers<[1], [0], [0], [1], [0, 0, 1, 1], [], []>} : vector<16x8xf32>, vector<8x32xf32>, vector<16x32xf32> -> vector<16x32xf32>
    %173 = arith.addf %156, %172 : vector<16x32xf32>
    %174 = vector.extract_strided_slice %138 {offsets = [0, 16], sizes = [16, 8], strides = [1, 1]} : vector<16x32xf32> to vector<16x8xf32>
    %175 = vector.extract_strided_slice %139 {offsets = [0, 16], sizes = [16, 8], strides = [1, 1]} : vector<16x32xf32> to vector<16x8xf32>
    %cst_64 = arith.constant dense<0.000000e+00> : vector<16x16xf32>
    %176 = tpu.matmul %174, %175, %cst_64 {dimension_numbers = #tpu.dot_dimension_numbers<[1], [1], [0], [0], [0, 0, 1, 0], [], []>} : vector<16x8xf32>, vector<16x8xf32>, vector<16x16xf32> -> vector<16x16xf32>
    %177 = arith.mulf %176, %27 : vector<16x16xf32>
    %cst_65 = arith.constant dense<0xFF800000> : vector<16xf32>
    %178 = vector.multi_reduction <maximumf>, %177, %cst_65 [1] : vector<16x16xf32> to vector<16xf32>
    %179 = vector.shape_cast %178 : vector<16xf32> to vector<16x1xf32>
    %180 = vector.broadcast %179 : vector<16x1xf32> to vector<16x16xf32>
    %181 = arith.subf %177, %180 : vector<16x16xf32>
    %182 = math.exp %181 : vector<16x16xf32>
    %cst_66 = arith.constant dense<0.000000e+00> : vector<16x16xf32>
    %183 = tpu.matmul %182, %1, %cst_66 {dimension_numbers = #tpu.dot_dimension_numbers<[1], [0], [0], [1], [0, 0, 1, 1], [], []>} : vector<16x16xf32>, vector<16x16xf32>, vector<16x16xf32> -> vector<16x16xf32>
    %184 = tpu.reciprocal %183 {approx = true} : vector<16x16xf32> -> vector<16x16xf32>
    %185 = arith.mulf %182, %184 : vector<16x16xf32>
    %186 = vector.extract_strided_slice %140 {offsets = [0, 16], sizes = [16, 8], strides = [1, 1]} : vector<16x32xf32> to vector<16x8xf32>
    %cst_67 = arith.constant dense<0.000000e+00> : vector<16x8xf32>
    %187 = tpu.matmul %185, %186, %cst_67 {dimension_numbers = #tpu.dot_dimension_numbers<[1], [0], [0], [1], [0, 0, 1, 1], [], []>} : vector<16x16xf32>, vector<16x8xf32>, vector<16x8xf32> -> vector<16x8xf32>
    %188 = vector.extract_strided_slice %67 {offsets = [16, 0], sizes = [8, 32], strides = [1, 1]} : vector<32x32xf32> to vector<8x32xf32>
    %cst_68 = arith.constant dense<0.000000e+00> : vector<16x32xf32>
    %189 = tpu.matmul %187, %188, %cst_68 {dimension_numbers = #tpu.dot_dimension_numbers<[1], [0], [0], [1], [0, 0, 1, 1], [], []>} : vector<16x8xf32>, vector<8x32xf32>, vector<16x32xf32> -> vector<16x32xf32>
    %190 = arith.addf %173, %189 : vector<16x32xf32>
    %191 = vector.extract_strided_slice %138 {offsets = [0, 24], sizes = [16, 8], strides = [1, 1]} : vector<16x32xf32> to vector<16x8xf32>
    %192 = vector.extract_strided_slice %139 {offsets = [0, 24], sizes = [16, 8], strides = [1, 1]} : vector<16x32xf32> to vector<16x8xf32>
    %cst_69 = arith.constant dense<0.000000e+00> : vector<16x16xf32>
    %193 = tpu.matmul %191, %192, %cst_69 {dimension_numbers = #tpu.dot_dimension_numbers<[1], [1], [0], [0], [0, 0, 1, 0], [], []>} : vector<16x8xf32>, vector<16x8xf32>, vector<16x16xf32> -> vector<16x16xf32>
    %194 = arith.mulf %193, %27 : vector<16x16xf32>
    %cst_70 = arith.constant dense<0xFF800000> : vector<16xf32>
    %195 = vector.multi_reduction <maximumf>, %194, %cst_70 [1] : vector<16x16xf32> to vector<16xf32>
    %196 = vector.shape_cast %195 : vector<16xf32> to vector<16x1xf32>
    %197 = vector.broadcast %196 : vector<16x1xf32> to vector<16x16xf32>
    %198 = arith.subf %194, %197 : vector<16x16xf32>
    %199 = math.exp %198 : vector<16x16xf32>
    %cst_71 = arith.constant dense<0.000000e+00> : vector<16x16xf32>
    %200 = tpu.matmul %199, %1, %cst_71 {dimension_numbers = #tpu.dot_dimension_numbers<[1], [0], [0], [1], [0, 0, 1, 1], [], []>} : vector<16x16xf32>, vector<16x16xf32>, vector<16x16xf32> -> vector<16x16xf32>
    %201 = tpu.reciprocal %200 {approx = true} : vector<16x16xf32> -> vector<16x16xf32>
    %202 = arith.mulf %199, %201 : vector<16x16xf32>
    %203 = vector.extract_strided_slice %140 {offsets = [0, 24], sizes = [16, 8], strides = [1, 1]} : vector<16x32xf32> to vector<16x8xf32>
    %cst_72 = arith.constant dense<0.000000e+00> : vector<16x8xf32>
    %204 = tpu.matmul %202, %203, %cst_72 {dimension_numbers = #tpu.dot_dimension_numbers<[1], [0], [0], [1], [0, 0, 1, 1], [], []>} : vector<16x16xf32>, vector<16x8xf32>, vector<16x8xf32> -> vector<16x8xf32>
    %205 = vector.extract_strided_slice %67 {offsets = [24, 0], sizes = [8, 32], strides = [1, 1]} : vector<32x32xf32> to vector<8x32xf32>
    %cst_73 = arith.constant dense<0.000000e+00> : vector<16x32xf32>
    %206 = tpu.matmul %204, %205, %cst_73 {dimension_numbers = #tpu.dot_dimension_numbers<[1], [0], [0], [1], [0, 0, 1, 1], [], []>} : vector<16x8xf32>, vector<8x32xf32>, vector<16x32xf32> -> vector<16x32xf32>
    %207 = arith.addf %190, %206 : vector<16x32xf32>
    %208 = tpu.concatenate %137, %207 in 0 : vector<16x32xf32>, vector<16x32xf32> -> vector<32x32xf32>
    %209 = arith.addf %24, %208 : vector<32x32xf32>
    %c0_74 = arith.constant 0 : index
    %c0_75 = arith.constant 0 : index
    %c0_76 = arith.constant 0 : index
    %210 = vector.load %arg8[%c0_74, %c0_75, %c0_76] : memref<2x1x32xf32, #tpu.memory_space<vmem>>, vector<1x1x32xf32>
    %211 = vector.shape_cast %210 : vector<1x1x32xf32> to vector<1x32xf32>
    %212 = vector.broadcast %211 : vector<1x32xf32> to vector<32x32xf32>
    %213 = arith.addf %209, %212 : vector<32x32xf32>
    %c0_77 = arith.constant 0 : index
    %c0_78 = arith.constant 0 : index
    %c0_79 = arith.constant 0 : index
    %214 = vector.load %arg9[%c0_77, %c0_78, %c0_79] : memref<2x1x32xf32, #tpu.memory_space<vmem>>, vector<1x1x32xf32>
    %215 = vector.shape_cast %214 : vector<1x1x32xf32> to vector<1x32xf32>
    %c0_80 = arith.constant 0 : index
    %c0_81 = arith.constant 0 : index
    %c0_82 = arith.constant 0 : index
    %216 = vector.load %arg10[%c0_80, %c0_81, %c0_82] : memref<2x1x32xf32, #tpu.memory_space<vmem>>, vector<1x1x32xf32>
    %217 = vector.shape_cast %216 : vector<1x1x32xf32> to vector<1x32xf32>
    %cst_83 = arith.constant dense<0.000000e+00> : vector<32x32xf32>
    %218 = tpu.matmul %213, %0, %cst_83 {dimension_numbers = #tpu.dot_dimension_numbers<[1], [0], [0], [1], [0, 0, 1, 1], [], []>} : vector<32x32xf32>, vector<32x32xf32>, vector<32x32xf32> -> vector<32x32xf32>
    %cst_84 = arith.constant 3.125000e-02 : f32
    %219 = vector.broadcast %cst_84 : f32 to vector<32x32xf32>
    %220 = arith.mulf %218, %219 : vector<32x32xf32>
    %221 = arith.subf %213, %220 : vector<32x32xf32>
    %222 = arith.mulf %221, %221 : vector<32x32xf32>
    %cst_85 = arith.constant dense<0.000000e+00> : vector<32x32xf32>
    %223 = tpu.matmul %222, %0, %cst_85 {dimension_numbers = #tpu.dot_dimension_numbers<[1], [0], [0], [1], [0, 0, 1, 1], [], []>} : vector<32x32xf32>, vector<32x32xf32>, vector<32x32xf32> -> vector<32x32xf32>
    %cst_86 = arith.constant 3.125000e-02 : f32
    %224 = vector.broadcast %cst_86 : f32 to vector<32x32xf32>
    %225 = arith.mulf %223, %224 : vector<32x32xf32>
    %cst_87 = arith.constant 9.99999974E-6 : f32
    %226 = vector.broadcast %cst_87 : f32 to vector<32x32xf32>
    %227 = arith.addf %225, %226 : vector<32x32xf32>
    %228 = math.rsqrt %227 : vector<32x32xf32>
    %229 = arith.mulf %221, %228 : vector<32x32xf32>
    %230 = vector.broadcast %215 : vector<1x32xf32> to vector<32x32xf32>
    %231 = arith.mulf %229, %230 : vector<32x32xf32>
    %232 = vector.broadcast %217 : vector<1x32xf32> to vector<32x32xf32>
    %233 = arith.addf %231, %232 : vector<32x32xf32>
    %c0_88 = arith.constant 0 : index
    %c0_89 = arith.constant 0 : index
    %c0_90 = arith.constant 0 : index
    %234 = vector.load %arg11[%c0_88, %c0_89, %c0_90] : memref<2x32x64xf32, #tpu.memory_space<vmem>>, vector<1x32x64xf32>
    %235 = vector.shape_cast %234 : vector<1x32x64xf32> to vector<32x64xf32>
    %cst_91 = arith.constant dense<0.000000e+00> : vector<32x64xf32>
    %236 = tpu.matmul %233, %235, %cst_91 {dimension_numbers = #tpu.dot_dimension_numbers<[1], [0], [0], [1], [0, 0, 1, 1], [], []>} : vector<32x32xf32>, vector<32x64xf32>, vector<32x64xf32> -> vector<32x64xf32>
    %c0_92 = arith.constant 0 : index
    %c0_93 = arith.constant 0 : index
    %c0_94 = arith.constant 0 : index
    %237 = vector.load %arg12[%c0_92, %c0_93, %c0_94] : memref<2x1x64xf32, #tpu.memory_space<vmem>>, vector<1x1x64xf32>
    %238 = vector.shape_cast %237 : vector<1x1x64xf32> to vector<1x64xf32>
    %239 = vector.broadcast %238 : vector<1x64xf32> to vector<32x64xf32>
    %240 = arith.addf %236, %239 : vector<32x64xf32>
    %241 = arith.mulf %240, %240 : vector<32x64xf32>
    %242 = arith.mulf %240, %241 : vector<32x64xf32>
    %cst_95 = arith.constant 4.471500e-02 : f32
    %243 = vector.broadcast %cst_95 : f32 to vector<32x64xf32>
    %244 = arith.mulf %243, %242 : vector<32x64xf32>
    %245 = arith.addf %240, %244 : vector<32x64xf32>
    %cst_96 = arith.constant 0.797884583 : f32
    %246 = vector.broadcast %cst_96 : f32 to vector<32x64xf32>
    %247 = arith.mulf %246, %245 : vector<32x64xf32>
    %248 = math.tanh %247 : vector<32x64xf32>
    %cst_97 = arith.constant 1.000000e+00 : f32
    %249 = vector.broadcast %cst_97 : f32 to vector<32x64xf32>
    %250 = arith.addf %249, %248 : vector<32x64xf32>
    %cst_98 = arith.constant 5.000000e-01 : f32
    %251 = vector.broadcast %cst_98 : f32 to vector<32x64xf32>
    %252 = arith.mulf %251, %250 : vector<32x64xf32>
    %253 = arith.mulf %240, %252 : vector<32x64xf32>
    %c0_99 = arith.constant 0 : index
    %c0_100 = arith.constant 0 : index
    %c0_101 = arith.constant 0 : index
    %254 = vector.load %arg13[%c0_99, %c0_100, %c0_101] : memref<2x64x32xf32, #tpu.memory_space<vmem>>, vector<1x64x32xf32>
    %255 = vector.shape_cast %254 : vector<1x64x32xf32> to vector<64x32xf32>
    %cst_102 = arith.constant dense<0.000000e+00> : vector<32x32xf32>
    %256 = tpu.matmul %253, %255, %cst_102 {dimension_numbers = #tpu.dot_dimension_numbers<[1], [0], [0], [1], [0, 0, 1, 1], [], []>} : vector<32x64xf32>, vector<64x32xf32>, vector<32x32xf32> -> vector<32x32xf32>
    %257 = arith.addf %213, %256 : vector<32x32xf32>
    %c0_103 = arith.constant 0 : index
    %c0_104 = arith.constant 0 : index
    %c0_105 = arith.constant 0 : index
    %258 = vector.load %arg14[%c0_103, %c0_104, %c0_105] : memref<2x1x32xf32, #tpu.memory_space<vmem>>, vector<1x1x32xf32>
    %259 = vector.shape_cast %258 : vector<1x1x32xf32> to vector<1x32xf32>
    %260 = vector.broadcast %259 : vector<1x32xf32> to vector<32x32xf32>
    %261 = arith.addf %257, %260 : vector<32x32xf32>
    %c1 = arith.constant 1 : index
    %c0_106 = arith.constant 0 : index
    %c0_107 = arith.constant 0 : index
    %262 = vector.load %arg3[%c1, %c0_106, %c0_107] : memref<2x1x32xf32, #tpu.memory_space<vmem>>, vector<1x1x32xf32>
    %263 = vector.shape_cast %262 : vector<1x1x32xf32> to vector<1x32xf32>
    %c1_108 = arith.constant 1 : index
    %c0_109 = arith.constant 0 : index
    %c0_110 = arith.constant 0 : index
    %264 = vector.load %arg4[%c1_108, %c0_109, %c0_110] : memref<2x1x32xf32, #tpu.memory_space<vmem>>, vector<1x1x32xf32>
    %265 = vector.shape_cast %264 : vector<1x1x32xf32> to vector<1x32xf32>
    %cst_111 = arith.constant dense<0.000000e+00> : vector<32x32xf32>
    %266 = tpu.matmul %261, %0, %cst_111 {dimension_numbers = #tpu.dot_dimension_numbers<[1], [0], [0], [1], [0, 0, 1, 1], [], []>} : vector<32x32xf32>, vector<32x32xf32>, vector<32x32xf32> -> vector<32x32xf32>
    %cst_112 = arith.constant 3.125000e-02 : f32
    %267 = vector.broadcast %cst_112 : f32 to vector<32x32xf32>
    %268 = arith.mulf %266, %267 : vector<32x32xf32>
    %269 = arith.subf %261, %268 : vector<32x32xf32>
    %270 = arith.mulf %269, %269 : vector<32x32xf32>
    %cst_113 = arith.constant dense<0.000000e+00> : vector<32x32xf32>
    %271 = tpu.matmul %270, %0, %cst_113 {dimension_numbers = #tpu.dot_dimension_numbers<[1], [0], [0], [1], [0, 0, 1, 1], [], []>} : vector<32x32xf32>, vector<32x32xf32>, vector<32x32xf32> -> vector<32x32xf32>
    %cst_114 = arith.constant 3.125000e-02 : f32
    %272 = vector.broadcast %cst_114 : f32 to vector<32x32xf32>
    %273 = arith.mulf %271, %272 : vector<32x32xf32>
    %cst_115 = arith.constant 9.99999974E-6 : f32
    %274 = vector.broadcast %cst_115 : f32 to vector<32x32xf32>
    %275 = arith.addf %273, %274 : vector<32x32xf32>
    %276 = math.rsqrt %275 : vector<32x32xf32>
    %277 = arith.mulf %269, %276 : vector<32x32xf32>
    %278 = vector.broadcast %263 : vector<1x32xf32> to vector<32x32xf32>
    %279 = arith.mulf %277, %278 : vector<32x32xf32>
    %280 = vector.broadcast %265 : vector<1x32xf32> to vector<32x32xf32>
    %281 = arith.addf %279, %280 : vector<32x32xf32>
    %c1_116 = arith.constant 1 : index
    %c0_117 = arith.constant 0 : index
    %c0_118 = arith.constant 0 : index
    %282 = vector.load %arg5[%c1_116, %c0_117, %c0_118] : memref<2x32x160xf32, #tpu.memory_space<vmem>>, vector<1x32x160xf32>
    %283 = vector.shape_cast %282 : vector<1x32x160xf32> to vector<32x160xf32>
    %cst_119 = arith.constant dense<0.000000e+00> : vector<32x160xf32>
    %284 = tpu.matmul %281, %283, %cst_119 {dimension_numbers = #tpu.dot_dimension_numbers<[1], [0], [0], [1], [0, 0, 1, 1], [], []>} : vector<32x32xf32>, vector<32x160xf32>, vector<32x160xf32> -> vector<32x160xf32>
    %c1_120 = arith.constant 1 : index
    %c0_121 = arith.constant 0 : index
    %c0_122 = arith.constant 0 : index
    %285 = vector.load %arg6[%c1_120, %c0_121, %c0_122] : memref<2x1x160xf32, #tpu.memory_space<vmem>>, vector<1x1x160xf32>
    %286 = vector.shape_cast %285 : vector<1x1x160xf32> to vector<1x160xf32>
    %287 = vector.broadcast %286 : vector<1x160xf32> to vector<32x160xf32>
    %288 = arith.addf %284, %287 : vector<32x160xf32>
    %289 = vector.extract_strided_slice %288 {offsets = [0, 0], sizes = [32, 32], strides = [1, 1]} : vector<32x160xf32> to vector<32x32xf32>
    %290 = arith.mulf %289, %25 : vector<32x32xf32>
    %291 = vector.extract_strided_slice %288 {offsets = [0, 32], sizes = [32, 32], strides = [1, 1]} : vector<32x160xf32> to vector<32x32xf32>
    %292 = arith.mulf %291, %26 : vector<32x32xf32>
    %293 = arith.addf %290, %292 : vector<32x32xf32>
    %294 = vector.extract_strided_slice %288 {offsets = [0, 64], sizes = [32, 32], strides = [1, 1]} : vector<32x160xf32> to vector<32x32xf32>
    %295 = arith.mulf %294, %25 : vector<32x32xf32>
    %296 = vector.extract_strided_slice %288 {offsets = [0, 96], sizes = [32, 32], strides = [1, 1]} : vector<32x160xf32> to vector<32x32xf32>
    %297 = arith.mulf %296, %26 : vector<32x32xf32>
    %298 = arith.addf %295, %297 : vector<32x32xf32>
    %299 = vector.extract_strided_slice %288 {offsets = [0, 128], sizes = [32, 32], strides = [1, 1]} : vector<32x160xf32> to vector<32x32xf32>
    %c1_123 = arith.constant 1 : index
    %c0_124 = arith.constant 0 : index
    %c0_125 = arith.constant 0 : index
    %300 = vector.load %arg7[%c1_123, %c0_124, %c0_125] : memref<2x32x32xf32, #tpu.memory_space<vmem>>, vector<1x32x32xf32>
    %301 = vector.shape_cast %300 : vector<1x32x32xf32> to vector<32x32xf32>
    %302 = vector.extract_strided_slice %293 {offsets = [0, 0], sizes = [16, 32], strides = [1, 1]} : vector<32x32xf32> to vector<16x32xf32>
    %303 = vector.extract_strided_slice %298 {offsets = [0, 0], sizes = [16, 32], strides = [1, 1]} : vector<32x32xf32> to vector<16x32xf32>
    %304 = vector.extract_strided_slice %299 {offsets = [0, 0], sizes = [16, 32], strides = [1, 1]} : vector<32x32xf32> to vector<16x32xf32>
    %305 = vector.extract_strided_slice %302 {offsets = [0, 0], sizes = [16, 8], strides = [1, 1]} : vector<16x32xf32> to vector<16x8xf32>
    %306 = vector.extract_strided_slice %303 {offsets = [0, 0], sizes = [16, 8], strides = [1, 1]} : vector<16x32xf32> to vector<16x8xf32>
    %cst_126 = arith.constant dense<0.000000e+00> : vector<16x16xf32>
    %307 = tpu.matmul %305, %306, %cst_126 {dimension_numbers = #tpu.dot_dimension_numbers<[1], [1], [0], [0], [0, 0, 1, 0], [], []>} : vector<16x8xf32>, vector<16x8xf32>, vector<16x16xf32> -> vector<16x16xf32>
    %308 = arith.mulf %307, %27 : vector<16x16xf32>
    %cst_127 = arith.constant dense<0xFF800000> : vector<16xf32>
    %309 = vector.multi_reduction <maximumf>, %308, %cst_127 [1] : vector<16x16xf32> to vector<16xf32>
    %310 = vector.shape_cast %309 : vector<16xf32> to vector<16x1xf32>
    %311 = vector.broadcast %310 : vector<16x1xf32> to vector<16x16xf32>
    %312 = arith.subf %308, %311 : vector<16x16xf32>
    %313 = math.exp %312 : vector<16x16xf32>
    %cst_128 = arith.constant dense<0.000000e+00> : vector<16x16xf32>
    %314 = tpu.matmul %313, %1, %cst_128 {dimension_numbers = #tpu.dot_dimension_numbers<[1], [0], [0], [1], [0, 0, 1, 1], [], []>} : vector<16x16xf32>, vector<16x16xf32>, vector<16x16xf32> -> vector<16x16xf32>
    %315 = tpu.reciprocal %314 {approx = true} : vector<16x16xf32> -> vector<16x16xf32>
    %316 = arith.mulf %313, %315 : vector<16x16xf32>
    %317 = vector.extract_strided_slice %304 {offsets = [0, 0], sizes = [16, 8], strides = [1, 1]} : vector<16x32xf32> to vector<16x8xf32>
    %cst_129 = arith.constant dense<0.000000e+00> : vector<16x8xf32>
    %318 = tpu.matmul %316, %317, %cst_129 {dimension_numbers = #tpu.dot_dimension_numbers<[1], [0], [0], [1], [0, 0, 1, 1], [], []>} : vector<16x16xf32>, vector<16x8xf32>, vector<16x8xf32> -> vector<16x8xf32>
    %319 = vector.extract_strided_slice %301 {offsets = [0, 0], sizes = [8, 32], strides = [1, 1]} : vector<32x32xf32> to vector<8x32xf32>
    %cst_130 = arith.constant dense<0.000000e+00> : vector<16x32xf32>
    %320 = tpu.matmul %318, %319, %cst_130 {dimension_numbers = #tpu.dot_dimension_numbers<[1], [0], [0], [1], [0, 0, 1, 1], [], []>} : vector<16x8xf32>, vector<8x32xf32>, vector<16x32xf32> -> vector<16x32xf32>
    %321 = vector.extract_strided_slice %302 {offsets = [0, 8], sizes = [16, 8], strides = [1, 1]} : vector<16x32xf32> to vector<16x8xf32>
    %322 = vector.extract_strided_slice %303 {offsets = [0, 8], sizes = [16, 8], strides = [1, 1]} : vector<16x32xf32> to vector<16x8xf32>
    %cst_131 = arith.constant dense<0.000000e+00> : vector<16x16xf32>
    %323 = tpu.matmul %321, %322, %cst_131 {dimension_numbers = #tpu.dot_dimension_numbers<[1], [1], [0], [0], [0, 0, 1, 0], [], []>} : vector<16x8xf32>, vector<16x8xf32>, vector<16x16xf32> -> vector<16x16xf32>
    %324 = arith.mulf %323, %27 : vector<16x16xf32>
    %cst_132 = arith.constant dense<0xFF800000> : vector<16xf32>
    %325 = vector.multi_reduction <maximumf>, %324, %cst_132 [1] : vector<16x16xf32> to vector<16xf32>
    %326 = vector.shape_cast %325 : vector<16xf32> to vector<16x1xf32>
    %327 = vector.broadcast %326 : vector<16x1xf32> to vector<16x16xf32>
    %328 = arith.subf %324, %327 : vector<16x16xf32>
    %329 = math.exp %328 : vector<16x16xf32>
    %cst_133 = arith.constant dense<0.000000e+00> : vector<16x16xf32>
    %330 = tpu.matmul %329, %1, %cst_133 {dimension_numbers = #tpu.dot_dimension_numbers<[1], [0], [0], [1], [0, 0, 1, 1], [], []>} : vector<16x16xf32>, vector<16x16xf32>, vector<16x16xf32> -> vector<16x16xf32>
    %331 = tpu.reciprocal %330 {approx = true} : vector<16x16xf32> -> vector<16x16xf32>
    %332 = arith.mulf %329, %331 : vector<16x16xf32>
    %333 = vector.extract_strided_slice %304 {offsets = [0, 8], sizes = [16, 8], strides = [1, 1]} : vector<16x32xf32> to vector<16x8xf32>
    %cst_134 = arith.constant dense<0.000000e+00> : vector<16x8xf32>
    %334 = tpu.matmul %332, %333, %cst_134 {dimension_numbers = #tpu.dot_dimension_numbers<[1], [0], [0], [1], [0, 0, 1, 1], [], []>} : vector<16x16xf32>, vector<16x8xf32>, vector<16x8xf32> -> vector<16x8xf32>
    %335 = vector.extract_strided_slice %301 {offsets = [8, 0], sizes = [8, 32], strides = [1, 1]} : vector<32x32xf32> to vector<8x32xf32>
    %cst_135 = arith.constant dense<0.000000e+00> : vector<16x32xf32>
    %336 = tpu.matmul %334, %335, %cst_135 {dimension_numbers = #tpu.dot_dimension_numbers<[1], [0], [0], [1], [0, 0, 1, 1], [], []>} : vector<16x8xf32>, vector<8x32xf32>, vector<16x32xf32> -> vector<16x32xf32>
    %337 = arith.addf %320, %336 : vector<16x32xf32>
    %338 = vector.extract_strided_slice %302 {offsets = [0, 16], sizes = [16, 8], strides = [1, 1]} : vector<16x32xf32> to vector<16x8xf32>
    %339 = vector.extract_strided_slice %303 {offsets = [0, 16], sizes = [16, 8], strides = [1, 1]} : vector<16x32xf32> to vector<16x8xf32>
    %cst_136 = arith.constant dense<0.000000e+00> : vector<16x16xf32>
    %340 = tpu.matmul %338, %339, %cst_136 {dimension_numbers = #tpu.dot_dimension_numbers<[1], [1], [0], [0], [0, 0, 1, 0], [], []>} : vector<16x8xf32>, vector<16x8xf32>, vector<16x16xf32> -> vector<16x16xf32>
    %341 = arith.mulf %340, %27 : vector<16x16xf32>
    %cst_137 = arith.constant dense<0xFF800000> : vector<16xf32>
    %342 = vector.multi_reduction <maximumf>, %341, %cst_137 [1] : vector<16x16xf32> to vector<16xf32>
    %343 = vector.shape_cast %342 : vector<16xf32> to vector<16x1xf32>
    %344 = vector.broadcast %343 : vector<16x1xf32> to vector<16x16xf32>
    %345 = arith.subf %341, %344 : vector<16x16xf32>
    %346 = math.exp %345 : vector<16x16xf32>
    %cst_138 = arith.constant dense<0.000000e+00> : vector<16x16xf32>
    %347 = tpu.matmul %346, %1, %cst_138 {dimension_numbers = #tpu.dot_dimension_numbers<[1], [0], [0], [1], [0, 0, 1, 1], [], []>} : vector<16x16xf32>, vector<16x16xf32>, vector<16x16xf32> -> vector<16x16xf32>
    %348 = tpu.reciprocal %347 {approx = true} : vector<16x16xf32> -> vector<16x16xf32>
    %349 = arith.mulf %346, %348 : vector<16x16xf32>
    %350 = vector.extract_strided_slice %304 {offsets = [0, 16], sizes = [16, 8], strides = [1, 1]} : vector<16x32xf32> to vector<16x8xf32>
    %cst_139 = arith.constant dense<0.000000e+00> : vector<16x8xf32>
    %351 = tpu.matmul %349, %350, %cst_139 {dimension_numbers = #tpu.dot_dimension_numbers<[1], [0], [0], [1], [0, 0, 1, 1], [], []>} : vector<16x16xf32>, vector<16x8xf32>, vector<16x8xf32> -> vector<16x8xf32>
    %352 = vector.extract_strided_slice %301 {offsets = [16, 0], sizes = [8, 32], strides = [1, 1]} : vector<32x32xf32> to vector<8x32xf32>
    %cst_140 = arith.constant dense<0.000000e+00> : vector<16x32xf32>
    %353 = tpu.matmul %351, %352, %cst_140 {dimension_numbers = #tpu.dot_dimension_numbers<[1], [0], [0], [1], [0, 0, 1, 1], [], []>} : vector<16x8xf32>, vector<8x32xf32>, vector<16x32xf32> -> vector<16x32xf32>
    %354 = arith.addf %337, %353 : vector<16x32xf32>
    %355 = vector.extract_strided_slice %302 {offsets = [0, 24], sizes = [16, 8], strides = [1, 1]} : vector<16x32xf32> to vector<16x8xf32>
    %356 = vector.extract_strided_slice %303 {offsets = [0, 24], sizes = [16, 8], strides = [1, 1]} : vector<16x32xf32> to vector<16x8xf32>
    %cst_141 = arith.constant dense<0.000000e+00> : vector<16x16xf32>
    %357 = tpu.matmul %355, %356, %cst_141 {dimension_numbers = #tpu.dot_dimension_numbers<[1], [1], [0], [0], [0, 0, 1, 0], [], []>} : vector<16x8xf32>, vector<16x8xf32>, vector<16x16xf32> -> vector<16x16xf32>
    %358 = arith.mulf %357, %27 : vector<16x16xf32>
    %cst_142 = arith.constant dense<0xFF800000> : vector<16xf32>
    %359 = vector.multi_reduction <maximumf>, %358, %cst_142 [1] : vector<16x16xf32> to vector<16xf32>
    %360 = vector.shape_cast %359 : vector<16xf32> to vector<16x1xf32>
    %361 = vector.broadcast %360 : vector<16x1xf32> to vector<16x16xf32>
    %362 = arith.subf %358, %361 : vector<16x16xf32>
    %363 = math.exp %362 : vector<16x16xf32>
    %cst_143 = arith.constant dense<0.000000e+00> : vector<16x16xf32>
    %364 = tpu.matmul %363, %1, %cst_143 {dimension_numbers = #tpu.dot_dimension_numbers<[1], [0], [0], [1], [0, 0, 1, 1], [], []>} : vector<16x16xf32>, vector<16x16xf32>, vector<16x16xf32> -> vector<16x16xf32>
    %365 = tpu.reciprocal %364 {approx = true} : vector<16x16xf32> -> vector<16x16xf32>
    %366 = arith.mulf %363, %365 : vector<16x16xf32>
    %367 = vector.extract_strided_slice %304 {offsets = [0, 24], sizes = [16, 8], strides = [1, 1]} : vector<16x32xf32> to vector<16x8xf32>
    %cst_144 = arith.constant dense<0.000000e+00> : vector<16x8xf32>
    %368 = tpu.matmul %366, %367, %cst_144 {dimension_numbers = #tpu.dot_dimension_numbers<[1], [0], [0], [1], [0, 0, 1, 1], [], []>} : vector<16x16xf32>, vector<16x8xf32>, vector<16x8xf32> -> vector<16x8xf32>
    %369 = vector.extract_strided_slice %301 {offsets = [24, 0], sizes = [8, 32], strides = [1, 1]} : vector<32x32xf32> to vector<8x32xf32>
    %cst_145 = arith.constant dense<0.000000e+00> : vector<16x32xf32>
    %370 = tpu.matmul %368, %369, %cst_145 {dimension_numbers = #tpu.dot_dimension_numbers<[1], [0], [0], [1], [0, 0, 1, 1], [], []>} : vector<16x8xf32>, vector<8x32xf32>, vector<16x32xf32> -> vector<16x32xf32>
    %371 = arith.addf %354, %370 : vector<16x32xf32>
    %372 = vector.extract_strided_slice %293 {offsets = [16, 0], sizes = [16, 32], strides = [1, 1]} : vector<32x32xf32> to vector<16x32xf32>
    %373 = vector.extract_strided_slice %298 {offsets = [16, 0], sizes = [16, 32], strides = [1, 1]} : vector<32x32xf32> to vector<16x32xf32>
    %374 = vector.extract_strided_slice %299 {offsets = [16, 0], sizes = [16, 32], strides = [1, 1]} : vector<32x32xf32> to vector<16x32xf32>
    %375 = vector.extract_strided_slice %372 {offsets = [0, 0], sizes = [16, 8], strides = [1, 1]} : vector<16x32xf32> to vector<16x8xf32>
    %376 = vector.extract_strided_slice %373 {offsets = [0, 0], sizes = [16, 8], strides = [1, 1]} : vector<16x32xf32> to vector<16x8xf32>
    %cst_146 = arith.constant dense<0.000000e+00> : vector<16x16xf32>
    %377 = tpu.matmul %375, %376, %cst_146 {dimension_numbers = #tpu.dot_dimension_numbers<[1], [1], [0], [0], [0, 0, 1, 0], [], []>} : vector<16x8xf32>, vector<16x8xf32>, vector<16x16xf32> -> vector<16x16xf32>
    %378 = arith.mulf %377, %27 : vector<16x16xf32>
    %cst_147 = arith.constant dense<0xFF800000> : vector<16xf32>
    %379 = vector.multi_reduction <maximumf>, %378, %cst_147 [1] : vector<16x16xf32> to vector<16xf32>
    %380 = vector.shape_cast %379 : vector<16xf32> to vector<16x1xf32>
    %381 = vector.broadcast %380 : vector<16x1xf32> to vector<16x16xf32>
    %382 = arith.subf %378, %381 : vector<16x16xf32>
    %383 = math.exp %382 : vector<16x16xf32>
    %cst_148 = arith.constant dense<0.000000e+00> : vector<16x16xf32>
    %384 = tpu.matmul %383, %1, %cst_148 {dimension_numbers = #tpu.dot_dimension_numbers<[1], [0], [0], [1], [0, 0, 1, 1], [], []>} : vector<16x16xf32>, vector<16x16xf32>, vector<16x16xf32> -> vector<16x16xf32>
    %385 = tpu.reciprocal %384 {approx = true} : vector<16x16xf32> -> vector<16x16xf32>
    %386 = arith.mulf %383, %385 : vector<16x16xf32>
    %387 = vector.extract_strided_slice %374 {offsets = [0, 0], sizes = [16, 8], strides = [1, 1]} : vector<16x32xf32> to vector<16x8xf32>
    %cst_149 = arith.constant dense<0.000000e+00> : vector<16x8xf32>
    %388 = tpu.matmul %386, %387, %cst_149 {dimension_numbers = #tpu.dot_dimension_numbers<[1], [0], [0], [1], [0, 0, 1, 1], [], []>} : vector<16x16xf32>, vector<16x8xf32>, vector<16x8xf32> -> vector<16x8xf32>
    %389 = vector.extract_strided_slice %301 {offsets = [0, 0], sizes = [8, 32], strides = [1, 1]} : vector<32x32xf32> to vector<8x32xf32>
    %cst_150 = arith.constant dense<0.000000e+00> : vector<16x32xf32>
    %390 = tpu.matmul %388, %389, %cst_150 {dimension_numbers = #tpu.dot_dimension_numbers<[1], [0], [0], [1], [0, 0, 1, 1], [], []>} : vector<16x8xf32>, vector<8x32xf32>, vector<16x32xf32> -> vector<16x32xf32>
    %391 = vector.extract_strided_slice %372 {offsets = [0, 8], sizes = [16, 8], strides = [1, 1]} : vector<16x32xf32> to vector<16x8xf32>
    %392 = vector.extract_strided_slice %373 {offsets = [0, 8], sizes = [16, 8], strides = [1, 1]} : vector<16x32xf32> to vector<16x8xf32>
    %cst_151 = arith.constant dense<0.000000e+00> : vector<16x16xf32>
    %393 = tpu.matmul %391, %392, %cst_151 {dimension_numbers = #tpu.dot_dimension_numbers<[1], [1], [0], [0], [0, 0, 1, 0], [], []>} : vector<16x8xf32>, vector<16x8xf32>, vector<16x16xf32> -> vector<16x16xf32>
    %394 = arith.mulf %393, %27 : vector<16x16xf32>
    %cst_152 = arith.constant dense<0xFF800000> : vector<16xf32>
    %395 = vector.multi_reduction <maximumf>, %394, %cst_152 [1] : vector<16x16xf32> to vector<16xf32>
    %396 = vector.shape_cast %395 : vector<16xf32> to vector<16x1xf32>
    %397 = vector.broadcast %396 : vector<16x1xf32> to vector<16x16xf32>
    %398 = arith.subf %394, %397 : vector<16x16xf32>
    %399 = math.exp %398 : vector<16x16xf32>
    %cst_153 = arith.constant dense<0.000000e+00> : vector<16x16xf32>
    %400 = tpu.matmul %399, %1, %cst_153 {dimension_numbers = #tpu.dot_dimension_numbers<[1], [0], [0], [1], [0, 0, 1, 1], [], []>} : vector<16x16xf32>, vector<16x16xf32>, vector<16x16xf32> -> vector<16x16xf32>
    %401 = tpu.reciprocal %400 {approx = true} : vector<16x16xf32> -> vector<16x16xf32>
    %402 = arith.mulf %399, %401 : vector<16x16xf32>
    %403 = vector.extract_strided_slice %374 {offsets = [0, 8], sizes = [16, 8], strides = [1, 1]} : vector<16x32xf32> to vector<16x8xf32>
    %cst_154 = arith.constant dense<0.000000e+00> : vector<16x8xf32>
    %404 = tpu.matmul %402, %403, %cst_154 {dimension_numbers = #tpu.dot_dimension_numbers<[1], [0], [0], [1], [0, 0, 1, 1], [], []>} : vector<16x16xf32>, vector<16x8xf32>, vector<16x8xf32> -> vector<16x8xf32>
    %405 = vector.extract_strided_slice %301 {offsets = [8, 0], sizes = [8, 32], strides = [1, 1]} : vector<32x32xf32> to vector<8x32xf32>
    %cst_155 = arith.constant dense<0.000000e+00> : vector<16x32xf32>
    %406 = tpu.matmul %404, %405, %cst_155 {dimension_numbers = #tpu.dot_dimension_numbers<[1], [0], [0], [1], [0, 0, 1, 1], [], []>} : vector<16x8xf32>, vector<8x32xf32>, vector<16x32xf32> -> vector<16x32xf32>
    %407 = arith.addf %390, %406 : vector<16x32xf32>
    %408 = vector.extract_strided_slice %372 {offsets = [0, 16], sizes = [16, 8], strides = [1, 1]} : vector<16x32xf32> to vector<16x8xf32>
    %409 = vector.extract_strided_slice %373 {offsets = [0, 16], sizes = [16, 8], strides = [1, 1]} : vector<16x32xf32> to vector<16x8xf32>
    %cst_156 = arith.constant dense<0.000000e+00> : vector<16x16xf32>
    %410 = tpu.matmul %408, %409, %cst_156 {dimension_numbers = #tpu.dot_dimension_numbers<[1], [1], [0], [0], [0, 0, 1, 0], [], []>} : vector<16x8xf32>, vector<16x8xf32>, vector<16x16xf32> -> vector<16x16xf32>
    %411 = arith.mulf %410, %27 : vector<16x16xf32>
    %cst_157 = arith.constant dense<0xFF800000> : vector<16xf32>
    %412 = vector.multi_reduction <maximumf>, %411, %cst_157 [1] : vector<16x16xf32> to vector<16xf32>
    %413 = vector.shape_cast %412 : vector<16xf32> to vector<16x1xf32>
    %414 = vector.broadcast %413 : vector<16x1xf32> to vector<16x16xf32>
    %415 = arith.subf %411, %414 : vector<16x16xf32>
    %416 = math.exp %415 : vector<16x16xf32>
    %cst_158 = arith.constant dense<0.000000e+00> : vector<16x16xf32>
    %417 = tpu.matmul %416, %1, %cst_158 {dimension_numbers = #tpu.dot_dimension_numbers<[1], [0], [0], [1], [0, 0, 1, 1], [], []>} : vector<16x16xf32>, vector<16x16xf32>, vector<16x16xf32> -> vector<16x16xf32>
    %418 = tpu.reciprocal %417 {approx = true} : vector<16x16xf32> -> vector<16x16xf32>
    %419 = arith.mulf %416, %418 : vector<16x16xf32>
    %420 = vector.extract_strided_slice %374 {offsets = [0, 16], sizes = [16, 8], strides = [1, 1]} : vector<16x32xf32> to vector<16x8xf32>
    %cst_159 = arith.constant dense<0.000000e+00> : vector<16x8xf32>
    %421 = tpu.matmul %419, %420, %cst_159 {dimension_numbers = #tpu.dot_dimension_numbers<[1], [0], [0], [1], [0, 0, 1, 1], [], []>} : vector<16x16xf32>, vector<16x8xf32>, vector<16x8xf32> -> vector<16x8xf32>
    %422 = vector.extract_strided_slice %301 {offsets = [16, 0], sizes = [8, 32], strides = [1, 1]} : vector<32x32xf32> to vector<8x32xf32>
    %cst_160 = arith.constant dense<0.000000e+00> : vector<16x32xf32>
    %423 = tpu.matmul %421, %422, %cst_160 {dimension_numbers = #tpu.dot_dimension_numbers<[1], [0], [0], [1], [0, 0, 1, 1], [], []>} : vector<16x8xf32>, vector<8x32xf32>, vector<16x32xf32> -> vector<16x32xf32>
    %424 = arith.addf %407, %423 : vector<16x32xf32>
    %425 = vector.extract_strided_slice %372 {offsets = [0, 24], sizes = [16, 8], strides = [1, 1]} : vector<16x32xf32> to vector<16x8xf32>
    %426 = vector.extract_strided_slice %373 {offsets = [0, 24], sizes = [16, 8], strides = [1, 1]} : vector<16x32xf32> to vector<16x8xf32>
    %cst_161 = arith.constant dense<0.000000e+00> : vector<16x16xf32>
    %427 = tpu.matmul %425, %426, %cst_161 {dimension_numbers = #tpu.dot_dimension_numbers<[1], [1], [0], [0], [0, 0, 1, 0], [], []>} : vector<16x8xf32>, vector<16x8xf32>, vector<16x16xf32> -> vector<16x16xf32>
    %428 = arith.mulf %427, %27 : vector<16x16xf32>
    %cst_162 = arith.constant dense<0xFF800000> : vector<16xf32>
    %429 = vector.multi_reduction <maximumf>, %428, %cst_162 [1] : vector<16x16xf32> to vector<16xf32>
    %430 = vector.shape_cast %429 : vector<16xf32> to vector<16x1xf32>
    %431 = vector.broadcast %430 : vector<16x1xf32> to vector<16x16xf32>
    %432 = arith.subf %428, %431 : vector<16x16xf32>
    %433 = math.exp %432 : vector<16x16xf32>
    %cst_163 = arith.constant dense<0.000000e+00> : vector<16x16xf32>
    %434 = tpu.matmul %433, %1, %cst_163 {dimension_numbers = #tpu.dot_dimension_numbers<[1], [0], [0], [1], [0, 0, 1, 1], [], []>} : vector<16x16xf32>, vector<16x16xf32>, vector<16x16xf32> -> vector<16x16xf32>
    %435 = tpu.reciprocal %434 {approx = true} : vector<16x16xf32> -> vector<16x16xf32>
    %436 = arith.mulf %433, %435 : vector<16x16xf32>
    %437 = vector.extract_strided_slice %374 {offsets = [0, 24], sizes = [16, 8], strides = [1, 1]} : vector<16x32xf32> to vector<16x8xf32>
    %cst_164 = arith.constant dense<0.000000e+00> : vector<16x8xf32>
    %438 = tpu.matmul %436, %437, %cst_164 {dimension_numbers = #tpu.dot_dimension_numbers<[1], [0], [0], [1], [0, 0, 1, 1], [], []>} : vector<16x16xf32>, vector<16x8xf32>, vector<16x8xf32> -> vector<16x8xf32>
    %439 = vector.extract_strided_slice %301 {offsets = [24, 0], sizes = [8, 32], strides = [1, 1]} : vector<32x32xf32> to vector<8x32xf32>
    %cst_165 = arith.constant dense<0.000000e+00> : vector<16x32xf32>
    %440 = tpu.matmul %438, %439, %cst_165 {dimension_numbers = #tpu.dot_dimension_numbers<[1], [0], [0], [1], [0, 0, 1, 1], [], []>} : vector<16x8xf32>, vector<8x32xf32>, vector<16x32xf32> -> vector<16x32xf32>
    %441 = arith.addf %424, %440 : vector<16x32xf32>
    %442 = tpu.concatenate %371, %441 in 0 : vector<16x32xf32>, vector<16x32xf32> -> vector<32x32xf32>
    %443 = arith.addf %261, %442 : vector<32x32xf32>
    %c1_166 = arith.constant 1 : index
    %c0_167 = arith.constant 0 : index
    %c0_168 = arith.constant 0 : index
    %444 = vector.load %arg8[%c1_166, %c0_167, %c0_168] : memref<2x1x32xf32, #tpu.memory_space<vmem>>, vector<1x1x32xf32>
    %445 = vector.shape_cast %444 : vector<1x1x32xf32> to vector<1x32xf32>
    %446 = vector.broadcast %445 : vector<1x32xf32> to vector<32x32xf32>
    %447 = arith.addf %443, %446 : vector<32x32xf32>
    %c1_169 = arith.constant 1 : index
    %c0_170 = arith.constant 0 : index
    %c0_171 = arith.constant 0 : index
    %448 = vector.load %arg9[%c1_169, %c0_170, %c0_171] : memref<2x1x32xf32, #tpu.memory_space<vmem>>, vector<1x1x32xf32>
    %449 = vector.shape_cast %448 : vector<1x1x32xf32> to vector<1x32xf32>
    %c1_172 = arith.constant 1 : index
    %c0_173 = arith.constant 0 : index
    %c0_174 = arith.constant 0 : index
    %450 = vector.load %arg10[%c1_172, %c0_173, %c0_174] : memref<2x1x32xf32, #tpu.memory_space<vmem>>, vector<1x1x32xf32>
    %451 = vector.shape_cast %450 : vector<1x1x32xf32> to vector<1x32xf32>
    %cst_175 = arith.constant dense<0.000000e+00> : vector<32x32xf32>
    %452 = tpu.matmul %447, %0, %cst_175 {dimension_numbers = #tpu.dot_dimension_numbers<[1], [0], [0], [1], [0, 0, 1, 1], [], []>} : vector<32x32xf32>, vector<32x32xf32>, vector<32x32xf32> -> vector<32x32xf32>
    %cst_176 = arith.constant 3.125000e-02 : f32
    %453 = vector.broadcast %cst_176 : f32 to vector<32x32xf32>
    %454 = arith.mulf %452, %453 : vector<32x32xf32>
    %455 = arith.subf %447, %454 : vector<32x32xf32>
    %456 = arith.mulf %455, %455 : vector<32x32xf32>
    %cst_177 = arith.constant dense<0.000000e+00> : vector<32x32xf32>
    %457 = tpu.matmul %456, %0, %cst_177 {dimension_numbers = #tpu.dot_dimension_numbers<[1], [0], [0], [1], [0, 0, 1, 1], [], []>} : vector<32x32xf32>, vector<32x32xf32>, vector<32x32xf32> -> vector<32x32xf32>
    %cst_178 = arith.constant 3.125000e-02 : f32
    %458 = vector.broadcast %cst_178 : f32 to vector<32x32xf32>
    %459 = arith.mulf %457, %458 : vector<32x32xf32>
    %cst_179 = arith.constant 9.99999974E-6 : f32
    %460 = vector.broadcast %cst_179 : f32 to vector<32x32xf32>
    %461 = arith.addf %459, %460 : vector<32x32xf32>
    %462 = math.rsqrt %461 : vector<32x32xf32>
    %463 = arith.mulf %455, %462 : vector<32x32xf32>
    %464 = vector.broadcast %449 : vector<1x32xf32> to vector<32x32xf32>
    %465 = arith.mulf %463, %464 : vector<32x32xf32>
    %466 = vector.broadcast %451 : vector<1x32xf32> to vector<32x32xf32>
    %467 = arith.addf %465, %466 : vector<32x32xf32>
    %c1_180 = arith.constant 1 : index
    %c0_181 = arith.constant 0 : index
    %c0_182 = arith.constant 0 : index
    %468 = vector.load %arg11[%c1_180, %c0_181, %c0_182] : memref<2x32x64xf32, #tpu.memory_space<vmem>>, vector<1x32x64xf32>
    %469 = vector.shape_cast %468 : vector<1x32x64xf32> to vector<32x64xf32>
    %cst_183 = arith.constant dense<0.000000e+00> : vector<32x64xf32>
    %470 = tpu.matmul %467, %469, %cst_183 {dimension_numbers = #tpu.dot_dimension_numbers<[1], [0], [0], [1], [0, 0, 1, 1], [], []>} : vector<32x32xf32>, vector<32x64xf32>, vector<32x64xf32> -> vector<32x64xf32>
    %c1_184 = arith.constant 1 : index
    %c0_185 = arith.constant 0 : index
    %c0_186 = arith.constant 0 : index
    %471 = vector.load %arg12[%c1_184, %c0_185, %c0_186] : memref<2x1x64xf32, #tpu.memory_space<vmem>>, vector<1x1x64xf32>
    %472 = vector.shape_cast %471 : vector<1x1x64xf32> to vector<1x64xf32>
    %473 = vector.broadcast %472 : vector<1x64xf32> to vector<32x64xf32>
    %474 = arith.addf %470, %473 : vector<32x64xf32>
    %475 = arith.mulf %474, %474 : vector<32x64xf32>
    %476 = arith.mulf %474, %475 : vector<32x64xf32>
    %cst_187 = arith.constant 4.471500e-02 : f32
    %477 = vector.broadcast %cst_187 : f32 to vector<32x64xf32>
    %478 = arith.mulf %477, %476 : vector<32x64xf32>
    %479 = arith.addf %474, %478 : vector<32x64xf32>
    %cst_188 = arith.constant 0.797884583 : f32
    %480 = vector.broadcast %cst_188 : f32 to vector<32x64xf32>
    %481 = arith.mulf %480, %479 : vector<32x64xf32>
    %482 = math.tanh %481 : vector<32x64xf32>
    %cst_189 = arith.constant 1.000000e+00 : f32
    %483 = vector.broadcast %cst_189 : f32 to vector<32x64xf32>
    %484 = arith.addf %483, %482 : vector<32x64xf32>
    %cst_190 = arith.constant 5.000000e-01 : f32
    %485 = vector.broadcast %cst_190 : f32 to vector<32x64xf32>
    %486 = arith.mulf %485, %484 : vector<32x64xf32>
    %487 = arith.mulf %474, %486 : vector<32x64xf32>
    %c1_191 = arith.constant 1 : index
    %c0_192 = arith.constant 0 : index
    %c0_193 = arith.constant 0 : index
    %488 = vector.load %arg13[%c1_191, %c0_192, %c0_193] : memref<2x64x32xf32, #tpu.memory_space<vmem>>, vector<1x64x32xf32>
    %489 = vector.shape_cast %488 : vector<1x64x32xf32> to vector<64x32xf32>
    %cst_194 = arith.constant dense<0.000000e+00> : vector<32x32xf32>
    %490 = tpu.matmul %487, %489, %cst_194 {dimension_numbers = #tpu.dot_dimension_numbers<[1], [0], [0], [1], [0, 0, 1, 1], [], []>} : vector<32x64xf32>, vector<64x32xf32>, vector<32x32xf32> -> vector<32x32xf32>
    %491 = arith.addf %447, %490 : vector<32x32xf32>
    %c1_195 = arith.constant 1 : index
    %c0_196 = arith.constant 0 : index
    %c0_197 = arith.constant 0 : index
    %492 = vector.load %arg14[%c1_195, %c0_196, %c0_197] : memref<2x1x32xf32, #tpu.memory_space<vmem>>, vector<1x1x32xf32>
    %493 = vector.shape_cast %492 : vector<1x1x32xf32> to vector<1x32xf32>
    %494 = vector.broadcast %493 : vector<1x32xf32> to vector<32x32xf32>
    %495 = arith.addf %491, %494 : vector<32x32xf32>
    %c0_198 = arith.constant 0 : index
    %c0_199 = arith.constant 0 : index
    %496 = vector.load %arg15[%c0_198, %c0_199] : memref<1x32xf32, #tpu.memory_space<vmem>>, vector<1x32xf32>
    %c0_200 = arith.constant 0 : index
    %c0_201 = arith.constant 0 : index
    %497 = vector.load %arg16[%c0_200, %c0_201] : memref<1x32xf32, #tpu.memory_space<vmem>>, vector<1x32xf32>
    %cst_202 = arith.constant dense<0.000000e+00> : vector<32x32xf32>
    %498 = tpu.matmul %495, %0, %cst_202 {dimension_numbers = #tpu.dot_dimension_numbers<[1], [0], [0], [1], [0, 0, 1, 1], [], []>} : vector<32x32xf32>, vector<32x32xf32>, vector<32x32xf32> -> vector<32x32xf32>
    %cst_203 = arith.constant 3.125000e-02 : f32
    %499 = vector.broadcast %cst_203 : f32 to vector<32x32xf32>
    %500 = arith.mulf %498, %499 : vector<32x32xf32>
    %501 = arith.subf %495, %500 : vector<32x32xf32>
    %502 = arith.mulf %501, %501 : vector<32x32xf32>
    %cst_204 = arith.constant dense<0.000000e+00> : vector<32x32xf32>
    %503 = tpu.matmul %502, %0, %cst_204 {dimension_numbers = #tpu.dot_dimension_numbers<[1], [0], [0], [1], [0, 0, 1, 1], [], []>} : vector<32x32xf32>, vector<32x32xf32>, vector<32x32xf32> -> vector<32x32xf32>
    %cst_205 = arith.constant 3.125000e-02 : f32
    %504 = vector.broadcast %cst_205 : f32 to vector<32x32xf32>
    %505 = arith.mulf %503, %504 : vector<32x32xf32>
    %cst_206 = arith.constant 9.99999974E-6 : f32
    %506 = vector.broadcast %cst_206 : f32 to vector<32x32xf32>
    %507 = arith.addf %505, %506 : vector<32x32xf32>
    %508 = math.rsqrt %507 : vector<32x32xf32>
    %509 = arith.mulf %501, %508 : vector<32x32xf32>
    %510 = vector.broadcast %496 : vector<1x32xf32> to vector<32x32xf32>
    %511 = arith.mulf %509, %510 : vector<32x32xf32>
    %512 = vector.broadcast %497 : vector<1x32xf32> to vector<32x32xf32>
    %513 = arith.addf %511, %512 : vector<32x32xf32>
    %c0_207 = arith.constant 0 : index
    %c0_208 = arith.constant 0 : index
    %514 = vector.load %arg20[%c0_207, %c0_208] : memref<32x1xf32, #tpu.memory_space<vmem>>, vector<32x1xf32>
    %cst_209 = arith.constant dense<0.000000e+00> : vector<32x1xf32>
    %515 = tpu.matmul %513, %514, %cst_209 {dimension_numbers = #tpu.dot_dimension_numbers<[1], [0], [0], [1], [0, 0, 1, 1], [], []>} : vector<32x32xf32>, vector<32x1xf32>, vector<32x1xf32> -> vector<32x1xf32>
    %c0_210 = arith.constant 0 : index
    %c0_211 = arith.constant 0 : index
    %516 = vector.load %arg21[%c0_210, %c0_211] : memref<1x1xf32, #tpu.memory_space<vmem>>, vector<1x1xf32>
    %517 = vector.broadcast %516 : vector<1x1xf32> to vector<32x1xf32>
    %518 = arith.addf %515, %517 : vector<32x1xf32>
    %519 = vector.extract_strided_slice %513 {offsets = [0, 0], sizes = [16, 32], strides = [1, 1]} : vector<32x32xf32> to vector<16x32xf32>
    %520 = vector.extract_strided_slice %518 {offsets = [0, 0], sizes = [16, 1], strides = [1, 1]} : vector<32x1xf32> to vector<16x1xf32>
    %cst_212 = arith.constant dense<0xFF800000> : vector<1xf32>
    %521 = vector.multi_reduction <maximumf>, %520, %cst_212 [0] : vector<16x1xf32> to vector<1xf32>
    %522 = vector.shape_cast %521 : vector<1xf32> to vector<1x1xf32>
    %523 = vector.broadcast %522 : vector<1x1xf32> to vector<16x1xf32>
    %524 = arith.subf %520, %523 : vector<16x1xf32>
    %525 = math.exp %524 : vector<16x1xf32>
    %cst_213 = arith.constant dense<0.000000e+00> : vector<1xf32>
    %526 = vector.multi_reduction <add>, %525, %cst_213 [0] : vector<16x1xf32> to vector<1xf32>
    %527 = vector.shape_cast %526 : vector<1xf32> to vector<1x1xf32>
    %528 = tpu.reciprocal %527 {approx = true} : vector<1x1xf32> -> vector<1x1xf32>
    %529 = vector.broadcast %528 : vector<1x1xf32> to vector<16x1xf32>
    %530 = arith.mulf %525, %529 : vector<16x1xf32>
    %531 = vector.broadcast %530 : vector<16x1xf32> to vector<16x32xf32>
    %532 = arith.mulf %531, %519 : vector<16x32xf32>
    %cst_214 = arith.constant dense<0.000000e+00> : vector<1x32xf32>
    %533 = tpu.matmul %2, %532, %cst_214 {dimension_numbers = #tpu.dot_dimension_numbers<[1], [0], [0], [1], [0, 0, 1, 1], [], []>} : vector<1x16xf32>, vector<16x32xf32>, vector<1x32xf32> -> vector<1x32xf32>
    %c0_215 = arith.constant 0 : index
    %c0_216 = arith.constant 0 : index
    %534 = vector.load %arg22[%c0_215, %c0_216] : memref<32x128xf32, #tpu.memory_space<vmem>>, vector<32x128xf32>
    %cst_217 = arith.constant dense<0.000000e+00> : vector<1x128xf32>
    %535 = tpu.matmul %533, %534, %cst_217 {dimension_numbers = #tpu.dot_dimension_numbers<[1], [0], [0], [1], [0, 0, 1, 1], [], []>} : vector<1x32xf32>, vector<32x128xf32>, vector<1x128xf32> -> vector<1x128xf32>
    %c0_218 = arith.constant 0 : index
    %c0_219 = arith.constant 0 : index
    %536 = vector.load %arg23[%c0_218, %c0_219] : memref<1x128xf32, #tpu.memory_space<vmem>>, vector<1x128xf32>
    %537 = arith.addf %535, %536 : vector<1x128xf32>
    %538 = vector.extract_strided_slice %513 {offsets = [16, 0], sizes = [16, 32], strides = [1, 1]} : vector<32x32xf32> to vector<16x32xf32>
    %539 = vector.extract_strided_slice %518 {offsets = [16, 0], sizes = [16, 1], strides = [1, 1]} : vector<32x1xf32> to vector<16x1xf32>
    %cst_220 = arith.constant dense<0xFF800000> : vector<1xf32>
    %540 = vector.multi_reduction <maximumf>, %539, %cst_220 [0] : vector<16x1xf32> to vector<1xf32>
    %541 = vector.shape_cast %540 : vector<1xf32> to vector<1x1xf32>
    %542 = vector.broadcast %541 : vector<1x1xf32> to vector<16x1xf32>
    %543 = arith.subf %539, %542 : vector<16x1xf32>
    %544 = math.exp %543 : vector<16x1xf32>
    %cst_221 = arith.constant dense<0.000000e+00> : vector<1xf32>
    %545 = vector.multi_reduction <add>, %544, %cst_221 [0] : vector<16x1xf32> to vector<1xf32>
    %546 = vector.shape_cast %545 : vector<1xf32> to vector<1x1xf32>
    %547 = tpu.reciprocal %546 {approx = true} : vector<1x1xf32> -> vector<1x1xf32>
    %548 = vector.broadcast %547 : vector<1x1xf32> to vector<16x1xf32>
    %549 = arith.mulf %544, %548 : vector<16x1xf32>
    %550 = vector.broadcast %549 : vector<16x1xf32> to vector<16x32xf32>
    %551 = arith.mulf %550, %538 : vector<16x32xf32>
    %cst_222 = arith.constant dense<0.000000e+00> : vector<1x32xf32>
    %552 = tpu.matmul %2, %551, %cst_222 {dimension_numbers = #tpu.dot_dimension_numbers<[1], [0], [0], [1], [0, 0, 1, 1], [], []>} : vector<1x16xf32>, vector<16x32xf32>, vector<1x32xf32> -> vector<1x32xf32>
    %c0_223 = arith.constant 0 : index
    %c0_224 = arith.constant 0 : index
    %553 = vector.load %arg22[%c0_223, %c0_224] : memref<32x128xf32, #tpu.memory_space<vmem>>, vector<32x128xf32>
    %cst_225 = arith.constant dense<0.000000e+00> : vector<1x128xf32>
    %554 = tpu.matmul %552, %553, %cst_225 {dimension_numbers = #tpu.dot_dimension_numbers<[1], [0], [0], [1], [0, 0, 1, 1], [], []>} : vector<1x32xf32>, vector<32x128xf32>, vector<1x128xf32> -> vector<1x128xf32>
    %c0_226 = arith.constant 0 : index
    %c0_227 = arith.constant 0 : index
    %555 = vector.load %arg23[%c0_226, %c0_227] : memref<1x128xf32, #tpu.memory_space<vmem>>, vector<1x128xf32>
    %556 = arith.addf %554, %555 : vector<1x128xf32>
    %557 = tpu.concatenate %537, %556 in 0 : vector<1x128xf32>, vector<1x128xf32> -> vector<2x128xf32>
    %c0_228 = arith.constant 0 : index
    %c0_229 = arith.constant 0 : index
    %c0_230 = arith.constant 0 : index
    %558 = vector.load %arg24[%c0_228, %c0_229, %c0_230] : memref<1x2x128xf32, #tpu.memory_space<vmem>>, vector<1x2x128xf32>
    %559 = vector.shape_cast %558 : vector<1x2x128xf32> to vector<2x128xf32>
    %560 = vector.shape_cast %557 : vector<2x128xf32> to vector<1x2x128xf32>
    tpu.vector_store %arg24[%c0_228, %c0_229, %c0_230], %560 {strides = array<i32>} : memref<1x2x128xf32, #tpu.memory_space<vmem>>, vector<1x2x128xf32>,
    return
  }
  func.func @transform_0(%arg0: i32) -> (i32, i32) {
    %c0_i32 = arith.constant 0 : i32
    %c0_i32_0 = arith.constant 0 : i32
    return %arg0, %c0_i32 : i32, i32
  }
  func.func @transform_1(%arg0: i32) -> (i32, i32) {
    %c0_i32 = arith.constant 0 : i32
    %c0_i32_0 = arith.constant 0 : i32
    %c0_i32_1 = arith.constant 0 : i32
    return %c0_i32, %c0_i32_0 : i32, i32
  }
  func.func @transform_2(%arg0: i32) -> (i32, i32, i32) {
    %c0_i32 = arith.constant 0 : i32
    %c0_i32_0 = arith.constant 0 : i32
    %c0_i32_1 = arith.constant 0 : i32
    %c0_i32_2 = arith.constant 0 : i32
    return %c0_i32, %c0_i32_0, %c0_i32_1 : i32, i32, i32
  }
  func.func @transform_3(%arg0: i32) -> (i32, i32, i32) {
    %c0_i32 = arith.constant 0 : i32
    %c0_i32_0 = arith.constant 0 : i32
    %c0_i32_1 = arith.constant 0 : i32
    %c0_i32_2 = arith.constant 0 : i32
    return %c0_i32, %c0_i32_0, %c0_i32_1 : i32, i32, i32
  }
  func.func @transform_4(%arg0: i32) -> (i32, i32, i32) {
    %c0_i32 = arith.constant 0 : i32
    %c0_i32_0 = arith.constant 0 : i32
    %c0_i32_1 = arith.constant 0 : i32
    %c0_i32_2 = arith.constant 0 : i32
    return %c0_i32, %c0_i32_0, %c0_i32_1 : i32, i32, i32
  }
  func.func @transform_5(%arg0: i32) -> (i32, i32, i32) {
    %c0_i32 = arith.constant 0 : i32
    %c0_i32_0 = arith.constant 0 : i32
    %c0_i32_1 = arith.constant 0 : i32
    %c0_i32_2 = arith.constant 0 : i32
    return %c0_i32, %c0_i32_0, %c0_i32_1 : i32, i32, i32
  }
  func.func @transform_6(%arg0: i32) -> (i32, i32, i32) {
    %c0_i32 = arith.constant 0 : i32
    %c0_i32_0 = arith.constant 0 : i32
    %c0_i32_1 = arith.constant 0 : i32
    %c0_i32_2 = arith.constant 0 : i32
    return %c0_i32, %c0_i32_0, %c0_i32_1 : i32, i32, i32
  }
  func.func @transform_7(%arg0: i32) -> (i32, i32, i32) {
    %c0_i32 = arith.constant 0 : i32
    %c0_i32_0 = arith.constant 0 : i32
    %c0_i32_1 = arith.constant 0 : i32
    %c0_i32_2 = arith.constant 0 : i32
    return %c0_i32, %c0_i32_0, %c0_i32_1 : i32, i32, i32
  }
  func.func @transform_8(%arg0: i32) -> (i32, i32, i32) {
    %c0_i32 = arith.constant 0 : i32
    %c0_i32_0 = arith.constant 0 : i32
    %c0_i32_1 = arith.constant 0 : i32
    %c0_i32_2 = arith.constant 0 : i32
    return %c0_i32, %c0_i32_0, %c0_i32_1 : i32, i32, i32
  }
  func.func @transform_9(%arg0: i32) -> (i32, i32, i32) {
    %c0_i32 = arith.constant 0 : i32
    %c0_i32_0 = arith.constant 0 : i32
    %c0_i32_1 = arith.constant 0 : i32
    %c0_i32_2 = arith.constant 0 : i32
    return %c0_i32, %c0_i32_0, %c0_i32_1 : i32, i32, i32
  }
  func.func @transform_10(%arg0: i32) -> (i32, i32, i32) {
    %c0_i32 = arith.constant 0 : i32
    %c0_i32_0 = arith.constant 0 : i32
    %c0_i32_1 = arith.constant 0 : i32
    %c0_i32_2 = arith.constant 0 : i32
    return %c0_i32, %c0_i32_0, %c0_i32_1 : i32, i32, i32
  }
  func.func @transform_11(%arg0: i32) -> (i32, i32, i32) {
    %c0_i32 = arith.constant 0 : i32
    %c0_i32_0 = arith.constant 0 : i32
    %c0_i32_1 = arith.constant 0 : i32
    %c0_i32_2 = arith.constant 0 : i32
    return %c0_i32, %c0_i32_0, %c0_i32_1 : i32, i32, i32
  }
  func.func @transform_12(%arg0: i32) -> (i32, i32, i32) {
    %c0_i32 = arith.constant 0 : i32
    %c0_i32_0 = arith.constant 0 : i32
    %c0_i32_1 = arith.constant 0 : i32
    %c0_i32_2 = arith.constant 0 : i32
    return %c0_i32, %c0_i32_0, %c0_i32_1 : i32, i32, i32
  }
  func.func @transform_13(%arg0: i32) -> (i32, i32, i32) {
    %c0_i32 = arith.constant 0 : i32
    %c0_i32_0 = arith.constant 0 : i32
    %c0_i32_1 = arith.constant 0 : i32
    %c0_i32_2 = arith.constant 0 : i32
    return %c0_i32, %c0_i32_0, %c0_i32_1 : i32, i32, i32
  }
  func.func @transform_14(%arg0: i32) -> (i32, i32) {
    %c0_i32 = arith.constant 0 : i32
    %c0_i32_0 = arith.constant 0 : i32
    %c0_i32_1 = arith.constant 0 : i32
    return %c0_i32, %c0_i32_0 : i32, i32
  }
  func.func @transform_15(%arg0: i32) -> (i32, i32) {
    %c0_i32 = arith.constant 0 : i32
    %c0_i32_0 = arith.constant 0 : i32
    %c0_i32_1 = arith.constant 0 : i32
    return %c0_i32, %c0_i32_0 : i32, i32
  }
  func.func @transform_16(%arg0: i32) -> (i32, i32) {
    %c0_i32 = arith.constant 0 : i32
    %c0_i32_0 = arith.constant 0 : i32
    %c0_i32_1 = arith.constant 0 : i32
    return %c0_i32, %c0_i32_0 : i32, i32
  }
  func.func @transform_17(%arg0: i32) -> (i32, i32) {
    %c0_i32 = arith.constant 0 : i32
    %c0_i32_0 = arith.constant 0 : i32
    %c0_i32_1 = arith.constant 0 : i32
    return %c0_i32, %c0_i32_0 : i32, i32
  }
  func.func @transform_18(%arg0: i32) -> (i32, i32) {
    %c0_i32 = arith.constant 0 : i32
    %c0_i32_0 = arith.constant 0 : i32
    %c0_i32_1 = arith.constant 0 : i32
    return %c0_i32, %c0_i32_0 : i32, i32
  }
  func.func @transform_19(%arg0: i32) -> (i32, i32) {
    %c0_i32 = arith.constant 0 : i32
    %c0_i32_0 = arith.constant 0 : i32
    %c0_i32_1 = arith.constant 0 : i32
    return %c0_i32, %c0_i32_0 : i32, i32
  }
  func.func @transform_20(%arg0: i32) -> (i32, i32) {
    %c0_i32 = arith.constant 0 : i32
    %c0_i32_0 = arith.constant 0 : i32
    %c0_i32_1 = arith.constant 0 : i32
    return %c0_i32, %c0_i32_0 : i32, i32
  }
  func.func @transform_21(%arg0: i32) -> (i32, i32) {
    %c0_i32 = arith.constant 0 : i32
    %c0_i32_0 = arith.constant 0 : i32
    %c0_i32_1 = arith.constant 0 : i32
    return %c0_i32, %c0_i32_0 : i32, i32
  }
  func.func @transform_22(%arg0: i32) -> (i32, i32) {
    %c0_i32 = arith.constant 0 : i32
    %c0_i32_0 = arith.constant 0 : i32
    %c0_i32_1 = arith.constant 0 : i32
    return %c0_i32, %c0_i32_0 : i32, i32
  }
  func.func @transform_23(%arg0: i32) -> (i32, i32, i32) {
    %c0_i32 = arith.constant 0 : i32
    %c0_i32_0 = arith.constant 0 : i32
    %c0_i32_1 = arith.constant 0 : i32
    return %arg0, %c0_i32, %c0_i32_0 : i32, i32, i32
  }
}

</mosaic_0001>

<bundles_post_ra>
// kernel: algebraic_seq_cct_forward.1
= control target key start
LH: loop header
LB: loop body
LE: loop exit
PB: predicated region body
PF: predicated region fallthrough
CT: control target
= control target key end

     0   :  { %s12469_s0 = inlined_call_operand.vmem [shape: f32[288,32], index: 0, kind: input, shape index: {}]   ;;  %s12470_s1 = inlined_call_operand.vmem [shape: f32[32,32], index: 1, kind: input, shape index: {}]   ;;  %s12471_s2 = inlined_call_operand.vmem [shape: f32[2,1,32], index: 2, kind: input, shape index: {}]   ;;  %s12472_s3 = inlined_call_operand.vmem [shape: f32[2,1,32], index: 3, kind: input, shape index: {}]   ;;  %s12473_s4 = inlined_call_operand.vmem [shape: f32[2,32,160], index: 4, kind: input, shape index: {}]   ;;  %s12474_s5 = inlined_call_operand.vmem [shape: f32[2,1,160], index: 5, kind: input, shape index: {}]   ;;  %s12475_s6 = inlined_call_operand.vmem [shape: f32[2,32,32], index: 6, kind: input, shape index: {}]   ;;  %s12476_s7 = inlined_call_operand.vmem [shape: f32[2,1,32], index: 7, kind: input, shape index: {}]   ;;  %s12477_s8 = inlined_call_operand.vmem [shape: f32[2,1,32], index: 8, kind: input, shape index: {}]   ;;  %s12478_s9 = inlined_call_operand.vmem [shape: f32[2,1,32], index: 9, kind: input, shape index: {}]   ;;  %s12479_s10 = inlined_call_operand.vmem [shape: f32[2,32,64], index: 10, kind: input, shape index: {}]   ;;  %s12480_s11 = inlined_call_operand.vmem [shape: f32[2,1,64], index: 11, kind: input, shape index: {}]   ;;  %s12481_s12 = inlined_call_operand.vmem [shape: f32[2,64,32], index: 12, kind: input, shape index: {}]   ;;  %s12482_s13 = inlined_call_operand.vmem [shape: f32[2,1,32], index: 13, kind: input, shape index: {}]   ;;  %s12483_s14 = inlined_call_operand.vmem [shape: f32[1,32], index: 14, kind: input, shape index: {}]   ;;  %s12484_s15 = inlined_call_operand.vmem [shape: f32[1,32], index: 15, kind: input, shape index: {}]   ;;  %s12485_s16 = inlined_call_operand.vmem [shape: f32[32,32], index: 16, kind: input, shape index: {}]   ;;  %s12486_s17 = inlined_call_operand.vmem [shape: f32[32,32], index: 17, kind: input, shape index: {}]   ;;  %s12487_s18 = inlined_call_operand.vmem [shape: f32[16,16], index: 18, kind: input, shape index: {}]   ;;  %s12488_s19 = inlined_call_operand.vmem [shape: f32[32,1], index: 19, kind: input, shape index: {}]   ;;  %s12489_s20 = inlined_call_operand.<no memory space> [shape: f32[1,1], index: 20, kind: input, shape index: {}]   ;;  %s12490_s21 = inlined_call_operand.vmem [shape: f32[32,128], index: 21, kind: input, shape index: {}]   ;;  %s12491_s22 = inlined_call_operand.vmem [shape: f32[1,128], index: 22, kind: input, shape index: {}]   ;;  %s12492_s23 = inlined_call_operand.hbm [shape: f32[1,2,128], index: 23, kind: output, shape index: {}]  }
   0x1   :  { %12518 = sst [smem:[#allocation6_spill]] %s12469_s0  ;;  %v28_v0 = vstv %s12489_s20 }
   0x2   :  { %12519 = sst [smem:[#allocation7_spill]] %s12470_s1  ;;  %29 = vst [vmem:[#allocation2] sm:$0x1] %v28_v0 }
   0x3   :  { %12520 = sst [smem:[#allocation8_spill]] %s12471_s2 }
   0x4   :  { %12521 = sst [smem:[#allocation9_spill]] %s12472_s3 }
   0x5   :  { %12522 = sst [smem:[#allocation10_spill]] %s12473_s4 }
   0x6   :  { %12523 = sst [smem:[#allocation11_spill]] %s12474_s5 }
   0x7   :  { %12524 = sst [smem:[#allocation12_spill]] %s12475_s6 }
   0x8   :  { %12525 = sst [smem:[#allocation13_spill]] %s12476_s7 }
   0x9   :  { %12526 = sst [smem:[#allocation14_spill]] %s12483_s14 }
   0xa   :  { %12527 = sst [smem:[#allocation15_spill]] %s12484_s15 }
   0xb   :  { %12528 = sst [smem:[#allocation16_spill]] %s12490_s21 }
   0xc   :  { %12529 = sst [smem:[#allocation17_spill]] %s12491_s22 }
   0xd   :  { %12530 = sst [smem:[#allocation18_spill]] %s12492_s23 }
   0xe   :  { %s12531_s5 = sld [smem:[#allocation7_spill]]  ;;  %vm117_vm0 = vcmask 261120  }
   0xf   :  { %s12532_s27 = sld [smem:[#allocation6_spill]] }
  0x14   :  { %v116_v1 = vld [vmem:[%s12531_s5 + $0x18] sm:$0xff]  ;;  %v115_v2 = vld [vmem:[%s12531_s5 + $0x10] sm:$0xff]  ;;  %v114_v4 = vld [vmem:[%s12531_s5 + $0x8] sm:$0xff] }
  0x15   :  { %9718 = vmatprep.subr.mxu0 %v116_v1  ;;  %v77_v3 = vld [vmem:[%s12532_s27] sm:$0xff]  ;;  %v78_v6 = vld [vmem:[%s12532_s27 + $0x8] sm:$0xff]  ;;  %v79_v7 = vld [vmem:[%s12532_s27 + $0x10] sm:$0xff] }
  0x16   :  { %9719 = vmatpush3.msra.mxu0 %v116_v1  ;;  %9726 = vmatprep.mubr.msk.f32.mxu0 %vm117_vm0, %v77_v3  ;;  %v113_v5 = vld [vmem:[%s12531_s5] sm:$0xff]  ;;  %v80_v8 = vld [vmem:[%s12532_s27 + $0x18] sm:$0xff] }
  0x17   :  { %9720 = vmatprep.subr.mxu0 %v115_v2  ;;  %v81_v9 = vld [vmem:[%s12532_s27 + $0x20] sm:$0xff] }
  0x18   :  { %9721 = vmatpush3.msra.mxu0 %v115_v2 }
  0x19   :  { %9722 = vmatprep.subr.mxu0 %v114_v4 }
  0x1a   :  { %9723 = vmatpush3.msra.mxu0 %v114_v4 }
  0x1b   :  { %9724 = vmatprep.subr.mxu0 %v113_v5 }
  0x1c   :  { %9725 = vmatpush3.msra.mxu0 %v113_v5 }
  0x1d   :  { %9727 = vmatmul.mubr.msk.f32.vlgmr.msra.gmra.mxu0 %vm117_vm0, %v78_v6 }
  0x1e   :  { %9729 = vmatprep.mubr.msk.f32.mxu0 %vm117_vm0, %v79_v7 }
  0x21   :  { %9730 = vmatmul.mubr.msk.f32.gmra.mxu0 %vm117_vm0, %v80_v8 }
  0x22   :  { %30 = vsyncpa [#allocation4], 0  ;;  %9732 = vmatprep.mubr.msk.f32.mxu0 %vm117_vm0, %v81_v9  ;;  %v82_v10 = vld [vmem:[%s12532_s27 + $0x28] sm:$0xff]  ;;  %v83_v11 = vld [vmem:[%s12532_s27 + $0x30] sm:$0xff]  ;;  %v10698_v41 = vmov 1.0   ;;  %s12533_s7 = sld [smem:[#allocation10_spill]] }
  0x23   :  { %v84_v12 = vld [vmem:[%s12532_s27 + $0x38] sm:$0xff]  ;;  %v85_v13 = vld [vmem:[%s12532_s27 + $0x40] sm:$0xff]  ;;  %v86_v14 = vld [vmem:[%s12532_s27 + $0x48] sm:$0xff]  ;;  %9780 = vmatprep.subr.mxu1 %v10698_v41  ;;  %s12515_s20 = smov 96   ;;  %s12513_s30 = smov 64   ;;  %vm1024_vm1 = vcmask 64512  }
  0x24   :  { %v87_v15 = vld [vmem:[%s12532_s27 + $0x50] sm:$0xff]  ;;  %v88_v16 = vld [vmem:[%s12532_s27 + $0x58] sm:$0xff]  ;;  %v89_v17 = vld [vmem:[%s12532_s27 + $0x60] sm:$0xff]  ;;  %9781 = vmatpush3.msra.mxu1 %v10698_v41  ;;  %s10702_s5 = smov 32   ;;  %s12534_s2 = sld [smem:[#allocation8_spill]]  ;;  %vm1112_vm2 = vcmask 130048  }
  0x25   :  { %9733 = vmatmul.mubr.msk.f32.gmra.mxu0 %vm117_vm0, %v82_v10  ;;  %v90_v18 = vld [vmem:[%s12532_s27 + $0x68] sm:$0xff]  ;;  %v91_v19 = vld [vmem:[%s12532_s27 + $0x70] sm:$0xff]  ;;  %v92_v20 = vld [vmem:[%s12532_s27 + $0x78] sm:$0xff]  ;;  %9782 = vmatprep.subr.mxu1 %v10698_v41  ;;  %s12535_s28 = sld [smem:[#allocation9_spill]]  ;;  %s12509_s26 = smov 56   ;;  %vm4295_vm3 = vcmask 523264  }
  0x26   :  { %9735 = vmatprep.mubr.msk.f32.mxu0 %vm117_vm0, %v83_v11  ;;  %v93_v21 = vld [vmem:[%s12532_s27 + $0x80] sm:$0xff]  ;;  %v94_v22 = vld [vmem:[%s12532_s27 + $0x88] sm:$0xff]  ;;  %v95_v23 = vld [vmem:[%s12532_s27 + $0x90] sm:$0xff]  ;;  %9783 = vmatpush3.msra.mxu1 %v10698_v41  ;;  %s12536_s0 = sld [smem:[#allocation11_spill]]  ;;  %s12503_s6 = smov 48   ;;  %vm8584_vm4 = vcmask 7168  }
  0x27   :  { %v96_v24 = vld [vmem:[%s12532_s27 + $0x98] sm:$0xff]  ;;  %v97_v25 = vld [vmem:[%s12532_s27 + $0xa0] sm:$0xff]  ;;  %v98_v26 = vld [vmem:[%s12532_s27 + $0xa8] sm:$0xff]  ;;  %9784 = vmatprep.subr.mxu1 %v10698_v41  ;;  %s12501_s29 = smov 112   ;;  %s12505_s3 = smov 40   ;;  %vm10710_vm5 = vmmov 0  }
  0x28   :  { %v99_v27 = vld [vmem:[%s12532_s27 + $0xb0] sm:$0xff]  ;;  %v100_v28 = vld [vmem:[%s12532_s27 + $0xb8] sm:$0xff]  ;;  %v101_v29 = vld [vmem:[%s12532_s27 + $0xc0] sm:$0xff]  ;;  %9785 = vmatpush3.msra.mxu1 %v10698_v41  ;;  %s12511_s4 = smov 104   ;;  %s12537_s1 = sld [smem:[#allocation12_spill]]  ;;  %vm8960_vm6 = vcmask 1040384  }
  0x29   :  { %9736 = vmatmul.mubr.msk.f32.gmra.mxu0 %vm117_vm0, %v84_v12  ;;  %v102_v30 = vld [vmem:[%s12532_s27 + $0xc8] sm:$0xff]  ;;  %v103_v31 = vld [vmem:[%s12532_s27 + $0xd0] sm:$0xff]  ;;  %v104_v32 = vld [vmem:[%s12532_s27 + $0xd8] sm:$0xff]  ;;  %9786 = vmatprep.subr.mxu1 %v10698_v41  ;;  %s12542_s24 = smov 112   ;;  %s12543_s25 = smov 40  }
  0x2a   :  { %9738 = vmatprep.mubr.msk.f32.mxu0 %vm117_vm0, %v85_v13  ;;  %v105_v33 = vld [vmem:[%s12532_s27 + $0xe0] sm:$0xff]  ;;  %v106_v34 = vld [vmem:[%s12532_s27 + $0xe8] sm:$0xff]  ;;  %v107_v35 = vld [vmem:[%s12532_s27 + $0xf0] sm:$0xff]  ;;  %9787 = vmatpush3.msra.mxu1 %v10698_v41 }
  0x2b   :  { %v108_v36 = vld [vmem:[%s12532_s27 + $0xf8] sm:$0xff]  ;;  %v109_v37 = vld [vmem:[%s12532_s27 + $0x100] sm:$0xff]  ;;  %v110_v38 = vld [vmem:[%s12532_s27 + $0x108] sm:$0xff]  ;;  %9794 = vmatprep.subr.mxu1 %v10698_v41 }
  0x2c   :  { %v111_v39 = vld [vmem:[%s12532_s27 + $0x110] sm:$0xff]  ;;  %v112_v40 = vld [vmem:[%s12532_s27 + $0x118] sm:$0xff]  ;;  %s12507_s27 = smov 120  }
  0x2d   :  { %9739 = vmatmul.mubr.msk.f32.gmra.mxu0 %vm117_vm0, %v86_v14 }
  0x2e   :  { %9741 = vmatprep.mubr.msk.f32.mxu0 %vm117_vm0, %v87_v15 }
  0x31   :  { %9742 = vmatmul.mubr.msk.f32.gmra.mxu0 %vm117_vm0, %v88_v16 }
  0x32   :  { %9744 = vmatprep.mubr.msk.f32.mxu0 %vm117_vm0, %v89_v17 }
  0x35   :  { %9745 = vmatmul.mubr.msk.f32.gmra.mxu0 %vm117_vm0, %v90_v18 }
  0x36   :  { %9747 = vmatprep.mubr.msk.f32.mxu0 %vm117_vm0, %v91_v19 }
  0x39   :  { %9748 = vmatmul.mubr.msk.f32.gmra.mxu0 %vm117_vm0, %v92_v20 }
  0x3a   :  { %9750 = vmatprep.mubr.msk.f32.mxu0 %vm117_vm0, %v93_v21 }
  0x3d   :  { %9751 = vmatmul.mubr.msk.f32.gmra.mxu0 %vm117_vm0, %v94_v22 }
  0x3e   :  { %9753 = vmatprep.mubr.msk.f32.mxu0 %vm117_vm0, %v95_v23 }
  0x41   :  { %9754 = vmatmul.mubr.msk.f32.gmra.mxu0 %vm117_vm0, %v96_v24 }
  0x42   :  { %9756 = vmatprep.mubr.msk.f32.mxu0 %vm117_vm0, %v97_v25 }
  0x45   :  { %9757 = vmatmul.mubr.msk.f32.gmra.mxu0 %vm117_vm0, %v98_v26 }
  0x46   :  { %9759 = vmatprep.mubr.msk.f32.mxu0 %vm117_vm0, %v99_v27 }
  0x49   :  { %9760 = vmatmul.mubr.msk.f32.gmra.mxu0 %vm117_vm0, %v100_v28 }
  0x4a   :  { %9762 = vmatprep.mubr.msk.f32.mxu0 %vm117_vm0, %v101_v29 }
  0x4d   :  { %9763 = vmatmul.mubr.msk.f32.gmra.mxu0 %vm117_vm0, %v102_v30 }
  0x4e   :  { %9765 = vmatprep.mubr.msk.f32.mxu0 %vm117_vm0, %v103_v31 }
  0x51   :  { %9766 = vmatmul.mubr.msk.f32.gmra.mxu0 %vm117_vm0, %v104_v32 }
  0x52   :  { %9768 = vmatprep.mubr.msk.f32.mxu0 %vm117_vm0, %v105_v33 }
  0x55   :  { %9769 = vmatmul.mubr.msk.f32.gmra.mxu0 %vm117_vm0, %v106_v34 }
  0x56   :  { %9771 = vmatprep.mubr.msk.f32.mxu0 %vm117_vm0, %v107_v35 }
  0x59   :  { %9772 = vmatmul.mubr.msk.f32.gmra.mxu0 %vm117_vm0, %v108_v36 }
  0x5a   :  { %9774 = vmatprep.mubr.msk.f32.mxu0 %vm117_vm0, %v109_v37 }
  0x5d   :  { %9775 = vmatmul.mubr.msk.f32.gmra.mxu0 %vm117_vm0, %v110_v38 }
  0x5e   :  { %9777 = vmatprep.mubr.msk.f32.mxu0 %vm117_vm0, %v111_v39 }
  0x61   :  { %9778 = vmatmul.mubr.msk.f32.gmra.mxu0 %vm117_vm0, %v112_v40 }
  0xdd   :  { %v9728_v42 = vpop.f32.mrf.mxu0 }
  0xde   :  { %v472_v9 = vmax.f32 %v9728_v42, 0.0 }
  0xdf   :  { %v292_v43 = vpop.f32.mrf.mxu0 }
  0xe0   :  { %v471_v7 = vmax.f32 %v292_v43, 0.0 }
  0xe1   :  { %v9731_v44 = vpop.f32.mrf.mxu0 }
  0xe2   :  { %v474_v23 = vmax.f32 %v9731_v44, 0.0 }
  0xe3   :  { %v302_v45 = vpop.f32.mrf.mxu0 }
  0xe4   :  { %v473_v19 = vmax.f32 %v302_v45, 0.0 }
  0xe5   :  { %v9734_v46 = vpop.f32.mrf.mxu0 }
  0xe6   :  { %v476_v5 = vmax.f32 %v9734_v46, 0.0 }
  0xe7   :  { %v312_v47 = vpop.f32.mrf.mxu0 }
  0xe8   :  { %v475_v4 = vmax.f32 %v312_v47, 0.0  ;;  %v508_v15 = vmax.f32 %v472_v9, %v476_v5 }
  0xe9   :  { %v9737_v48 = vpop.f32.mrf.mxu0 }
  0xea   :  { %v507_v12 = vmax.f32 %v471_v7, %v475_v4  ;;  %v478_v16 = vmax.f32 %v9737_v48, 0.0 }
  0xeb   :  { %v322_v49 = vpop.f32.mrf.mxu0 }
  0xec   :  { %v477_v13 = vmax.f32 %v322_v49, 0.0  ;;  %v510_v32 = vmax.f32 %v474_v23, %v478_v16 }
  0xed   :  { %v9740_v50 = vpop.f32.mrf.mxu0 }
  0xee   :  { %v480_v10 = vmax.f32 %v9740_v50, 0.0  ;;  %v509_v28 = vmax.f32 %v473_v19, %v477_v13 }
  0xef   :  { %v332_v51 = vpop.f32.mrf.mxu0 }
  0xf0   :  { %v479_v8 = vmax.f32 %v332_v51, 0.0  ;;  %v512_v24 = vmax.f32 %v508_v15, %v480_v10 }
  0xf1   :  { %v9743_v52 = vpop.f32.mrf.mxu0 }
  0xf2   :  { %v511_v20 = vmax.f32 %v507_v12, %v479_v8  ;;  %v482_v25 = vmax.f32 %v9743_v52, 0.0 }
  0xf3   :  { %v342_v53 = vpop.f32.mrf.mxu0 }
  0xf4   :  { %v481_v21 = vmax.f32 %v342_v53, 0.0  ;;  %v514_v42 = vmax.f32 %v510_v32, %v482_v25 }
  0xf5   :  { %v9746_v54 = vpop.f32.mrf.mxu0 }
  0xf6   :  { %v484_v17 = vmax.f32 %v9746_v54, 0.0  ;;  %v513_v37 = vmax.f32 %v509_v28, %v481_v21 }
  0xf7   :  { %v352_v55 = vpop.f32.mrf.mxu0 }
  0xf8   :  { %v483_v14 = vmax.f32 %v352_v55, 0.0  ;;  %v516_v33 = vmax.f32 %v512_v24, %v484_v17 }
  0xf9   :  { %v9749_v56 = vpop.f32.mrf.mxu0 }
  0xfa   :  { %v515_v29 = vmax.f32 %v511_v20, %v483_v14  ;;  %v486_v34 = vmax.f32 %v9749_v56, 0.0 }
  0xfb   :  { %v362_v57 = vpop.f32.mrf.mxu0 }
  0xfc   :  { %v485_v30 = vmax.f32 %v362_v57, 0.0  ;;  %v518_v51 = vmax.f32 %v514_v42, %v486_v34  ;;  %v794_v42 = vld [vmem:[%s12533_s7 + $0x8] sm:$0xff] }
  0xfd   :  { %v9752_v58 = vpop.f32.mrf.mxu0 }
  0xfe   :  { %v488_v26 = vmax.f32 %v9752_v58, 0.0  ;;  %v517_v47 = vmax.f32 %v513_v37, %v485_v30  ;;  %v798_v37 = vld [vmem:[%s12533_s7 + $0x28] sm:$0xff] }
  0xff   :  { %v372_v59 = vpop.f32.mrf.mxu0 }
 0x100   :  { %v487_v22 = vmax.f32 %v372_v59, 0.0  ;;  %v520_v43 = vmax.f32 %v516_v33, %v488_v26 }
 0x101   :  { %v11000_v60 = vpop.f32.mrf.mxu0 }
 0x102   :  { %v519_v38 = vmax.f32 %v515_v29, %v487_v22  ;;  %v490_v44 = vmax.f32 %v11000_v60, 0.0 }
 0x103   :  { %v382_v61 = vpop.f32.mrf.mxu0 }
 0x104   :  { %v489_v39 = vmax.f32 %v382_v61, 0.0  ;;  %v522_v59 = vmax.f32 %v518_v51, %v490_v44  ;;  %v10699_v44 = vmov 0.0  }
 0x105   :  { %v9758_v62 = vpop.f32.mrf.mxu0 }
 0x106   :  { %v492_v35 = vmax.f32 %v9758_v62, 0.0  ;;  %v521_v56 = vmax.f32 %v517_v47, %v489_v39  ;;  %v796_v39 = vld [vmem:[%s12533_s7 + $0x18] sm:$0xff]  ;;  %v543_v47 = vld [vmem:[%s12486_s17] sm:$0xff] }
 0x107   :  { %v392_v63 = vpop.f32.mrf.mxu0 }
 0x108   :  { %v491_v31 = vmax.f32 %v392_v63, 0.0  ;;  %v524_v52 = vmax.f32 %v520_v43, %v492_v35  ;;  %v800_v35 = vld [vmem:[%s12533_s7 + $0x38] sm:$0xff]  ;;  %v793_v43 = vld [vmem:[%s12533_s7] sm:$0xff] }
 0x109   :  { %v11002_v0 = vpop.f32.mrf.mxu0 }
 0x10a   :  { %v523_v48 = vmax.f32 %v519_v38, %v491_v31  ;;  %v494_v53 = vmax.f32 %v11002_v0, 0.0  ;;  %v797_v38 = vld [vmem:[%s12533_s7 + $0x20] sm:$0xff] }
 0x10b   :  { %v11004_v1 = vpop.f32.mrf.mxu0 }
 0x10c   :  { %v493_v49 = vmax.f32 %v11004_v1, 0.0  ;;  %v526_v5 = vmax.f32 %v522_v59, %v494_v53 }
 0x10d   :  { %v9764_v2 = vpop.f32.mrf.mxu0 }
 0x10e   :  { %v496_v45 = vmax.f32 %v9764_v2, 0.0  ;;  %v525_v2 = vmax.f32 %v521_v56, %v493_v49 }
 0x10f   :  { %v412_v3 = vpop.f32.mrf.mxu0 }
 0x110   :  { %v495_v40 = vmax.f32 %v412_v3, 0.0  ;;  %v528_v61 = vmax.f32 %v524_v52, %v496_v45  ;;  %v11083_v45 = vld [vmem:[%s12486_s17 + $0x8] sm:$0xff] }
 0x111   :  { %v11006_v6 = vpop.f32.mrf.mxu0  ;;  %980 = vrot.lane.b32.xlu0 %v11083_v45, %s12515_s20 }
 0x112   :  { %v527_v57 = vmax.f32 %v523_v48, %v495_v40  ;;  %v498_v60 = vmax.f32 %v11006_v6, 0.0  ;;  %v795_v40 = vld [vmem:[%s12533_s7 + $0x10] sm:$0xff]  ;;  %v11101_v48 = vld [vmem:[%s12485_s16] sm:$0xff] }
 0x113   :  { %v422_v11 = vpop.f32.mrf.mxu0 }
 0x114   :  { %v497_v58 = vmax.f32 %v422_v11, 0.0  ;;  %v530_v12 = vmax.f32 %v526_v5, %v498_v60  ;;  %v9022_v5 = vld [vmem:[%s12535_s28] ss:$0 sm:$0xff] }
 0x115   :  { %v9770_v18 = vpop.f32.mrf.mxu0  ;;  %978 = vrot.lane.b32.xlu0 %v543_v47, %s12515_s20 }
 0x116   :  { %v500_v54 = vmax.f32 %v9770_v18, 0.0  ;;  %v529_v0 = vmax.f32 %v525_v2, %v497_v58 }
 0x117   :  { %v432_v27 = vpop.f32.mrf.mxu0 }
 0x118   :  { %v499_v50 = vmax.f32 %v432_v27, 0.0  ;;  %v532_v7 = vmax.f32 %v528_v61, %v500_v54 }
 0x119   :  { %v9773_v36 = vpop.f32.mrf.mxu0  ;;  %962 = vrot.lane.b32.xlu0 %v11101_v48, %s12513_s30 }
 0x11a   :  { %v531_v3 = vmax.f32 %v527_v57, %v499_v50  ;;  %v502_v8 = vmax.f32 %v9773_v36, 0.0  ;;  %v799_v36 = vld [vmem:[%s12533_s7 + $0x30] sm:$0xff] }
 0x11b   :  { %v442_v46 = vpop.f32.mrf.mxu0 }
 0x11c   :  { %v501_v4 = vmax.f32 %v442_v46, 0.0  ;;  %v534_v16 = vmax.f32 %v530_v12, %v502_v8  ;;  %v11090_v46 = vld [vmem:[%s12485_s16 + $0x8] sm:$0xff] }
 0x11d   :  { %v9776_v55 = vpop.f32.mrf.mxu0  ;;  %964 = vrot.lane.b32.xlu1 %v11090_v46, %s12513_s30  ;;  %922 = vrot.lane.b32.xlu0 %v543_v47, %s10702_s5 }
 0x11e   :  { %v504_v62 = vmax.f32 %v9776_v55, 0.0  ;;  %v533_v15 = vmax.f32 %v529_v0, %v501_v4 }
 0x11f   :  { %v452_v63 = vpop.f32.mrf.mxu0 }
 0x120   :  { %v503_v1 = vmax.f32 %v452_v63, 0.0  ;;  %v11014_v13 = vmax.f32 %v532_v7, %v504_v62 }
 0x121   :  { %v9779_v9 = vpop.f32.mrf.mxu0 }
 0x122   :  { %v11012_v10 = vmax.f32 %v531_v3, %v503_v1  ;;  %v506_v11 = vmax.f32 %v9779_v9, 0.0  ;;  %v9021_v3 = vld [vmem:[%s12534_s2] ss:$0 sm:$0xff] }
 0x123   :  { %v462_v14 = vpop.f32.mrf.mxu0 }
 0x124   :  { %v505_v6 = vmax.f32 %v462_v14, 0.0  ;;  %9788 = vmatprep.mubr.msk.f32.mxu1 %vm117_vm0, %v11012_v10  ;;  %v11023_v18 = vmax.f32 %v534_v16, %v506_v11 }
 0x125   :  { %9789 = vmatmul.mubr.msk.f32.vlgmr.msra.gmra.mxu1 %vm117_vm0, %v11014_v13 }
 0x126   :  { %v11020_v17 = vmax.f32 %v533_v15, %v505_v6  ;;  %9795 = vmatpush3.msra.mxu1 %v10698_v41 }
 0x127   :  { %9796 = vmatprep.subr.mxu1 %v10698_v41 }
 0x128   :  { %9791 = vmatprep.mubr.msk.f32.mxu1 %vm117_vm0, %v11020_v17  ;;  %9797 = vmatpush3.msra.mxu1 %v10698_v41 }
 0x129   :  { %9792 = vmatmul.mubr.msk.f32.gmra.mxu1 %vm117_vm0, %v11023_v18  ;;  %9798 = vmatprep.subr.mxu1 %v10698_v41 }
 0x12a   :  { %9799 = vmatpush3.msra.mxu1 %v10698_v41 }
 0x12b   :  { %9800 = vmatprep.subr.mxu1 %v10698_v41 }
 0x12c   :  { %9801 = vmatpush3.msra.mxu1 %v10698_v41 }
 0x12d   :  { %849 = vmatprep.subr.mxu1 %v800_v35 }
 0x18f   :  { %v11156_v47 = vpop.permute.xlu1 %964 }
 0x1e5   :  { %v9790_v19 = vpop.f32.mrf.mxu1 }
 0x1e6   :  { %v649_v20 = vmul.f32 0.03125, %v9790_v19  ;;  %v803_v19 = vlaneseq }
 0x1e7   :  { %v629_v21 = vpop.f32.mrf.mxu1 }
 0x1e8   :  { %v648_v22 = vmul.f32 0.03125, %v629_v21  ;;  %v11036_v23 = vsub.f32 %v11014_v13, %v649_v20  ;;  %v11122_v20 = vshrl.u32 %v803_v19, 7 }
 0x1e9   :  { %v9793_v24 = vpop.f32.mrf.mxu1 }
 0x1ea   :  { %v652_v25 = vsub.f32 %v11012_v10, %v648_v22  ;;  %v651_v26 = vmul.f32 0.03125, %v9793_v24  ;;  %v657_v30 = vmul.f32 %v11036_v23, %v11036_v23  ;;  %v805_v21 = vsub.s32 0, %v11122_v20  ;;  %v801_v22 = vld [vmem:[%s12536_s0] sm:$0x3] }
 0x1eb   :  { %v639_v27 = vpop.f32.mrf.mxu1 }
 0x1ec   :  { %v656_v28 = vmul.f32 %v652_v25, %v652_v25  ;;  %v650_v29 = vmul.f32 0.03125, %v639_v27  ;;  %v11042_v31 = vsub.f32 %v11023_v18, %v651_v26  ;;  %v11132_v26 = vpop.permute.xlu0 %980 }
 0x1ee   :  { %v11045_v32 = vsub.f32 %v11020_v17, %v650_v29  ;;  %9802 = vmatprep.mubr.msk.f32.mxu1 %vm117_vm0, %v656_v28  ;;  %v659_v34 = vmul.f32 %v11042_v31, %v11042_v31  ;;  %v809_v28 = vsub.s32 1, %v11122_v20 }
 0x1ef   :  { %9803 = vmatmul.mubr.msk.f32.vlgmr.msra.gmra.mxu1 %vm117_vm0, %v657_v30 }
 0x1f0   :  { %v658_v33 = vmul.f32 %v11045_v32, %v11045_v32  ;;  %850 = vmatpush1.msra.mxu1 %v799_v36  ;;  %v11143_v36 = vpop.permute.xlu0 %978 }
 0x1f1   :  { %851 = vmatprep.subr.mxu1 %v798_v37 }
 0x1f2   :  { %9805 = vmatprep.mubr.msk.f32.mxu1 %vm117_vm0, %v658_v33  ;;  %852 = vmatpush1.msra.mxu1 %v797_v38 }
 0x1f3   :  { %9806 = vmatmul.mubr.msk.f32.gmra.mxu1 %vm117_vm0, %v659_v34  ;;  %853 = vmatprep.subr.mxu1 %v796_v39  ;;  %v11138_v34 = vrot.slane %v801_v22, %v809_v28 }
 0x1f4   :  { %854 = vmatpush1.msra.mxu1 %v795_v40  ;;  %889 = vmatprep.mubr.f32.mxu1 %v10699_v44 }
 0x1f5   :  { %855 = vmatprep.subr.mxu1 %v794_v42 }
 0x1f6   :  { %856 = vmatpush1.msra.mxu1 %v793_v43  ;;  %v11154_v43 = vpop.permute.xlu0 %962 }
 0x2af   :  { %v9804_v49 = vpop.f32.mrf.mxu1 }
 0x2b0   :  { %v758_v50 = vmul.f32 0.03125, %v9804_v49 }
 0x2b1   :  { %v738_v51 = vpop.f32.mrf.mxu1 }
 0x2b2   :  { %v762_v52 = vadd.f32 1e-05, %v758_v50  ;;  %v757_v53 = vmul.f32 0.03125, %v738_v51 }
 0x2b3   :  { %v9807_v54 = vpop.f32.mrf.mxu1 }
 0x2b4   :  { %10474 = vrsqrt.f32 %v762_v52  ;;  %v761_v55 = vadd.f32 1e-05, %v757_v53  ;;  %v760_v56 = vmul.f32 0.03125, %v9807_v54  ;;  %v11161_v52 = vpop.permute.xlu0 %922 }
 0x2b5   :  { %v748_v57 = vpop.f32.mrf.mxu1 }
 0x2b6   :  { %10476 = vrsqrt.f32 %v761_v55  ;;  %v759_v58 = vmul.f32 0.03125, %v748_v57  ;;  %v764_v59 = vadd.f32 1e-05, %v760_v56 }
 0x2b8   :  { %v763_v61 = vadd.f32 1e-05, %v759_v58 }
 0x2ba   :  { %10478 = vrsqrt.f32 %v763_v61 }
 0x2bb   :  { %10480 = vrsqrt.f32 %v764_v59 }
 0x2c1   :  { %v10475_v60 = vpop.eup %10474 }
 0x2c2   :  { %v770_v2 = vmul.f32 %v10475_v60, %v11036_v23 }
 0x2c3   :  { %v10477_v62 = vpop.eup %10476 }
 0x2c4   :  { %v769_v63 = vmul.f32 %v10477_v62, %v652_v25  ;;  %v780_v8 = vmul.f32 %v9021_v3, %v770_v2  ;;  %v806_v25 = vrot.slane %v801_v22, %v805_v21 }
 0x2c6   :  { %v779_v4 = vmul.f32 %v9021_v3, %v769_v63  ;;  %v790_v12 = vadd.f32 %v9022_v5, %v780_v8 }
 0x2c7   :  { %v10479_v1 = vpop.eup %10478 }
 0x2c8   :  { %v789_v7 = vadd.f32 %v9022_v5, %v779_v4  ;;  %v771_v9 = vmul.f32 %v10479_v1, %v11045_v32  ;;  %v10481_v0 = vpop.eup %10480  ;;  %v11203_v4 = vld [vmem:[%s12487_s18 + $0x8] sm:$0xff] }
 0x2c9   :  { %v772_v14 = vmul.f32 %v10481_v0, %v11042_v31 }
 0x2ca   :  { %9023 = vmatmul.mubr.msk.f32.vlgmr.msra.gmra.mxu1 %vm117_vm0, %v789_v7  ;;  %v781_v11 = vmul.f32 %v9021_v3, %v771_v9 }
 0x2cb   :  { %895 = vmatprep.mubr.f32.mxu1 %v10699_v44  ;;  %v782_v6 = vmul.f32 %v9021_v3, %v772_v14 }
 0x2cc   :  { %v791_v15 = vadd.f32 %v9022_v5, %v781_v11 }
 0x2cd   :  { %v792_v16 = vadd.f32 %v9022_v5, %v782_v6  ;;  %v11208_v5 = vld [vmem:[%s12487_s18] sm:$0xff] }
 0x2ce   :  { %9024 = vmatmul.mubr.msk.f32.gmra.mxu1 %vm117_vm0, %v790_v12 }
 0x2cf   :  { %901 = vmatprep.mubr.f32.mxu1 %v10699_v44 }
 0x2d2   :  { %9025 = vmatmul.mubr.msk.f32.gmra.mxu1 %vm117_vm0, %v791_v15 }
 0x2d3   :  { %907 = vmatprep.mubr.f32.mxu1 %v10699_v44 }
 0x2d6   :  { %9026 = vmatmul.mubr.msk.f32.gmra.mxu1 %vm117_vm0, %v792_v16 }
 0x38a   :  { %v891_v23 = vpop.f32.mrf.mxu1 }
 0x38b   :  { %v892_v31 = vadd.f32 %v891_v23, %v806_v25 }
 0x38c   :  { %v11128_v24 = vpop.f32.mrf.mxu1 }
 0x38d   :  { %v990_v39 = vmul.f32 %v11143_v36, %v892_v31  ;;  %v974_v53 = vmul.f32 %v11154_v43, %v892_v31  ;;  %v934_v55 = vmul.f32 %v11161_v52, %v892_v31  ;;  %v914_v59 = vmul.f32 %v892_v31, %v11101_v48 }
 0x38e   :  { %v897_v27 = vpop.f32.mrf.mxu1 }
 0x38f   :  { %v898_v29 = vadd.f32 %v897_v27, %v806_v25 }
 0x390   :  { %v899_v30 = vpop.f32.mrf.mxu1 }
 0x391   :  { %v991_v32 = vmul.f32 %v11132_v26, %v898_v29  ;;  %v975_v49 = vmul.f32 %v11156_v47, %v898_v29  ;;  %v915_v63 = vmul.f32 %v898_v29, %v11090_v46  ;;  %v11193_v48 = vadd.f32 %v899_v30, %v11138_v34 }
 0x392   :  { %v903_v33 = vpop.f32.mrf.mxu1 }
 0x393   :  { %v11140_v35 = vadd.f32 %v903_v33, %v806_v25  ;;  %1000 = vrot.lane.b32.xlu1 %v991_v32, %s12515_s20 }
 0x394   :  { %v905_v37 = vpop.f32.mrf.mxu1 }
 0x395   :  { %v11146_v38 = vadd.f32 %v905_v37, %v11138_v34 }
 0x396   :  { %v909_v40 = vpop.f32.mrf.mxu1 }
 0x397   :  { %v11149_v42 = vadd.f32 %v909_v40, %v806_v25  ;;  %998 = vrot.lane.b32.xlu1 %v990_v39, %s12515_s20  ;;  %v11225_v25 = vadd.f32 %v11128_v24, %v11138_v34 }
 0x398   :  { %v11198_v46 = vpop.f32.mrf.mxu1 }
 0x39b   :  { %924 = vrot.lane.b32.xlu1 %v11083_v45, %s10702_s5 }
 0x405   :  { %v1001_v50 = vpop.permute.xlu1 %1000 }
 0x406   :  { %v11159_v51 = vadd.f32 %v1001_v50, %v975_v49 }
 0x408   :  { %1022 = vrot.lane.b32.xlu0 %v11159_v51, %s12513_s30 }
 0x409   :  { %v999_v54 = vpop.permute.xlu1 %998 }
 0x40a   :  { %v11167_v45 = vadd.f32 %v999_v54, %v974_v53 }
 0x40c   :  { %1020 = vrot.lane.b32.xlu1 %v11167_v45, %s12513_s30  ;;  %942 = vrot.lane.b32.xlu0 %v934_v55, %s12515_s20 }
 0x40d   :  { %v11172_v56 = vpop.permute.xlu1 %924 }
 0x40e   :  { %v935_v57 = vmul.f32 %v11172_v56, %v898_v29 }
 0x410   :  { %944 = vrot.lane.b32.xlu1 %v935_v57, %s12515_s20 }
 0x47a   :  { %v1023_v58 = vpop.permute.xlu0 %1022 }
 0x47b   :  { %9808 = vmatprep.subr.msk.mxu1 %vm1024_vm1, %v1023_v58 }
 0x47c   :  { %9809 = vmatpush3.xpose.msk.msra.mxu1 %vm1024_vm1, %v1023_v58 }
 0x47e   :  { %v1021_v61 = vpop.permute.xlu1 %1020  ;;  %v943_v60 = vpop.permute.xlu0 %942 }
 0x47f   :  { %v11179_v62 = vadd.f32 %v943_v60, %v914_v59  ;;  %9810 = vmatprep.subr.msk.mxu1 %vm1024_vm1, %v1021_v61 }
 0x480   :  { %9811 = vmatpush3.xpose.msk.msra.mxu1 %vm1024_vm1, %v1021_v61 }
 0x481   :  { %9812 = vmatprep.mubr.msk.f32.mxu1 %vm1024_vm1, %v11179_v62  ;;  %9815 = vmatprep.subr.mxu1 %v10698_v41 }
 0x482   :  { %v945_v2 = vpop.permute.xlu1 %944 }
 0x483   :  { %v11187_v3 = vadd.f32 %v945_v2, %v915_v63 }
 0x485   :  { %9813 = vmatmul.mubr.msk.f32.vlgmr.msra.gmra.mxu1 %vm1024_vm1, %v11187_v3 }
 0x486   :  { %9816 = vmatpush3.msra.mxu1 %v10698_v41 }
 0x487   :  { %9817 = vmatprep.subr.mxu1 %v10698_v41 }
 0x488   :  { %9818 = vmatpush3.msra.mxu1 %v10698_v41 }
 0x489   :  { %9822 = vmatprep.subr.mxu1 %v11193_v48 }
 0x545   :  { %v9814_v1 = vpop.f32.mrf.mxu1 }
 0x546   :  { %v1111_v7 = vmul.f32 %v9814_v1, %v11203_v4 }
 0x547   :  { %v1101_v8 = vpop.f32.mrf.mxu1 }
 0x548   :  { %v1110_v9 = vmul.f32 %v1101_v8, %v11208_v5  ;;  %v1116_v0 = vsel %vm1112_vm2, %v1111_v7, -inf }
 0x549   :  { %1117 = vmax.xlane.f32.xlu1 %v1116_v0 }
 0x54a   :  { %v1113_v12 = vsel %vm1112_vm2, %v1110_v9, -inf }
 0x54b   :  { %1114 = vmax.xlane.f32.xlu0 %v1113_v12 }
 0x55a   :  { %1295 = vrot.lane.b32.xlu1 %v11167_v45, %s12509_s26 }
 0x55e   :  { %1293 = vrot.lane.b32.xlu1 %v11187_v3, %s12507_s27 }
 0x561   :  { %1297 = vrot.lane.b32.xlu0 %v11159_v51, %s12509_s26  ;;  %s12540_s26 = smov 120  }
 0x565   :  { %1291 = vrot.lane.b32.xlu0 %v11179_v62, %s12507_s27 }
 0x5d2   :  { %v1118_v11 = vpop.xlane.xlu1 %1117 }
 0x5d3   :  { %v1120_v14 = vsub.f32 %v1111_v7, %v1118_v11 }
 0x5d4   :  { %v1115_v15 = vpop.xlane.xlu0 %1114 }
 0x5d5   :  { %v1119_v6 = vsub.f32 %v1110_v9, %v1115_v15  ;;  %v1123_v16 = vmul.f32 1.442695, %v1120_v14 }
 0x5d6   :  { %v1296_v39 = vpop.permute.xlu1 %1295 }
 0x5d7   :  { %v1121_v19 = vmul.f32 1.442695, %v1119_v6 }
 0x5d8   :  { %v1298_v27 = vpop.permute.xlu0 %1297 }
 0x5d9   :  { %10482 = vpow2.f32 %v1121_v19 }
 0x5da   :  { %10484 = vpow2.f32 %v1123_v16  ;;  %v1294_v40 = vpop.permute.xlu1 %1293 }
 0x5dc   :  { %v1292_v37 = vpop.permute.xlu0 %1291 }
 0x5e6   :  { %v10483_v22 = vpop.eup %10482 }
 0x5e7   :  { %v10485_v23 = vpop.eup %10484  ;;  %9819 = vmatprep.mubr.msk.f32.mxu1 %vm1112_vm2, %v10483_v22 }
 0x5e8   :  { %9820 = vmatmul.mubr.msk.f32.vlgmr.msra.gmra.mxu1 %vm1112_vm2, %v10485_v23 }
 0x5e9   :  { %9823 = vmatpush3.msra.mxu1 %v11193_v48 }
 0x5ea   :  { %9824 = vmatprep.subr.mxu1 %v11225_v25 }
 0x5eb   :  { %9825 = vmatpush3.msra.mxu1 %v11225_v25 }
 0x5ec   :  { %9829 = vmatprep.subr.msk.mxu1 %vm1024_vm1, %v1298_v27 }
 0x6a8   :  { %v9821_v29 = vpop.f32.mrf.mxu1 }
 0x6a9   :  { %10486 = vrcp.f32 %v9821_v29 }
 0x6aa   :  { %v1197_v30 = vpop.f32.mrf.mxu1 }
 0x6ab   :  { %10488 = vrcp.f32 %v1197_v30 }
 0x6b6   :  { %v10487_v31 = vpop.eup %10486 }
 0x6b7   :  { %v1209_v24 = vmul.f32 %v10487_v31, %v10485_v23 }
 0x6b8   :  { %v10489_v32 = vpop.eup %10488 }
 0x6b9   :  { %v1208_v33 = vmul.f32 %v10489_v32, %v10483_v22 }
 0x6bb   :  { %9826 = vmatprep.mubr.msk.f32.mxu1 %vm1112_vm2, %v1208_v33 }
 0x6bc   :  { %9827 = vmatmul.mubr.msk.f32.vlgmr.msra.gmra.mxu1 %vm1112_vm2, %v1209_v24 }
 0x6bd   :  { %9830 = vmatpush3.xpose.msk.msra.mxu1 %vm1024_vm1, %v1298_v27  ;;  %9833 = vmatprep.mubr.msk.f32.mxu1 %vm1024_vm1, %v1292_v37 }
 0x6be   :  { %9831 = vmatprep.subr.msk.mxu1 %vm1024_vm1, %v1296_v39 }
 0x6c1   :  { %9832 = vmatpush3.xpose.msk.msra.mxu1 %vm1024_vm1, %v1296_v39  ;;  %v11299_v39 = vld [vmem:[%s12537_s1] sm:$0xff] }
 0x6c2   :  { %9836 = vmatprep.subr.mxu1 %v10698_v41 }
 0x6c4   :  { %9834 = vmatmul.mubr.msk.f32.vlgmr.msra.gmra.mxu1 %vm1024_vm1, %v1294_v40 }
 0x6c5   :  { %9837 = vmatpush3.msra.mxu1 %v10698_v41 }
 0x6c6   :  { %9838 = vmatprep.subr.mxu1 %v10698_v41 }
 0x6c7   :  { %9839 = vmatpush3.msra.mxu1 %v10698_v41 }
 0x77c   :  { %v11243_v49 = vpop.f32.mrf.mxu1 }
 0x77e   :  { %v11245_v50 = vpop.f32.mrf.mxu1 }
 0x784   :  { %v9835_v53 = vpop.f32.mrf.mxu1 }
 0x785   :  { %v1383_v54 = vmul.f32 %v9835_v53, %v11203_v4 }
 0x786   :  { %v1373_v55 = vpop.f32.mrf.mxu1 }
 0x787   :  { %v1382_v57 = vmul.f32 %v1373_v55, %v11208_v5  ;;  %v1387_v58 = vsel %vm1112_vm2, %v1383_v54, -inf }
 0x788   :  { %1388 = vmax.xlane.f32.xlu1 %v1387_v58 }
 0x789   :  { %v1384_v59 = vsel %vm1112_vm2, %v1382_v57, -inf }
 0x78a   :  { %1385 = vmax.xlane.f32.xlu0 %v1384_v59 }
 0x799   :  { %1736 = vrot.lane.b32.xlu1 %v11167_v45, %s12503_s6 }
 0x79d   :  { %1734 = vrot.lane.b32.xlu1 %v11187_v3, %s12501_s29 }
 0x7a0   :  { %1738 = vrot.lane.b32.xlu0 %v11159_v51, %s12503_s6 }
 0x7a1   :  { %1483 = vrot.lane.b32.xlu1 %v11225_v25, %s12507_s27 }
 0x7a4   :  { %1732 = vrot.lane.b32.xlu0 %v11179_v62, %s12501_s29 }
 0x7a8   :  { %1485 = vrot.lane.b32.xlu0 %v11193_v48, %s12507_s27  ;;  %s12544_s27 = sld [smem:[#allocation13_spill]] }
 0x811   :  { %v1389_v61 = vpop.xlane.xlu1 %1388 }
 0x812   :  { %v1391_v60 = vsub.f32 %v1383_v54, %v1389_v61 }
 0x813   :  { %v1386_v63 = vpop.xlane.xlu0 %1385 }
 0x814   :  { %v1390_v2 = vsub.f32 %v1382_v57, %v1386_v63  ;;  %v1394_v1 = vmul.f32 1.442695, %v1391_v60 }
 0x815   :  { %v1737_v9 = vpop.permute.xlu1 %1736 }
 0x816   :  { %v1392_v7 = vmul.f32 1.442695, %v1390_v2 }
 0x817   :  { %v1739_v8 = vpop.permute.xlu0 %1738 }
 0x818   :  { %10490 = vpow2.f32 %v1392_v7  ;;  %9860 = vmatprep.subr.msk.mxu0 %vm1024_vm1, %v1739_v8 }
 0x819   :  { %10492 = vpow2.f32 %v1394_v1  ;;  %9861 = vmatpush3.xpose.msk.msra.mxu0 %vm1024_vm1, %v1739_v8  ;;  %v1735_v12 = vpop.permute.xlu1 %1734 }
 0x81a   :  { %9862 = vmatprep.subr.msk.mxu0 %vm1024_vm1, %v1737_v9 }
 0x81b   :  { %v1733_v0 = vpop.permute.xlu0 %1732 }
 0x81c   :  { %9864 = vmatprep.mubr.msk.f32.mxu0 %vm1024_vm1, %v1733_v0 }
 0x81d   :  { %9863 = vmatpush3.xpose.msk.msra.mxu0 %vm1024_vm1, %v1737_v9  ;;  %v1484_v6 = vpop.permute.xlu1 %1483 }
 0x81f   :  { %v1486_v11 = vpop.permute.xlu0 %1485 }
 0x820   :  { %9843 = vmatprep.subr.mxu1 %v1486_v11  ;;  %9865 = vmatmul.mubr.msk.f32.vlgmr.msra.gmra.mxu0 %vm1024_vm1, %v1735_v12 }
 0x825   :  { %v10491_v14 = vpop.eup %10490 }
 0x826   :  { %v10493_v15 = vpop.eup %10492  ;;  %9840 = vmatprep.mubr.msk.f32.mxu1 %vm1112_vm2, %v10491_v14 }
 0x827   :  { %9841 = vmatmul.mubr.msk.f32.vlgmr.msra.gmra.mxu1 %vm1112_vm2, %v10493_v15 }
 0x828   :  { %9844 = vmatpush3.msra.mxu1 %v1486_v11 }
 0x829   :  { %9845 = vmatprep.subr.mxu1 %v1484_v6 }
 0x82a   :  { %9846 = vmatpush3.msra.mxu1 %v1484_v6 }
 0x8e0   :  { %v9866_v16 = vpop.f32.mrf.mxu0 }
 0x8e1   :  { %v1824_v19 = vmul.f32 %v9866_v16, %v11203_v4 }
 0x8e2   :  { %v1814_v22 = vpop.f32.mrf.mxu0 }
 0x8e3   :  { %v1823_v23 = vmul.f32 %v1814_v22, %v11208_v5  ;;  %v1828_v27 = vsel %vm1112_vm2, %v1824_v19, -inf  ;;  %v11330_v22 = vld [vmem:[%s12537_s1 + $0x10] sm:$0xff] }
 0x8e4   :  { %1829 = vmax.xlane.f32.xlu1 %v1828_v27  ;;  %9881 = vmatprep.subr.mxu0 %v11330_v22 }
 0x8e5   :  { %v1825_v29 = vsel %vm1112_vm2, %v1823_v23, -inf  ;;  %9882 = vmatpush3.msra.mxu0 %v11330_v22 }
 0x8e6   :  { %1826 = vmax.xlane.f32.xlu0 %v1825_v29  ;;  %9893 = vmatprep.subr.mxu0 %v10698_v41 }
 0x8e7   :  { %v9842_v30 = vpop.f32.mrf.mxu1 }
 0x8e8   :  { %10494 = vrcp.f32 %v9842_v30 }
 0x8e9   :  { %v1468_v31 = vpop.f32.mrf.mxu1 }
 0x8ea   :  { %10496 = vrcp.f32 %v1468_v31 }
 0x8f5   :  { %1922 = vrot.lane.b32.xlu1 %v11225_v25, %s12501_s29  ;;  %v10495_v32 = vpop.eup %10494 }
 0x8f6   :  { %v1480_v37 = vmul.f32 %v10495_v32, %v10493_v15 }
 0x8f7   :  { %v10497_v33 = vpop.eup %10496 }
 0x8f8   :  { %v1479_v24 = vmul.f32 %v10497_v33, %v10491_v14 }
 0x8f9   :  { %2096 = vrot.lane.b32.xlu1 %v11167_v45, %s12505_s3  ;;  %v11292_v45 = vld [vmem:[%s12537_s1 + $0x8] sm:$0xff] }
 0x8fa   :  { %9847 = vmatprep.mubr.msk.f32.mxu1 %vm1112_vm2, %v1479_v24  ;;  %9850 = vmatprep.subr.mxu1 %v11292_v45 }
 0x8fb   :  { %9848 = vmatmul.mubr.msk.f32.vlgmr.msra.gmra.mxu1 %vm1112_vm2, %v1480_v37  ;;  %v545_v37 = vld [vmem:[%s12486_s17 + $0x10] sm:$0xff] }
 0x8fc   :  { %1924 = vrot.lane.b32.xlu0 %v11193_v48, %s12501_s29  ;;  %9851 = vmatpush3.msra.mxu1 %v11292_v45  ;;  %s12546_s29 = smov 64  }
 0x8fd   :  { %2094 = vrot.lane.b32.xlu1 %v11187_v3, %s12511_s4  ;;  %9855 = vmatprep.subr.mxu1 %v11299_v39 }
 0x900   :  { %2098 = vrot.lane.b32.xlu0 %v11159_v51, %s12505_s3 }
 0x904   :  { %2092 = vrot.lane.b32.xlu0 %v11179_v62, %s12511_s4  ;;  %s12541_s4 = smov 48  }
 0x96d   :  { %v1830_v3 = vpop.xlane.xlu1 %1829 }
 0x96e   :  { %v1832_v62 = vsub.f32 %v1824_v19, %v1830_v3  ;;  %v11355_v3 = vld [vmem:[%s12485_s16 + $0x18] sm:$0xff] }
 0x96f   :  { %v1827_v51 = vpop.xlane.xlu0 %1826 }
 0x970   :  { %v1831_v40 = vsub.f32 %v1823_v23, %v1827_v51  ;;  %v1835_v54 = vmul.f32 1.442695, %v1832_v62  ;;  %v546_v51 = vld [vmem:[%s12486_s17 + $0x18] sm:$0xff]  ;;  %s12538_s17 = smov 104  }
 0x972   :  { %v1833_v53 = vmul.f32 1.442695, %v1831_v40  ;;  %v11362_v40 = vld [vmem:[%s12485_s16 + $0x10] sm:$0xff] }
 0x973   :  { %v1925_v59 = vpop.permute.xlu0 %1924 }
 0x974   :  { %10498 = vpow2.f32 %v1833_v53 }
 0x975   :  { %10500 = vpow2.f32 %v1835_v54 }
 0x977   :  { %v2099_v60 = vpop.permute.xlu0 %2098 }
 0x97b   :  { %v2093_v6 = vpop.permute.xlu0 %2092 }
 0x981   :  { %v10499_v58 = vpop.eup %10498 }
 0x982   :  { %v10501_v61 = vpop.eup %10500 }
 0x9bb   :  { %v9849_v55 = vpop.f32.mrf.mxu1 }
 0x9bd   :  { %v1561_v57 = vpop.f32.mrf.mxu1 }
 0x9be   :  { %9852 = vmatprep.mubr.msk.f32.mxu1 %vm1024_vm1, %v1561_v57 }
 0x9bf   :  { %9853 = vmatmul.mubr.msk.f32.vlgmr.msra.gmra.mxu1 %vm1024_vm1, %v9849_v55 }
 0x9c0   :  { %9857 = vmatprep.mubr.msk.f32.mxu1 %vm1024_vm1, %v11245_v50  ;;  %9856 = vmatpush3.msra.mxu1 %v11299_v39  ;;  %v1923_v50 = vpop.permute.xlu1 %1922 }
 0x9c1   :  { %9867 = vmatprep.subr.mxu1 %v10698_v41 }
 0x9c3   :  { %9858 = vmatmul.mubr.msk.f32.vlgmr.msra.gmra.mxu1 %vm1024_vm1, %v11243_v49 }
 0x9c4   :  { %9868 = vmatpush3.msra.mxu1 %v10698_v41  ;;  %9871 = vmatprep.mubr.msk.f32.mxu1 %vm1112_vm2, %v10499_v58  ;;  %v2097_v16 = vpop.permute.xlu1 %2096 }
 0x9c5   :  { %9869 = vmatprep.subr.mxu1 %v10698_v41 }
 0x9c6   :  { %9870 = vmatpush3.msra.mxu1 %v10698_v41 }
 0x9c7   :  { %9874 = vmatprep.subr.mxu1 %v1925_v59  ;;  %9872 = vmatmul.mubr.msk.f32.vlgmr.msra.gmra.mxu1 %vm1112_vm2, %v10501_v61 }
 0x9c8   :  { %9875 = vmatpush3.msra.mxu1 %v1925_v59  ;;  %v2095_v19 = vpop.permute.xlu1 %2094 }
 0x9c9   :  { %9876 = vmatprep.subr.mxu1 %v1923_v50 }
 0x9ca   :  { %9877 = vmatpush3.msra.mxu1 %v1923_v50 }
 0x9cb   :  { %9886 = vmatprep.subr.msk.mxu1 %vm1024_vm1, %v2099_v60 }
 0xa7f   :  { %v9854_v49 = vpop.f32.mrf.mxu1 }
 0xa81   :  { %v1642_v63 = vpop.f32.mrf.mxu1 }
 0xa83   :  { %v9859_v2 = vpop.f32.mrf.mxu1 }
 0xa84   :  { %v11316_v1 = vadd.f32 %v9859_v2, %v9854_v49 }
 0xa85   :  { %v1723_v7 = vpop.f32.mrf.mxu1 }
 0xa86   :  { %v11318_v8 = vadd.f32 %v1723_v7, %v1642_v63 }
 0xa87   :  { %v9873_v9 = vpop.f32.mrf.mxu1 }
 0xa88   :  { %10502 = vrcp.f32 %v9873_v9 }
 0xa89   :  { %v1909_v0 = vpop.f32.mrf.mxu1 }
 0xa8a   :  { %10504 = vrcp.f32 %v1909_v0 }
 0xa95   :  { %v10503_v12 = vpop.eup %10502 }
 0xa96   :  { %v1921_v15 = vmul.f32 %v10503_v12, %v10501_v61 }
 0xa97   :  { %v10505_v11 = vpop.eup %10504 }
 0xa98   :  { %v1920_v14 = vmul.f32 %v10505_v11, %v10499_v58 }
 0xa9a   :  { %9878 = vmatprep.mubr.msk.f32.mxu1 %vm1112_vm2, %v1920_v14 }
 0xa9b   :  { %9879 = vmatmul.mubr.msk.f32.vlgmr.msra.gmra.mxu1 %vm1112_vm2, %v1921_v15 }
 0xa9c   :  { %9887 = vmatpush3.xpose.msk.msra.mxu1 %vm1024_vm1, %v2099_v60  ;;  %9890 = vmatprep.mubr.msk.f32.mxu1 %vm1024_vm1, %v2093_v6 }
 0xa9d   :  { %9888 = vmatprep.subr.msk.mxu1 %vm1024_vm1, %v2097_v16 }
 0xaa0   :  { %9889 = vmatpush3.xpose.msk.msra.mxu1 %vm1024_vm1, %v2097_v16 }
 0xaa3   :  { %9891 = vmatmul.mubr.msk.f32.vlgmr.msra.gmra.mxu1 %vm1024_vm1, %v2095_v19 }
 0xb5b   :  { %v9880_v23 = vpop.f32.mrf.mxu1 }
 0xb5d   :  { %v2000_v27 = vpop.f32.mrf.mxu1 }
 0xb5e   :  { %9883 = vmatprep.mubr.msk.f32.mxu0 %vm1024_vm1, %v2000_v27 }
 0xb5f   :  { %9884 = vmatmul.mubr.msk.f32.vlgmr.msra.gmra.mxu0 %vm1024_vm1, %v9880_v23 }
 0xb60   :  { %9894 = vmatpush3.msra.mxu0 %v10698_v41 }
 0xb61   :  { %9895 = vmatprep.subr.mxu0 %v10698_v41 }
 0xb62   :  { %9896 = vmatpush3.msra.mxu0 %v10698_v41 }
 0xb63   :  { %v9892_v29 = vpop.f32.mrf.mxu1 }
 0xb64   :  { %v2184_v30 = vmul.f32 %v9892_v29, %v11203_v4 }
 0xb65   :  { %v2174_v31 = vpop.f32.mrf.mxu1 }
 0xb66   :  { %v2183_v32 = vmul.f32 %v2174_v31, %v11208_v5  ;;  %v2188_v33 = vsel %vm1112_vm2, %v2184_v30, -inf }
 0xb67   :  { %2189 = vmax.xlane.f32.xlu1 %v2188_v33 }
 0xb68   :  { %v2185_v24 = vsel %vm1112_vm2, %v2183_v32, -inf }
 0xb69   :  { %2186 = vmax.xlane.f32.xlu0 %v2185_v24 }
 0xb78   :  { %982 = vrot.lane.b32.xlu1 %v545_v37, %s12515_s20 }
 0xb7f   :  { %984 = vrot.lane.b32.xlu0 %v546_v51, %s12515_s20 }
 0xb83   :  { %968 = vrot.lane.b32.xlu0 %v11355_v3, %s12513_s30 }
 0xb87   :  { %966 = vrot.lane.b32.xlu0 %v11362_v40, %s12513_s30 }
 0xb8b   :  { %926 = vrot.lane.b32.xlu0 %v545_v37, %s10702_s5 }
 0xb8f   :  { %2284 = vrot.lane.b32.xlu0 %v11193_v48, %s12538_s17 }
 0xbf0   :  { %v2190_v62 = vpop.xlane.xlu1 %2189 }
 0xbf1   :  { %v2192_v53 = vsub.f32 %v2184_v30, %v2190_v62  ;;  %v916_v62 = vmul.f32 %v11140_v35, %v11362_v40 }
 0xbf2   :  { %v2187_v54 = vpop.xlane.xlu0 %2186 }
 0xbf3   :  { %v2191_v55 = vsub.f32 %v2183_v32, %v2187_v54  ;;  %v2195_v57 = vmul.f32 1.442695, %v2192_v53 }
 0xbf4   :  { %v11373_v50 = vpop.permute.xlu1 %982 }
 0xbf5   :  { %v2193_v58 = vmul.f32 1.442695, %v2191_v55  ;;  %v992_v48 = vmul.f32 %v11373_v50, %v11140_v35 }
 0xbf6   :  { %v11369_v59 = vpop.permute.xlu0 %984 }
 0xbf7   :  { %10506 = vpow2.f32 %v2193_v58  ;;  %v993_v61 = vmul.f32 %v11369_v59, %v11149_v42 }
 0xbf8   :  { %10508 = vpow2.f32 %v2195_v57  ;;  %v917_v57 = vmul.f32 %v11149_v42, %v11355_v3 }
 0xbf9   :  { %1004 = vrot.lane.b32.xlu1 %v993_v61, %s12515_s20 }
 0xbfa   :  { %v11376_v60 = vpop.permute.xlu0 %968 }
 0xbfb   :  { %v977_v11 = vmul.f32 %v11376_v60, %v11149_v42 }
 0xbfd   :  { %1002 = vrot.lane.b32.xlu1 %v992_v48, %s12515_s20 }
 0xbfe   :  { %v11381_v49 = vpop.permute.xlu0 %966 }
 0xbff   :  { %v976_v6 = vmul.f32 %v11381_v49, %v11140_v35 }
 0xc01   :  { %928 = vrot.lane.b32.xlu1 %v546_v51, %s10702_s5  ;;  %s12539_s5 = smov 56  }
 0xc02   :  { %v11384_v63 = vpop.permute.xlu0 %926 }
 0xc03   :  { %v936_v16 = vmul.f32 %v11384_v63, %v11140_v35 }
 0xc04   :  { %v10507_v2 = vpop.eup %10506 }
 0xc05   :  { %v10509_v7 = vpop.eup %10508  ;;  %9897 = vmatprep.mubr.msk.f32.mxu0 %vm1112_vm2, %v10507_v2  ;;  %2282 = vrot.lane.b32.xlu1 %v11225_v25, %s12538_s17 }
 0xc06   :  { %9898 = vmatmul.mubr.msk.f32.vlgmr.msra.gmra.mxu0 %vm1112_vm2, %v10509_v7  ;;  %v2285_v9 = vpop.permute.xlu0 %2284 }
 0xc07   :  { %9900 = vmatprep.subr.mxu0 %v2285_v9 }
 0xc08   :  { %9901 = vmatpush3.msra.mxu0 %v2285_v9  ;;  %v11462_v9 = vadd.f32 %v11198_v46, %v11138_v34 }
 0xc1f   :  { %v9885_v0 = vpop.f32.mrf.mxu0 }
 0xc20   :  { %v11391_v12 = vadd.f32 %v9885_v0, %v11316_v1 }
 0xc21   :  { %v11417_v29 = vpop.f32.mrf.mxu0 }
 0xc6b   :  { %v1005_v14 = vpop.permute.xlu1 %1004 }
 0xc6c   :  { %v11395_v15 = vadd.f32 %v1005_v14, %v977_v11 }
 0xc6e   :  { %2456 = vrot.lane.b32.xlu0 %v11395_v15, %s12513_s30 }
 0xc6f   :  { %v1003_v25 = vpop.permute.xlu1 %1002 }
 0xc70   :  { %v11403_v19 = vadd.f32 %v1003_v25, %v976_v6 }
 0xc72   :  { %2454 = vrot.lane.b32.xlu1 %v11403_v19, %s12513_s30  ;;  %946 = vrot.lane.b32.xlu0 %v936_v16, %s12515_s20 }
 0xc73   :  { %v11408_v1 = vpop.permute.xlu1 %928 }
 0xc74   :  { %v937_v23 = vmul.f32 %v11408_v1, %v11149_v42  ;;  %v11449_v42 = vld [vmem:[%s12537_s1 + $0x18] sm:$0xff] }
 0xc75   :  { %9907 = vmatprep.subr.mxu1 %v11449_v42 }
 0xc76   :  { %948 = vrot.lane.b32.xlu1 %v937_v23, %s12515_s20  ;;  %2729 = vrot.lane.b32.xlu0 %v11395_v15, %s12539_s5 }
 0xc77   :  { %v2283_v27 = vpop.permute.xlu1 %2282  ;;  %9908 = vmatpush3.msra.mxu1 %v11449_v42 }
 0xc78   :  { %9902 = vmatprep.subr.mxu0 %v2283_v27  ;;  %9919 = vmatprep.subr.mxu1 %v10698_v41 }
 0xc79   :  { %9903 = vmatpush3.msra.mxu0 %v2283_v27 }
 0xc7a   :  { %2727 = vrot.lane.b32.xlu1 %v11403_v19, %s12539_s5 }
 0xcc6   :  { %v9899_v30 = vpop.f32.mrf.mxu0 }
 0xcc7   :  { %10510 = vrcp.f32 %v9899_v30 }
 0xcc8   :  { %v2269_v31 = vpop.f32.mrf.mxu0 }
 0xcc9   :  { %10512 = vrcp.f32 %v2269_v31 }
 0xcd4   :  { %v10511_v32 = vpop.eup %10510 }
 0xcd5   :  { %v2281_v37 = vmul.f32 %v10511_v32, %v10509_v7 }
 0xcd6   :  { %v10513_v33 = vpop.eup %10512 }
 0xcd7   :  { %v2280_v24 = vmul.f32 %v10513_v33, %v10507_v2 }
 0xcd9   :  { %9904 = vmatprep.mubr.msk.f32.mxu0 %vm1112_vm2, %v2280_v24 }
 0xcda   :  { %9905 = vmatmul.mubr.msk.f32.vlgmr.msra.gmra.mxu0 %vm1112_vm2, %v2281_v37 }
 0xce0   :  { %v2457_v51 = vpop.permute.xlu0 %2456 }
 0xce1   :  { %9912 = vmatprep.subr.msk.mxu0 %vm1024_vm1, %v2457_v51 }
 0xce2   :  { %9913 = vmatpush3.xpose.msk.msra.mxu0 %vm1024_vm1, %v2457_v51 }
 0xce4   :  { %v2455_v53 = vpop.permute.xlu1 %2454  ;;  %v947_v54 = vpop.permute.xlu0 %946 }
 0xce5   :  { %v11425_v55 = vadd.f32 %v947_v54, %v916_v62  ;;  %9914 = vmatprep.subr.msk.mxu0 %vm1024_vm1, %v2455_v53 }
 0xce6   :  { %9915 = vmatpush3.xpose.msk.msra.mxu0 %vm1024_vm1, %v2455_v53 }
 0xce7   :  { %2723 = vrot.lane.b32.xlu0 %v11425_v55, %s12540_s26  ;;  %9916 = vmatprep.mubr.msk.f32.mxu0 %vm1024_vm1, %v11425_v55 }
 0xce8   :  { %v949_v58 = vpop.permute.xlu1 %948  ;;  %v2730_v61 = vpop.permute.xlu0 %2729 }
 0xce9   :  { %v11435_v35 = vadd.f32 %v949_v58, %v917_v57  ;;  %9933 = vmatprep.subr.msk.mxu0 %vm1024_vm1, %v2730_v61 }
 0xceb   :  { %2725 = vrot.lane.b32.xlu1 %v11435_v35, %s12540_s26  ;;  %9917 = vmatmul.mubr.msk.f32.vlgmr.msra.gmra.mxu0 %vm1024_vm1, %v11435_v35 }
 0xcec   :  { %9934 = vmatpush3.xpose.msk.msra.mxu0 %vm1024_vm1, %v2730_v61  ;;  %v2728_v40 = vpop.permute.xlu1 %2727 }
 0xced   :  { %9935 = vmatprep.subr.msk.mxu0 %vm1024_vm1, %v2728_v40 }
 0xcf0   :  { %9936 = vmatpush3.xpose.msk.msra.mxu0 %vm1024_vm1, %v2728_v40 }
 0xcf1   :  { %9954 = vmatprep.subr.mxu0 %v11292_v45 }
 0xd59   :  { %v2724_v3 = vpop.permute.xlu0 %2723 }
 0xd5a   :  { %9937 = vmatprep.mubr.msk.f32.mxu0 %vm1024_vm1, %v2724_v3 }
 0xd5d   :  { %v2726_v48 = vpop.permute.xlu1 %2725 }
 0xd5e   :  { %9938 = vmatmul.mubr.msk.f32.vlgmr.msra.gmra.mxu0 %vm1024_vm1, %v2726_v48 }
 0xd5f   :  { %9955 = vmatpush3.msra.mxu0 %v11292_v45 }
 0xd9a   :  { %v9906_v2 = vpop.f32.mrf.mxu0 }
 0xd9c   :  { %v2360_v7 = vpop.f32.mrf.mxu0 }
 0xd9d   :  { %9909 = vmatprep.mubr.msk.f32.mxu1 %vm1024_vm1, %v2360_v7 }
 0xd9e   :  { %9910 = vmatmul.mubr.msk.f32.vlgmr.msra.gmra.mxu1 %vm1024_vm1, %v9906_v2 }
 0xd9f   :  { %9920 = vmatpush3.msra.mxu1 %v10698_v41 }
 0xda0   :  { %9921 = vmatprep.subr.mxu1 %v10698_v41 }
 0xda1   :  { %9922 = vmatpush3.msra.mxu1 %v10698_v41 }
 0xda2   :  { %9926 = vmatprep.subr.mxu1 %v11462_v9 }
 0xdab   :  { %v9918_v0 = vpop.f32.mrf.mxu0 }
 0xdac   :  { %v2544_v45 = vmul.f32 %v9918_v0, %v11203_v4 }
 0xdad   :  { %v2534_v11 = vpop.f32.mrf.mxu0 }
 0xdae   :  { %v2543_v14 = vmul.f32 %v2534_v11, %v11208_v5  ;;  %v2548_v6 = vsel %vm1112_vm2, %v2544_v45, -inf }
 0xdaf   :  { %2549 = vmax.xlane.f32.xlu1 %v2548_v6 }
 0xdb0   :  { %v2545_v25 = vsel %vm1112_vm2, %v2543_v14, -inf }
 0xdb1   :  { %2546 = vmax.xlane.f32.xlu0 %v2545_v25 }
 0xdc0   :  { %2917 = vrot.lane.b32.xlu1 %v11462_v9, %s12540_s26 }
 0xdc4   :  { %3170 = vrot.lane.b32.xlu1 %v11395_v15, %s12541_s4 }
 0xdc8   :  { %3168 = vrot.lane.b32.xlu1 %v11403_v19, %s12541_s4 }
 0xdcc   :  { %3166 = vrot.lane.b32.xlu1 %v11435_v35, %s12542_s24 }
 0xe1e   :  { %v9939_v34 = vpop.f32.mrf.mxu0 }
 0xe1f   :  { %v2815_v23 = vmul.f32 %v9939_v34, %v11203_v4 }
 0xe20   :  { %v2805_v46 = vpop.f32.mrf.mxu0 }
 0xe21   :  { %v2814_v16 = vmul.f32 %v2805_v46, %v11208_v5  ;;  %v2819_v30 = vsel %vm1112_vm2, %v2815_v23, -inf }
 0xe23   :  { %v2816_v27 = vsel %vm1112_vm2, %v2814_v16, -inf }
 0xe24   :  { %2817 = vmax.xlane.f32.xlu0 %v2816_v27 }
 0xe28   :  { %2820 = vmax.xlane.f32.xlu0 %v2819_v30 }
 0xe38   :  { %v2550_v31 = vpop.xlane.xlu1 %2549 }
 0xe39   :  { %v2552_v32 = vsub.f32 %v2544_v45, %v2550_v31 }
 0xe3a   :  { %v2547_v33 = vpop.xlane.xlu0 %2546 }
 0xe3b   :  { %v2551_v24 = vsub.f32 %v2543_v14, %v2547_v33  ;;  %v2555_v37 = vmul.f32 1.442695, %v2552_v32 }
 0xe3c   :  { %v2918_v51 = vpop.permute.xlu1 %2917 }
 0xe3d   :  { %v2553_v62 = vmul.f32 1.442695, %v2551_v24 }
 0xe3e   :  { %2915 = vrot.lane.b32.xlu0 %v11146_v38, %s12540_s26 }
 0xe3f   :  { %10514 = vpow2.f32 %v2553_v62 }
 0xe40   :  { %10516 = vpow2.f32 %v2555_v37  ;;  %v11485_v53 = vpop.permute.xlu1 %3170 }
 0xe41   :  { %9964 = vmatprep.subr.msk.mxu0 %vm1024_vm1, %v11485_v53 }
 0xe42   :  { %3164 = vrot.lane.b32.xlu0 %v11425_v55, %s12542_s24 }
 0xe4c   :  { %v10515_v54 = vpop.eup %10514 }
 0xe4d   :  { %v10517_v57 = vpop.eup %10516  ;;  %9923 = vmatprep.mubr.msk.f32.mxu1 %vm1112_vm2, %v10515_v54 }
 0xe4e   :  { %9924 = vmatmul.mubr.msk.f32.vlgmr.msra.gmra.mxu1 %vm1112_vm2, %v10517_v57 }
 0xe4f   :  { %9927 = vmatpush3.msra.mxu1 %v11462_v9 }
 0xe50   :  { %9928 = vmatprep.subr.mxu1 %v11146_v38 }
 0xe51   :  { %9929 = vmatpush3.msra.mxu1 %v11146_v38 }
 0xe52   :  { %9940 = vmatprep.subr.mxu1 %v10698_v41 }
 0xe5e   :  { %v9911_v58 = vpop.f32.mrf.mxu1 }
 0xe5f   :  { %v11498_v61 = vadd.f32 %v9911_v58, %v11391_v12  ;;  %v3169_v58 = vpop.permute.xlu1 %3168 }
 0xe60   :  { %v11500_v3 = vpop.f32.mrf.mxu1 }
 0xead   :  { %v2818_v40 = vpop.xlane.xlu0 %2817 }
 0xeae   :  { %v2822_v48 = vsub.f32 %v2814_v16, %v2818_v40 }
 0xeb0   :  { %v2824_v11 = vmul.f32 1.442695, %v2822_v48 }
 0xeb1   :  { %v2821_v2 = vpop.xlane.xlu0 %2820 }
 0xeb2   :  { %v2823_v0 = vsub.f32 %v2815_v23, %v2821_v2 }
 0xeb4   :  { %v2826_v14 = vmul.f32 1.442695, %v2823_v0 }
 0xeb5   :  { %v2916_v23 = vpop.permute.xlu0 %2915 }
 0xf0e   :  { %v9925_v7 = vpop.f32.mrf.mxu1 }
 0xf0f   :  { %10518 = vrcp.f32 %v9925_v7 }
 0xf10   :  { %v2629_v45 = vpop.f32.mrf.mxu1 }
 0xf11   :  { %10520 = vrcp.f32 %v2629_v45 }
 0xf12   :  { %10522 = vpow2.f32 %v2824_v11 }
 0xf13   :  { %10524 = vpow2.f32 %v2826_v14 }
 0xf1c   :  { %v10519_v6 = vpop.eup %10518 }
 0xf1d   :  { %v2641_v46 = vmul.f32 %v10519_v6, %v10517_v57  ;;  %v3165_v57 = vpop.permute.xlu0 %3164 }
 0xf1e   :  { %v10521_v25 = vpop.eup %10520 }
 0xf1f   :  { %v2640_v34 = vmul.f32 %v10521_v25, %v10515_v54  ;;  %v10523_v12 = vpop.eup %10522 }
 0xf20   :  { %v10525_v16 = vpop.eup %10524 }
 0xf21   :  { %9930 = vmatprep.mubr.msk.f32.mxu1 %vm1112_vm2, %v2640_v34 }
 0xf22   :  { %9931 = vmatmul.mubr.msk.f32.vlgmr.msra.gmra.mxu1 %vm1112_vm2, %v2641_v46 }
 0xf23   :  { %9941 = vmatpush3.msra.mxu1 %v10698_v41  ;;  %9944 = vmatprep.mubr.msk.f32.mxu1 %vm1112_vm2, %v10523_v12 }
 0xf24   :  { %9942 = vmatprep.subr.mxu1 %v10698_v41 }
 0xf25   :  { %9943 = vmatpush3.msra.mxu1 %v10698_v41 }
 0xf26   :  { %9947 = vmatprep.subr.mxu1 %v2918_v51  ;;  %9945 = vmatmul.mubr.msk.f32.vlgmr.msra.gmra.mxu1 %vm1112_vm2, %v10525_v16 }
 0xf27   :  { %9948 = vmatpush3.msra.mxu1 %v2918_v51 }
 0xf28   :  { %9949 = vmatprep.subr.mxu1 %v2916_v23 }
 0xf29   :  { %9950 = vmatpush3.msra.mxu1 %v2916_v23 }
 0xf2a   :  { %9959 = vmatprep.subr.mxu1 %v11299_v39 }
 0xfe2   :  { %v9932_v27 = vpop.f32.mrf.mxu1 }
 0xfe4   :  { %v2714_v30 = vpop.f32.mrf.mxu1 }
 0xfe6   :  { %v9946_v31 = vpop.f32.mrf.mxu1 }
 0xfe7   :  { %10526 = vrcp.f32 %v9946_v31 }
 0xfe8   :  { %v2900_v32 = vpop.f32.mrf.mxu1 }
 0xfe9   :  { %10528 = vrcp.f32 %v2900_v32 }
 0xff4   :  { %v10527_v33 = vpop.eup %10526 }
 0xff5   :  { %v2912_v62 = vmul.f32 %v10527_v33, %v10525_v16 }
 0xff6   :  { %v10529_v24 = vpop.eup %10528 }
 0xff7   :  { %v2911_v37 = vmul.f32 %v10529_v24, %v10523_v12 }
 0xff9   :  { %9951 = vmatprep.mubr.msk.f32.mxu1 %vm1112_vm2, %v2911_v37 }
 0xffa   :  { %9952 = vmatmul.mubr.msk.f32.vlgmr.msra.gmra.mxu1 %vm1112_vm2, %v2912_v62 }
 0xffb   :  { %9961 = vmatprep.mubr.msk.f32.mxu1 %vm1024_vm1, %v2714_v30  ;;  %9960 = vmatpush3.msra.mxu1 %v11299_v39  ;;  %v3167_v39 = vpop.permute.xlu1 %3166 }
 0xffc   :  { %9971 = vmatprep.subr.mxu1 %v10698_v41 }
 0xffe   :  { %9962 = vmatmul.mubr.msk.f32.vlgmr.msra.gmra.mxu1 %vm1024_vm1, %v9932_v27 }
 0xfff   :  { %9972 = vmatpush3.msra.mxu1 %v10698_v41 }
0x1000   :  { %9973 = vmatprep.subr.mxu1 %v10698_v41 }
0x1001   :  { %9974 = vmatpush3.msra.mxu1 %v10698_v41 }
0x10ba   :  { %v9953_v51 = vpop.f32.mrf.mxu1 }
0x10bc   :  { %v2993_v54 = vpop.f32.mrf.mxu1 }
0x10bd   :  { %9956 = vmatprep.mubr.msk.f32.mxu0 %vm1024_vm1, %v2993_v54 }
0x10be   :  { %9957 = vmatmul.mubr.msk.f32.vlgmr.msra.gmra.mxu0 %vm1024_vm1, %v9953_v51 }
0x10bf   :  { %9965 = vmatpush3.xpose.msk.msra.mxu0 %vm1024_vm1, %v11485_v53  ;;  %9968 = vmatprep.mubr.msk.f32.mxu0 %vm1024_vm1, %v3165_v57 }
0x10c0   :  { %9966 = vmatprep.subr.msk.mxu0 %vm1024_vm1, %v3169_v58 }
0x10c3   :  { %9967 = vmatpush3.xpose.msk.msra.mxu0 %vm1024_vm1, %v3169_v58 }
0x10c4   :  { %9985 = vmatprep.subr.mxu0 %v11330_v22 }
0x10c6   :  { %9969 = vmatmul.mubr.msk.f32.vlgmr.msra.gmra.mxu0 %vm1024_vm1, %v3167_v39 }
0x10c7   :  { %9986 = vmatpush3.msra.mxu0 %v11330_v22 }
0x10c8   :  { %9997 = vmatprep.subr.mxu0 %v10698_v41 }
0x117e   :  { %v11530_v40 = vpop.f32.mrf.mxu0 }
0x1180   :  { %v11532_v48 = vpop.f32.mrf.mxu0 }
0x1186   :  { %v9970_v53 = vpop.f32.mrf.mxu0 }
0x1187   :  { %v3256_v2 = vmul.f32 %v9970_v53, %v11203_v4 }
0x1188   :  { %v3246_v7 = vpop.f32.mrf.mxu0 }
0x1189   :  { %v3255_v0 = vmul.f32 %v3246_v7, %v11208_v5  ;;  %v3260_v45 = vsel %vm1112_vm2, %v3256_v2, -inf }
0x118a   :  { %3261 = vmax.xlane.f32.xlu1 %v3260_v45 }
0x118b   :  { %v3257_v11 = vsel %vm1112_vm2, %v3255_v0, -inf }
0x118c   :  { %3258 = vmax.xlane.f32.xlu0 %v3257_v11 }
0x119b   :  { %3354 = vrot.lane.b32.xlu1 %v11146_v38, %s12542_s24 }
0x119f   :  { %3528 = vrot.lane.b32.xlu1 %v11403_v19, %s12543_s25 }
0x11a2   :  { %3356 = vrot.lane.b32.xlu0 %v11462_v9, %s12542_s24 }
0x11a3   :  { %3526 = vrot.lane.b32.xlu1 %v11435_v35, %s12538_s17  ;;  %v9963_v35 = vpop.f32.mrf.mxu1 }
0x11a5   :  { %v11553_v23 = vpop.f32.mrf.mxu1 }
0x11a6   :  { %3530 = vrot.lane.b32.xlu0 %v11395_v15, %s12543_s25 }
0x11aa   :  { %3524 = vrot.lane.b32.xlu0 %v11425_v55, %s12538_s17 }
0x1213   :  { %v3262_v22 = vpop.xlane.xlu1 %3261 }
0x1214   :  { %v3264_v14 = vsub.f32 %v3256_v2, %v3262_v22 }
0x1215   :  { %v3259_v6 = vpop.xlane.xlu0 %3258 }
0x1216   :  { %v3263_v25 = vsub.f32 %v3255_v0, %v3259_v6  ;;  %v3267_v34 = vmul.f32 1.442695, %v3264_v14 }
0x1217   :  { %v3355_v15 = vpop.permute.xlu1 %3354 }
0x1218   :  { %v3265_v46 = vmul.f32 1.442695, %v3263_v25 }
0x1219   :  { %v3357_v12 = vpop.permute.xlu0 %3356 }
0x121a   :  { %10530 = vpow2.f32 %v3265_v46  ;;  %9978 = vmatprep.subr.mxu1 %v3357_v12 }
0x121b   :  { %10532 = vpow2.f32 %v3267_v34  ;;  %v3529_v62 = vpop.permute.xlu1 %3528 }
0x121d   :  { %v3531_v55 = vpop.permute.xlu0 %3530 }
0x121f   :  { %v3527_v51 = vpop.permute.xlu1 %3526 }
0x1221   :  { %v3525_v37 = vpop.permute.xlu0 %3524 }
0x1227   :  { %v10531_v19 = vpop.eup %10530 }
0x1228   :  { %v10533_v16 = vpop.eup %10532  ;;  %9975 = vmatprep.mubr.msk.f32.mxu1 %vm1112_vm2, %v10531_v19 }
0x1229   :  { %9976 = vmatmul.mubr.msk.f32.vlgmr.msra.gmra.mxu1 %vm1112_vm2, %v10533_v16 }
0x122a   :  { %9979 = vmatpush3.msra.mxu1 %v3357_v12 }
0x122b   :  { %9980 = vmatprep.subr.mxu1 %v3355_v15 }
0x122c   :  { %9981 = vmatpush3.msra.mxu1 %v3355_v15  ;;  %v2090_v15 = vadd.f32 %v11417_v29, %v11318_v8 }
0x122d   :  { %9990 = vmatprep.subr.msk.mxu1 %vm1024_vm1, %v3531_v55 }
0x12e9   :  { %v9977_v27 = vpop.f32.mrf.mxu1 }
0x12ea   :  { %10534 = vrcp.f32 %v9977_v27 }
0x12eb   :  { %v3341_v30 = vpop.f32.mrf.mxu1 }
0x12ec   :  { %10536 = vrcp.f32 %v3341_v30 }
0x12f7   :  { %v10535_v31 = vpop.eup %10534 }
0x12f8   :  { %v3353_v24 = vmul.f32 %v10535_v31, %v10533_v16 }
0x12f9   :  { %v10537_v32 = vpop.eup %10536 }
0x12fa   :  { %v3352_v33 = vmul.f32 %v10537_v32, %v10531_v19 }
0x12fc   :  { %9982 = vmatprep.mubr.msk.f32.mxu1 %vm1112_vm2, %v3352_v33 }
0x12fd   :  { %9983 = vmatmul.mubr.msk.f32.vlgmr.msra.gmra.mxu1 %vm1112_vm2, %v3353_v24 }
0x12fe   :  { %9991 = vmatpush3.xpose.msk.msra.mxu1 %vm1024_vm1, %v3531_v55  ;;  %9994 = vmatprep.mubr.msk.f32.mxu1 %vm1024_vm1, %v3525_v37  ;;  %v2450_v55 = vadd.f32 %v11500_v3, %v2090_v15  ;;  %v11661_v15 = vld [vmem:[%s12478_s9] ss:$0 sm:$0xff] }
0x12ff   :  { %9992 = vmatprep.subr.msk.mxu1 %vm1024_vm1, %v3529_v62 }
0x1300   :  { %v3884_v30 = vadd.f32 %v2450_v55, %v11012_v10  ;;  %v3885_v10 = vadd.f32 %v11498_v61, %v11014_v13 }
0x1302   :  { %9993 = vmatpush3.xpose.msk.msra.mxu1 %vm1024_vm1, %v3529_v62 }
0x1303   :  { %10011 = vmatprep.subr.mxu1 %v11449_v42 }
0x1305   :  { %9995 = vmatmul.mubr.msk.f32.vlgmr.msra.gmra.mxu1 %vm1024_vm1, %v3527_v51 }
0x1306   :  { %10012 = vmatpush3.msra.mxu1 %v11449_v42 }
0x1307   :  { %10030 = vmatprep.subr.mxu1 %v10698_v41 }
0x13bd   :  { %v9984_v54 = vpop.f32.mrf.mxu1 }
0x13bf   :  { %v3432_v57 = vpop.f32.mrf.mxu1 }
0x13c0   :  { %9987 = vmatprep.mubr.msk.f32.mxu0 %vm1024_vm1, %v3432_v57 }
0x13c1   :  { %9988 = vmatmul.mubr.msk.f32.vlgmr.msra.gmra.mxu0 %vm1024_vm1, %v9984_v54 }
0x13c2   :  { %9998 = vmatpush3.msra.mxu0 %v10698_v41 }
0x13c3   :  { %9999 = vmatprep.subr.mxu0 %v10698_v41 }
0x13c4   :  { %10000 = vmatpush3.msra.mxu0 %v10698_v41 }
0x13c5   :  { %v9996_v58 = vpop.f32.mrf.mxu1 }
0x13c6   :  { %v3616_v39 = vmul.f32 %v9996_v58, %v11203_v4  ;;  %v4146_v58 = vld [vmem:[%s12479_s10 + $0x18] sm:$0xff] }
0x13c7   :  { %v3606_v53 = vpop.f32.mrf.mxu1 }
0x13c8   :  { %v3615_v42 = vmul.f32 %v3606_v53, %v11208_v5  ;;  %v3620_v2 = vsel %vm1112_vm2, %v3616_v39, -inf  ;;  %v4144_v53 = vld [vmem:[%s12479_s10 + $0x8] sm:$0xff] }
0x13c9   :  { %3621 = vmax.xlane.f32.xlu1 %v3620_v2  ;;  %v3156_v2 = vadd.f32 %v11553_v23, %v11532_v48 }
0x13ca   :  { %v3617_v7 = vsel %vm1112_vm2, %v3615_v42, -inf }
0x13cb   :  { %3618 = vmax.xlane.f32.xlu0 %v3617_v7 }
0x13da   :  { %3714 = vrot.lane.b32.xlu1 %v11146_v38, %s12538_s17 }
0x13e1   :  { %3716 = vrot.lane.b32.xlu0 %v11462_v9, %s12538_s17  ;;  %v3161_v9 = vadd.f32 %v9963_v35, %v11530_v40  ;;  %v9107_v40 = vld [vmem:[%s12544_s27] ss:$0 sm:$0xff] }
0x13e2   :  { %v11593_v33 = vadd.f32 %v9107_v40, %v3884_v30  ;;  %v11606_v8 = vadd.f32 %v9107_v40, %v3885_v10  ;;  %v4290_v10 = vld [vmem:[%s12481_s12 + $0x18] sm:$0xff] }
0x1452   :  { %v3622_v0 = vpop.xlane.xlu1 %3621 }
0x1453   :  { %v3624_v45 = vsub.f32 %v3616_v39, %v3622_v0  ;;  %v4145_v39 = vld [vmem:[%s12479_s10 + $0x10] sm:$0xff] }
0x1454   :  { %v3619_v11 = vpop.xlane.xlu0 %3618 }
0x1455   :  { %v3623_v22 = vsub.f32 %v3615_v42, %v3619_v11  ;;  %v3627_v4 = vmul.f32 1.442695, %v3624_v45  ;;  %v4143_v42 = vld [vmem:[%s12479_s10] sm:$0xff] }
0x1456   :  { %v3715_v38 = vpop.permute.xlu1 %3714 }
0x1457   :  { %v3625_v14 = vmul.f32 1.442695, %v3623_v22 }
0x1458   :  { %v3717_v6 = vpop.permute.xlu0 %3716 }
0x1459   :  { %10538 = vpow2.f32 %v3625_v14  ;;  %10004 = vmatprep.subr.mxu0 %v3717_v6 }
0x145a   :  { %10540 = vpow2.f32 %v3627_v4 }
0x1466   :  { %v10539_v5 = vpop.eup %10538 }
0x1467   :  { %v10541_v25 = vpop.eup %10540  ;;  %10001 = vmatprep.mubr.msk.f32.mxu0 %vm1112_vm2, %v10539_v5 }
0x1468   :  { %10002 = vmatmul.mubr.msk.f32.vlgmr.msra.gmra.mxu0 %vm1112_vm2, %v10541_v25 }
0x1469   :  { %10005 = vmatpush3.msra.mxu0 %v3717_v6 }
0x146a   :  { %10006 = vmatprep.subr.mxu0 %v3715_v38 }
0x146b   :  { %10007 = vmatpush3.msra.mxu0 %v3715_v38 }
0x146c   :  { %10016 = vmatprep.subr.mxu0 %v10698_v41 }
0x1481   :  { %v9989_v34 = vpop.f32.mrf.mxu0 }
0x1482   :  { %v11582_v46 = vadd.f32 %v9989_v34, %v3161_v9 }
0x1483   :  { %v11584_v12 = vpop.f32.mrf.mxu0 }
0x1484   :  { %v3522_v0 = vadd.f32 %v11584_v12, %v3156_v2 }
0x1528   :  { %v10003_v19 = vpop.f32.mrf.mxu0 }
0x1529   :  { %10542 = vrcp.f32 %v10003_v19 }
0x152a   :  { %v3701_v16 = vpop.f32.mrf.mxu0 }
0x152b   :  { %10544 = vrcp.f32 %v3701_v16 }
0x1536   :  { %v10543_v27 = vpop.eup %10542 }
0x1537   :  { %v3713_v35 = vmul.f32 %v10543_v27, %v10541_v25 }
0x1538   :  { %v10545_v31 = vpop.eup %10544 }
0x1539   :  { %v3712_v32 = vmul.f32 %v10545_v31, %v10539_v5  ;;  %v4294_v31 = vld [vmem:[%s12481_s12 + $0x38] sm:$0xff] }
0x153b   :  { %10008 = vmatprep.mubr.msk.f32.mxu0 %vm1112_vm2, %v3712_v32  ;;  %v4293_v32 = vld [vmem:[%s12481_s12 + $0x30] sm:$0xff] }
0x153c   :  { %10009 = vmatmul.mubr.msk.f32.vlgmr.msra.gmra.mxu0 %vm1112_vm2, %v3713_v35  ;;  %v4291_v35 = vld [vmem:[%s12481_s12 + $0x20] sm:$0xff] }
0x153d   :  { %10017 = vmatpush3.msra.mxu0 %v10698_v41  ;;  %10024 = vmatprep.mubr.msk.f32.mxu0 %vm117_vm0, %v11593_v33 }
0x153e   :  { %10018 = vmatprep.subr.mxu0 %v10698_v41 }
0x153f   :  { %10019 = vmatpush3.msra.mxu0 %v10698_v41 }
0x1540   :  { %10020 = vmatprep.subr.mxu0 %v10698_v41 }
0x1541   :  { %10021 = vmatpush3.msra.mxu0 %v10698_v41 }
0x1542   :  { %10022 = vmatprep.subr.mxu0 %v10698_v41 }
0x1543   :  { %10023 = vmatpush3.msra.mxu0 %v10698_v41 }
0x1544   :  { %10025 = vmatmul.mubr.msk.f32.vlgmr.msra.gmra.mxu0 %vm117_vm0, %v11606_v8  ;;  %10044 = vmatprep.subr.mxu0 %v4146_v58 }
0x1545   :  { %10045 = vmatpush3.msra.mxu0 %v4146_v58 }
0x1546   :  { %10046 = vmatprep.subr.mxu0 %v4145_v39 }
0x1547   :  { %10047 = vmatpush3.msra.mxu0 %v4145_v39  ;;  %v11707_v39 = vld [vmem:[%s12480_s11] ss:$0 sm:$0xff] }
0x1548   :  { %10048 = vmatprep.subr.mxu0 %v4144_v53 }
0x1549   :  { %10049 = vmatpush3.msra.mxu0 %v4144_v53 }
0x154a   :  { %10050 = vmatprep.subr.mxu0 %v4143_v42 }
0x154b   :  { %10051 = vmatpush3.msra.mxu0 %v4143_v42 }
0x154c   :  { %10080 = vmatprep.subr.mxu0 %v10698_v41 }
0x15fc   :  { %v10010_v29 = vpop.f32.mrf.mxu0 }
0x15fe   :  { %v3792_v3 = vpop.f32.mrf.mxu0 }
0x15ff   :  { %10013 = vmatprep.mubr.msk.f32.mxu1 %vm1024_vm1, %v3792_v3  ;;  %v4288_v3 = vld [vmem:[%s12481_s12 + $0x8] sm:$0xff] }
0x1600   :  { %10014 = vmatmul.mubr.msk.f32.vlgmr.msra.gmra.mxu1 %vm1024_vm1, %v10010_v29  ;;  %v4289_v29 = vld [vmem:[%s12481_s12 + $0x10] sm:$0xff] }
0x1601   :  { %10031 = vmatpush3.msra.mxu1 %v10698_v41 }
0x1602   :  { %10032 = vmatprep.subr.mxu1 %v10698_v41 }
0x1603   :  { %10033 = vmatpush3.msra.mxu1 %v10698_v41 }
0x1604   :  { %v10026_v13 = vpop.f32.mrf.mxu0  ;;  %10034 = vmatprep.subr.mxu1 %v10698_v41 }
0x1605   :  { %v3999_v61 = vmul.f32 0.03125, %v10026_v13  ;;  %10035 = vmatpush3.msra.mxu1 %v10698_v41  ;;  %v4287_v13 = vld [vmem:[%s12481_s12] sm:$0xff] }
0x1606   :  { %v3979_v24 = vpop.f32.mrf.mxu0  ;;  %10036 = vmatprep.subr.mxu1 %v10698_v41 }
0x1607   :  { %v3998_v37 = vmul.f32 0.03125, %v3979_v24  ;;  %10037 = vmatpush3.msra.mxu1 %v10698_v41  ;;  %v4003_v62 = vsub.f32 %v11606_v8, %v3999_v61 }
0x1608   :  { %10058 = vmatprep.subr.mxu1 %v4294_v31 }
0x1609   :  { %v4002_v51 = vsub.f32 %v11593_v33, %v3998_v37  ;;  %v4007_v57 = vmul.f32 %v4003_v62, %v4003_v62 }
0x160b   :  { %v4006_v54 = vmul.f32 %v4002_v51, %v4002_v51 }
0x160d   :  { %10038 = vmatprep.mubr.msk.f32.mxu1 %vm117_vm0, %v4006_v54 }
0x160e   :  { %10039 = vmatmul.mubr.msk.f32.vlgmr.msra.gmra.mxu1 %vm117_vm0, %v4007_v57 }
0x160f   :  { %10059 = vmatpush3.msra.mxu1 %v4294_v31 }
0x1610   :  { %10060 = vmatprep.subr.mxu1 %v4293_v32 }
0x1611   :  { %10061 = vmatpush3.msra.mxu1 %v4293_v32 }
0x16c0   :  { %v10015_v7 = vpop.f32.mrf.mxu1 }
0x16c1   :  { %v3883_v45 = vadd.f32 %v10015_v7, %v11582_v46  ;;  %v11655_v46 = vld [vmem:[%s12477_s8] ss:$0 sm:$0xff] }
0x16c2   :  { %v3873_v11 = vpop.f32.mrf.mxu1 }
0x16c3   :  { %v3882_v22 = vadd.f32 %v3873_v11, %v3522_v0  ;;  %v3887_v4 = vadd.f32 %v3883_v45, %v11023_v18 }
0x16c5   :  { %v3886_v14 = vadd.f32 %v3882_v22, %v11020_v17  ;;  %v11646_v5 = vadd.f32 %v9107_v40, %v3887_v4 }
0x16c7   :  { %v11644_v6 = vadd.f32 %v9107_v40, %v3886_v14  ;;  %v4292_v40 = vld [vmem:[%s12481_s12 + $0x28] sm:$0xff] }
0x16c8   :  { %10062 = vmatprep.subr.mxu1 %v4292_v40 }
0x16c9   :  { %10027 = vmatprep.mubr.msk.f32.mxu0 %vm117_vm0, %v11644_v6  ;;  %10063 = vmatpush3.msra.mxu1 %v4292_v40 }
0x16ca   :  { %10028 = vmatmul.mubr.msk.f32.gmra.mxu0 %vm117_vm0, %v11646_v5  ;;  %10064 = vmatprep.subr.mxu1 %v4291_v35 }
0x16cb   :  { %10065 = vmatpush3.msra.mxu1 %v4291_v35 }
0x16cc   :  { %10066 = vmatprep.subr.mxu1 %v4290_v10 }
0x16cd   :  { %10067 = vmatpush3.msra.mxu1 %v4290_v10 }
0x16ce   :  { %v10040_v48 = vpop.f32.mrf.mxu1  ;;  %10068 = vmatprep.subr.mxu1 %v4289_v29 }
0x16cf   :  { %v4108_v23 = vmul.f32 0.03125, %v10040_v48  ;;  %10069 = vmatpush3.msra.mxu1 %v4289_v29 }
0x16d0   :  { %v4088_v25 = vpop.f32.mrf.mxu1  ;;  %10070 = vmatprep.subr.mxu1 %v4288_v3 }
0x16d1   :  { %v4112_v38 = vadd.f32 1e-05, %v4108_v23  ;;  %v4107_v9 = vmul.f32 0.03125, %v4088_v25  ;;  %10071 = vmatpush3.msra.mxu1 %v4288_v3 }
0x16d2   :  { %10072 = vmatprep.subr.mxu1 %v4287_v13 }
0x16d3   :  { %10546 = vrsqrt.f32 %v4112_v38  ;;  %v4111_v34 = vadd.f32 1e-05, %v4107_v9  ;;  %10073 = vmatpush3.msra.mxu1 %v4287_v13 }
0x16d5   :  { %10548 = vrsqrt.f32 %v4111_v34 }
0x16e0   :  { %v10547_v18 = vpop.eup %10546 }
0x16e1   :  { %v4120_v17 = vmul.f32 %v10547_v18, %v4003_v62 }
0x16e2   :  { %v10549_v12 = vpop.eup %10548 }
0x16e3   :  { %v4119_v19 = vmul.f32 %v10549_v12, %v4002_v51  ;;  %v4130_v16 = vmul.f32 %v11655_v46, %v4120_v17 }
0x16e5   :  { %v4129_v55 = vmul.f32 %v11655_v46, %v4119_v19  ;;  %v4140_v30 = vadd.f32 %v11661_v15, %v4130_v16 }
0x16e7   :  { %v4139_v27 = vadd.f32 %v11661_v15, %v4129_v55 }
0x16e9   :  { %10052 = vmatprep.mubr.msk.f32.mxu0 %vm117_vm0, %v4139_v27 }
0x16ea   :  { %10053 = vmatmul.mubr.msk.f32.vlgmr.msra.gmra.mxu0 %vm117_vm0, %v4140_v30 }
0x16eb   :  { %10081 = vmatpush3.msra.mxu0 %v10698_v41 }
0x16ec   :  { %10082 = vmatprep.subr.mxu0 %v10698_v41 }
0x16ed   :  { %10083 = vmatpush3.msra.mxu0 %v10698_v41 }
0x16ee   :  { %10084 = vmatprep.subr.mxu0 %v10698_v41 }
0x16ef   :  { %10085 = vmatpush3.msra.mxu0 %v10698_v41 }
0x16f0   :  { %10086 = vmatprep.subr.mxu0 %v10698_v41 }
0x16f1   :  { %10087 = vmatpush3.msra.mxu0 %v10698_v41 }
0x16f2   :  { %10094 = vmatprep.subr.mxu0 %v10698_v41 }
0x178a   :  { %v10029_v61 = vpop.f32.mrf.mxu0 }
0x178b   :  { %v4001_v24 = vmul.f32 0.03125, %v10029_v61 }
0x178c   :  { %v3989_v37 = vpop.f32.mrf.mxu0 }
0x178d   :  { %v4000_v62 = vmul.f32 0.03125, %v3989_v37  ;;  %v4005_v51 = vsub.f32 %v11646_v5, %v4001_v24 }
0x178f   :  { %v4004_v54 = vsub.f32 %v11644_v6, %v4000_v62  ;;  %v4009_v58 = vmul.f32 %v4005_v51, %v4005_v51 }
0x1791   :  { %v4008_v57 = vmul.f32 %v4004_v54, %v4004_v54 }
0x1793   :  { %10041 = vmatprep.mubr.msk.f32.mxu1 %vm117_vm0, %v4008_v57 }
0x1794   :  { %10042 = vmatmul.mubr.msk.f32.gmra.mxu1 %vm117_vm0, %v4009_v58 }
0x17aa   :  { %v10054_v53 = vpop.f32.mrf.mxu0 }
0x17ab   :  { %v4238_v42 = vadd.f32 %v10054_v53, %v11707_v39 }
0x17ac   :  { %v4232_v2 = vpop.f32.mrf.mxu0 }
0x17ad   :  { %v4252_v7 = vmul.f32 %v4238_v42, %v4238_v42  ;;  %v4233_v0 = vadd.f32 %v11707_v39, %v4232_v2 }
0x17af   :  { %v4256_v45 = vmul.f32 %v4252_v7, %v4238_v42  ;;  %v4251_v11 = vmul.f32 %v4233_v0, %v4233_v0 }
0x17b1   :  { %v4260_v22 = vmul.f32 0.044715, %v4256_v45  ;;  %v4255_v4 = vmul.f32 %v4251_v11, %v4233_v0 }
0x17b3   :  { %v4264_v14 = vadd.f32 %v4260_v22, %v4238_v42  ;;  %v4259_v48 = vmul.f32 0.044715, %v4255_v4 }
0x17b5   :  { %v4268_v23 = vmul.f32 0.7978846, %v4264_v14  ;;  %v4263_v25 = vadd.f32 %v4259_v48, %v4233_v0 }
0x17b7   :  { %10550 = vtanh.f32 %v4268_v23  ;;  %v4267_v38 = vmul.f32 0.7978846, %v4263_v25 }
0x17b9   :  { %10552 = vtanh.f32 %v4267_v38 }
0x17c4   :  { %v10551_v9 = vpop.eup %10550 }
0x17c5   :  { %v4276_v34 = vadd.f32 1.0, %v10551_v9 }
0x17c6   :  { %v10553_v18 = vpop.eup %10552 }
0x17c7   :  { %v4275_v17 = vadd.f32 1.0, %v10553_v18  ;;  %v4280_v12 = vmul.f32 0.5, %v4276_v34 }
0x17c9   :  { %v4279_v19 = vmul.f32 0.5, %v4275_v17  ;;  %v4284_v55 = vmul.f32 %v4280_v12, %v4238_v42 }
0x17cb   :  { %v4283_v16 = vmul.f32 %v4279_v19, %v4233_v0 }
0x17cd   :  { %10074 = vmatprep.mubr.msk.f32.mxu1 %vm4295_vm3, %v4283_v16 }
0x17ce   :  { %10075 = vmatmul.mubr.msk.f32.vlgmr.msra.gmra.mxu1 %vm4295_vm3, %v4284_v55 }
0x1854   :  { %v10043_v27 = vpop.f32.mrf.mxu1 }
0x1855   :  { %v4110_v30 = vmul.f32 0.03125, %v10043_v27 }
0x1856   :  { %v4098_v31 = vpop.f32.mrf.mxu1 }
0x1857   :  { %v4114_v32 = vadd.f32 1e-05, %v4110_v30  ;;  %v4109_v40 = vmul.f32 0.03125, %v4098_v31 }
0x1859   :  { %10554 = vrsqrt.f32 %v4114_v32  ;;  %v4113_v35 = vadd.f32 1e-05, %v4109_v40 }
0x185b   :  { %10556 = vrsqrt.f32 %v4113_v35 }
0x1866   :  { %v10555_v10 = vpop.eup %10554 }
0x1867   :  { %v4122_v29 = vmul.f32 %v10555_v10, %v4005_v51  ;;  %v9127_v51 = vld [vmem:[%s12482_s13] ss:$0 sm:$0xff] }
0x1868   :  { %v10557_v3 = vpop.eup %10556 }
0x1869   :  { %v4121_v13 = vmul.f32 %v10557_v3, %v4004_v54  ;;  %v4132_v61 = vmul.f32 %v11655_v46, %v4122_v29 }
0x186b   :  { %v4131_v24 = vmul.f32 %v11655_v46, %v4121_v13  ;;  %v4142_v62 = vadd.f32 %v11661_v15, %v4132_v61 }
0x186d   :  { %v4141_v37 = vadd.f32 %v11661_v15, %v4131_v24  ;;  %v9146_v24 = vld [vmem:[%s12533_s7 + $0x70] sm:$0xff] }
0x186f   :  { %10055 = vmatprep.mubr.msk.f32.mxu0 %vm117_vm0, %v4141_v37  ;;  %v9145_v37 = vld [vmem:[%s12533_s7 + $0x68] sm:$0xff] }
0x1870   :  { %10056 = vmatmul.mubr.msk.f32.gmra.mxu0 %vm117_vm0, %v4142_v62  ;;  %v9144_v62 = vld [vmem:[%s12533_s7 + $0x60] sm:$0xff] }
0x188e   :  { %v10076_v57 = vpop.f32.mrf.mxu1 }
0x188f   :  { %v4394_v58 = vadd.f32 %v10076_v57, %v11606_v8  ;;  %v9143_v57 = vld [vmem:[%s12533_s7 + $0x58] sm:$0xff] }
0x1890   :  { %v4374_v53 = vpop.f32.mrf.mxu1 }
0x1891   :  { %v4393_v54 = vadd.f32 %v4374_v53, %v11593_v33  ;;  %v11726_v46 = vadd.f32 %v9127_v51, %v4394_v58  ;;  %v9142_v58 = vld [vmem:[%s12533_s7 + $0x50] sm:$0xff]  ;;  %v9141_v53 = vld [vmem:[%s12533_s7 + $0x48] sm:$0xff] }
0x1893   :  { %v11724_v42 = vadd.f32 %v9127_v51, %v4393_v54 }
0x1895   :  { %10088 = vmatprep.mubr.msk.f32.mxu0 %vm117_vm0, %v11724_v42 }
0x1896   :  { %10089 = vmatmul.mubr.msk.f32.vlgmr.msra.gmra.mxu0 %vm117_vm0, %v11726_v46 }
0x1897   :  { %10095 = vmatpush3.msra.mxu0 %v10698_v41 }
0x1898   :  { %10096 = vmatprep.subr.mxu0 %v10698_v41 }
0x1899   :  { %10097 = vmatpush3.msra.mxu0 %v10698_v41 }
0x189a   :  { %10098 = vmatprep.subr.mxu0 %v10698_v41 }
0x189b   :  { %10099 = vmatpush3.msra.mxu0 %v10698_v41 }
0x189c   :  { %10100 = vmatprep.subr.mxu0 %v10698_v41 }
0x189d   :  { %10101 = vmatpush3.msra.mxu0 %v10698_v41 }
0x1930   :  { %v10057_v33 = vpop.f32.mrf.mxu0 }
0x1931   :  { %v4248_v8 = vadd.f32 %v10057_v33, %v11707_v39 }
0x1932   :  { %v4242_v15 = vpop.f32.mrf.mxu0 }
0x1933   :  { %v4254_v2 = vmul.f32 %v4248_v8, %v4248_v8  ;;  %v4243_v7 = vadd.f32 %v11707_v39, %v4242_v15 }
0x1935   :  { %v4258_v0 = vmul.f32 %v4254_v2, %v4248_v8  ;;  %v4253_v45 = vmul.f32 %v4243_v7, %v4243_v7 }
0x1937   :  { %v4262_v11 = vmul.f32 0.044715, %v4258_v0  ;;  %v4257_v22 = vmul.f32 %v4253_v45, %v4243_v7 }
0x1939   :  { %v4266_v4 = vadd.f32 %v4262_v11, %v4248_v8  ;;  %v4261_v14 = vmul.f32 0.044715, %v4257_v22 }
0x193b   :  { %v4270_v48 = vmul.f32 0.7978846, %v4266_v4  ;;  %v4265_v23 = vadd.f32 %v4261_v14, %v4243_v7 }
0x193d   :  { %10558 = vtanh.f32 %v4270_v48  ;;  %v4269_v25 = vmul.f32 0.7978846, %v4265_v23 }
0x193f   :  { %10560 = vtanh.f32 %v4269_v25 }
0x194a   :  { %v10559_v38 = vpop.eup %10558 }
0x194b   :  { %v4278_v9 = vadd.f32 1.0, %v10559_v38 }
0x194c   :  { %v10561_v34 = vpop.eup %10560 }
0x194d   :  { %v4277_v18 = vadd.f32 1.0, %v10561_v34  ;;  %v4282_v17 = vmul.f32 0.5, %v4278_v9 }
0x194f   :  { %v4281_v12 = vmul.f32 0.5, %v4277_v18  ;;  %v4286_v16 = vmul.f32 %v4282_v17, %v4248_v8  ;;  %v9138_v18 = vld [vmem:[%s12534_s2 + $0x1] ss:$0 sm:$0xff] }
0x1951   :  { %v4285_v19 = vmul.f32 %v4281_v12, %v4243_v7  ;;  %v9139_v12 = vld [vmem:[%s12535_s28 + $0x1] ss:$0 sm:$0xff]  ;;  %s12549_s28 = sld [smem:[#allocation16_spill]] }
0x1953   :  { %10077 = vmatprep.mubr.msk.f32.mxu1 %vm4295_vm3, %v4285_v19 }
0x1954   :  { %10078 = vmatmul.mubr.msk.f32.gmra.mxu1 %vm4295_vm3, %v4286_v16 }
0x1955   :  { %4752 = vmatprep.mubr.f32.mxu1 %v10699_v44 }
0x1956   :  { %v10090_v39 = vpop.f32.mrf.mxu0 }
0x1957   :  { %v4510_v31 = vmul.f32 0.03125, %v10090_v39 }
0x1958   :  { %v4490_v55 = vpop.f32.mrf.mxu0 }
0x1959   :  { %v4509_v27 = vmul.f32 0.03125, %v4490_v55  ;;  %v4514_v3 = vsub.f32 %v11726_v46, %v4510_v31 }
0x195b   :  { %v4513_v35 = vsub.f32 %v11724_v42, %v4509_v27 }
0x195d   :  { %v4517_v61 = vmul.f32 %v4513_v35, %v4513_v35 }
0x1a14   :  { %v10079_v30 = vpop.f32.mrf.mxu1 }
0x1a15   :  { %v4396_v32 = vadd.f32 %v10079_v30, %v11646_v5  ;;  %v4518_v5 = vmul.f32 %v4514_v3, %v4514_v3 }
0x1a16   :  { %v4384_v40 = vpop.f32.mrf.mxu1 }
0x1a17   :  { %v4395_v10 = vadd.f32 %v4384_v40, %v11644_v6  ;;  %v11750_v13 = vadd.f32 %v9127_v51, %v4396_v32  ;;  %v9147_v6 = vld [vmem:[%s12533_s7 + $0x78] sm:$0xff] }
0x1a18   :  { %4712 = vmatprep.subr.mxu1 %v9147_v6 }
0x1a19   :  { %v11747_v29 = vadd.f32 %v9127_v51, %v4395_v10  ;;  %4713 = vmatpush1.msra.mxu1 %v9146_v24  ;;  %v9140_v51 = vld [vmem:[%s12533_s7 + $0x40] sm:$0xff]  ;;  %s12548_s7 = sld [smem:[#allocation15_spill]] }
0x1a1a   :  { %4714 = vmatprep.subr.mxu1 %v9145_v37 }
0x1a1b   :  { %10091 = vmatprep.mubr.msk.f32.mxu0 %vm117_vm0, %v11747_v29  ;;  %4715 = vmatpush1.msra.mxu1 %v9144_v62 }
0x1a1c   :  { %10092 = vmatmul.mubr.msk.f32.gmra.mxu0 %vm117_vm0, %v11750_v13  ;;  %4716 = vmatprep.subr.mxu1 %v9143_v57 }
0x1a1d   :  { %10102 = vmatprep.mubr.msk.f32.mxu0 %vm117_vm0, %v4517_v61  ;;  %4717 = vmatpush1.msra.mxu1 %v9142_v58 }
0x1a1e   :  { %4718 = vmatprep.subr.mxu1 %v9141_v53 }
0x1a1f   :  { %4719 = vmatpush1.msra.mxu1 %v9140_v51 }
0x1a20   :  { %10103 = vmatmul.mubr.msk.f32.vlgmr.msra.gmra.mxu0 %vm117_vm0, %v4518_v5 }
0x1adc   :  { %v10093_v54 = vpop.f32.mrf.mxu0 }
0x1add   :  { %v4512_v33 = vmul.f32 0.03125, %v10093_v54 }
0x1ade   :  { %v4500_v8 = vpop.f32.mrf.mxu0 }
0x1adf   :  { %v4511_v15 = vmul.f32 0.03125, %v4500_v8  ;;  %v4516_v2 = vsub.f32 %v11750_v13, %v4512_v33 }
0x1ae0   :  { %v10104_v7 = vpop.f32.mrf.mxu0 }
0x1ae1   :  { %v4515_v0 = vsub.f32 %v11747_v29, %v4511_v15  ;;  %v4619_v45 = vmul.f32 0.03125, %v10104_v7  ;;  %v4520_v48 = vmul.f32 %v4516_v2, %v4516_v2 }
0x1ae2   :  { %v4599_v11 = vpop.f32.mrf.mxu0 }
0x1ae3   :  { %v4519_v22 = vmul.f32 %v4515_v0, %v4515_v0  ;;  %v4623_v4 = vadd.f32 1e-05, %v4619_v45  ;;  %v4618_v14 = vmul.f32 0.03125, %v4599_v11 }
0x1ae5   :  { %10562 = vrsqrt.f32 %v4623_v4  ;;  %v4622_v23 = vadd.f32 1e-05, %v4618_v14  ;;  %10105 = vmatprep.mubr.msk.f32.mxu0 %vm117_vm0, %v4519_v22 }
0x1ae6   :  { %10106 = vmatmul.mubr.msk.f32.gmra.mxu0 %vm117_vm0, %v4520_v48 }
0x1ae7   :  { %10564 = vrsqrt.f32 %v4622_v23 }
0x1af2   :  { %v10563_v25 = vpop.eup %10562 }
0x1af3   :  { %v4631_v34 = vmul.f32 %v10563_v25, %v4514_v3 }
0x1af4   :  { %v10565_v38 = vpop.eup %10564 }
0x1af5   :  { %v4630_v9 = vmul.f32 %v10565_v38, %v4513_v35  ;;  %v4641_v16 = vmul.f32 %v9138_v18, %v4631_v34  ;;  %v9148_v35 = vld [vmem:[%s12536_s0 + $0x2] sm:$0x3]  ;;  %s12545_s0 = smov 96  }
0x1af6   :  { %v11801_v3 = vrot.slane %v9148_v35, %v805_v21  ;;  %v11855_v34 = vrot.slane %v9148_v35, %v809_v28 }
0x1af7   :  { %v4640_v17 = vmul.f32 %v9138_v18, %v4630_v9  ;;  %v4651_v39 = vadd.f32 %v9139_v12, %v4641_v16 }
0x1af9   :  { %v4650_v19 = vadd.f32 %v9139_v12, %v4640_v17 }
0x1afb   :  { %9149 = vmatmul.mubr.msk.f32.vlgmr.msra.gmra.mxu1 %vm117_vm0, %v4650_v19  ;;  %v11875_v19 = vld [vmem:[%s12487_s18 + $0x8] sm:$0xff] }
0x1afc   :  { %4758 = vmatprep.mubr.f32.mxu1 %v10699_v44 }
0x1aff   :  { %9150 = vmatmul.mubr.msk.f32.gmra.mxu1 %vm117_vm0, %v4651_v39 }
0x1b00   :  { %4764 = vmatprep.mubr.f32.mxu1 %v10699_v44 }
0x1ba6   :  { %v10107_v55 = vpop.f32.mrf.mxu0 }
0x1ba7   :  { %v4621_v27 = vmul.f32 0.03125, %v10107_v55  ;;  %v11881_v55 = vld [vmem:[%s12487_s18] sm:$0xff]  ;;  %s12547_s18 = sld [smem:[#allocation14_spill]] }
0x1ba8   :  { %v4609_v30 = vpop.f32.mrf.mxu0 }
0x1ba9   :  { %v4625_v31 = vadd.f32 1e-05, %v4621_v27  ;;  %v4620_v32 = vmul.f32 0.03125, %v4609_v30 }
0x1bab   :  { %10566 = vrsqrt.f32 %v4625_v31  ;;  %v4624_v40 = vadd.f32 1e-05, %v4620_v32 }
0x1bad   :  { %10568 = vrsqrt.f32 %v4624_v40 }
0x1bb8   :  { %v10567_v10 = vpop.eup %10566 }
0x1bb9   :  { %v4633_v24 = vmul.f32 %v10567_v10, %v4516_v2 }
0x1bba   :  { %v10569_v61 = vpop.eup %10568 }
0x1bbb   :  { %v4754_v5 = vpop.f32.mrf.mxu1  ;;  %v4632_v6 = vmul.f32 %v10569_v61, %v4515_v0  ;;  %v4643_v54 = vmul.f32 %v9138_v18, %v4633_v24 }
0x1bbc   :  { %v4755_v37 = vadd.f32 %v4754_v5, %v11801_v3 }
0x1bbd   :  { %v11804_v62 = vpop.f32.mrf.mxu1  ;;  %v4642_v57 = vmul.f32 %v9138_v18, %v4632_v6  ;;  %v4653_v8 = vadd.f32 %v9139_v12, %v4643_v54 }
0x1bbe   :  { %v4809_v58 = vmul.f32 %v4755_v37, %v11143_v36  ;;  %v4805_v36 = vmul.f32 %v4755_v37, %v11154_v43  ;;  %v4781_v43 = vmul.f32 %v4755_v37, %v11161_v52  ;;  %v10671_v52 = vld [vmem:[%s12485_s16] sm:$0xff]  ;;  %v11908_v54 = vadd.f32 %v11804_v62, %v11855_v34 }
0x1bbf   :  { %v4760_v53 = vpop.f32.mrf.mxu1  ;;  %v4652_v51 = vadd.f32 %v9139_v12, %v4642_v57  ;;  %v4777_v48 = vmul.f32 %v10671_v52, %v4755_v37 }
0x1bc0   :  { %v4761_v33 = vadd.f32 %v4760_v53, %v11801_v3  ;;  %4817 = vrot.lane.b32.xlu1 %v4809_v58, %s12545_s0 }
0x1bc1   :  { %9151 = vmatmul.mubr.msk.f32.gmra.mxu1 %vm117_vm0, %v4652_v51  ;;  %v4762_v38 = vpop.f32.mrf.mxu1 }
0x1bc2   :  { %v4810_v21 = vmul.f32 %v4761_v33, %v11132_v26  ;;  %4770 = vmatprep.mubr.f32.mxu1 %v10699_v44  ;;  %v4806_v7 = vmul.f32 %v4761_v33, %v11156_v47  ;;  %v4782_v26 = vmul.f32 %v4761_v33, %v11172_v56  ;;  %v10670_v56 = vld [vmem:[%s12485_s16 + $0x8] sm:$0xff]  ;;  %v11863_v17 = vadd.f32 %v4762_v38, %v11855_v34 }
0x1bc3   :  { %v4778_v11 = vmul.f32 %v10670_v56, %v4761_v33 }
0x1bc4   :  { %4819 = vrot.lane.b32.xlu0 %v4810_v21, %s12545_s0 }
0x1bc5   :  { %9152 = vmatmul.mubr.msk.f32.gmra.mxu1 %vm117_vm0, %v4653_v8 }
0x1c32   :  { %v4818_v15 = vpop.permute.xlu1 %4817 }
0x1c33   :  { %v11815_v2 = vadd.f32 %v4818_v15, %v4805_v36 }
0x1c35   :  { %4840 = vrot.lane.b32.xlu1 %v11815_v2, %s12546_s29 }
0x1c36   :  { %v4820_v0 = vpop.permute.xlu0 %4819 }
0x1c37   :  { %v11820_v45 = vadd.f32 %v4820_v0, %v4806_v7 }
0x1c39   :  { %4842 = vrot.lane.b32.xlu0 %v11820_v45, %s12546_s29  ;;  %4791 = vrot.lane.b32.xlu1 %v4782_v26, %s12545_s0 }
0x1c3d   :  { %5113 = vrot.lane.b32.xlu1 %v11815_v2, %s12539_s5  ;;  %4789 = vrot.lane.b32.xlu0 %v4781_v43, %s12545_s0 }
0x1c41   :  { %5115 = vrot.lane.b32.xlu0 %v11820_v45, %s12539_s5 }
0x1c81   :  { %v11894_v32 = vpop.f32.mrf.mxu1 }
0x1c83   :  { %v11896_v40 = vpop.f32.mrf.mxu1 }
0x1c85   :  { %v11898_v35 = vpop.f32.mrf.mxu1 }
0x1c87   :  { %v11900_v10 = vpop.f32.mrf.mxu1 }
0x1ca7   :  { %v4841_v47 = vpop.permute.xlu1 %4840 }
0x1cab   :  { %v4843_v22 = vpop.permute.xlu0 %4842  ;;  %v4792_v4 = vpop.permute.xlu1 %4791 }
0x1cac   :  { %v11835_v14 = vadd.f32 %v4792_v4, %v4778_v11  ;;  %10108 = vmatprep.subr.msk.mxu0 %vm1024_vm1, %v4843_v22 }
0x1cad   :  { %10109 = vmatpush3.xpose.msk.msra.mxu0 %vm1024_vm1, %v4843_v22 }
0x1cae   :  { %10110 = vmatprep.subr.msk.mxu0 %vm1024_vm1, %v4841_v47  ;;  %5111 = vrot.lane.b32.xlu1 %v11835_v14, %s12540_s26 }
0x1caf   :  { %v4790_v23 = vpop.permute.xlu0 %4789  ;;  %v5114_v18 = vpop.permute.xlu1 %5113 }
0x1cb0   :  { %v11845_v25 = vadd.f32 %v4790_v23, %v4777_v48 }
0x1cb1   :  { %10111 = vmatpush3.xpose.msk.msra.mxu0 %vm1024_vm1, %v4841_v47 }
0x1cb2   :  { %5109 = vrot.lane.b32.xlu0 %v11845_v25, %s12540_s26  ;;  %10112 = vmatprep.mubr.msk.f32.mxu0 %vm1024_vm1, %v11845_v25 }
0x1cb3   :  { %v5116_v9 = vpop.permute.xlu0 %5115  ;;  %10115 = vmatprep.subr.mxu0 %v10698_v41 }
0x1cb4   :  { %10113 = vmatmul.mubr.msk.f32.vlgmr.msra.gmra.mxu0 %vm1024_vm1, %v11835_v14  ;;  %10129 = vmatprep.subr.msk.mxu1 %vm1024_vm1, %v5116_v9 }
0x1cb5   :  { %10116 = vmatpush3.msra.mxu0 %v10698_v41  ;;  %10130 = vmatpush3.xpose.msk.msra.mxu1 %vm1024_vm1, %v5116_v9 }
0x1cb6   :  { %10117 = vmatprep.subr.mxu0 %v10698_v41  ;;  %10131 = vmatprep.subr.msk.mxu1 %vm1024_vm1, %v5114_v18 }
0x1cb7   :  { %10118 = vmatpush3.msra.mxu0 %v10698_v41 }
0x1cb8   :  { %10122 = vmatprep.subr.mxu0 %v11863_v17 }
0x1cb9   :  { %10132 = vmatpush3.xpose.msk.msra.mxu1 %vm1024_vm1, %v5114_v18  ;;  %v11927_v18 = vld [vmem:[%s12537_s1 + $0x28] sm:$0xff] }
0x1d20   :  { %v5112_v28 = vpop.permute.xlu1 %5111 }
0x1d24   :  { %v5110_v20 = vpop.permute.xlu0 %5109 }
0x1d25   :  { %10133 = vmatprep.mubr.msk.f32.mxu1 %vm1024_vm1, %v5110_v20 }
0x1d26   :  { %10134 = vmatmul.mubr.msk.f32.vlgmr.msra.gmra.mxu1 %vm1024_vm1, %v5112_v28 }
0x1d74   :  { %v10114_v12 = vpop.f32.mrf.mxu0 }
0x1d75   :  { %v4930_v16 = vmul.f32 %v11875_v19, %v10114_v12  ;;  %v11938_v12 = vld [vmem:[%s12537_s1 + $0x20] sm:$0xff] }
0x1d76   :  { %v4920_v39 = vpop.f32.mrf.mxu0 }
0x1d77   :  { %v4929_v27 = vmul.f32 %v11881_v55, %v4920_v39  ;;  %v4934_v30 = vsel %vm1112_vm2, %v4930_v16, -inf }
0x1d78   :  { %4935 = vmax.xlane.f32.xlu1 %v4934_v30 }
0x1d79   :  { %v4931_v31 = vsel %vm1112_vm2, %v4929_v27, -inf }
0x1d7a   :  { %4932 = vmax.xlane.f32.xlu0 %v4931_v31 }
0x1d89   :  { %5303 = vrot.lane.b32.xlu1 %v11863_v17, %s12540_s26 }
0x1d8d   :  { %5556 = vrot.lane.b32.xlu1 %v11820_v45, %s12541_s4 }
0x1d91   :  { %5554 = vrot.lane.b32.xlu1 %v11815_v2, %s12541_s4 }
0x1d95   :  { %5552 = vrot.lane.b32.xlu1 %v11835_v14, %s12542_s24 }
0x1de6   :  { %v10135_v61 = vpop.f32.mrf.mxu1 }
0x1de7   :  { %v5201_v24 = vmul.f32 %v11875_v19, %v10135_v61 }
0x1de8   :  { %v5191_v5 = vpop.f32.mrf.mxu1 }
0x1de9   :  { %v5200_v6 = vmul.f32 %v11881_v55, %v5191_v5  ;;  %v5205_v57 = vsel %vm1112_vm2, %v5201_v24, -inf }
0x1deb   :  { %v5202_v37 = vsel %vm1112_vm2, %v5200_v6, -inf }
0x1dec   :  { %5203 = vmax.xlane.f32.xlu0 %v5202_v37 }
0x1df0   :  { %5206 = vmax.xlane.f32.xlu0 %v5205_v57 }
0x1e01   :  { %v4936_v58 = vpop.xlane.xlu1 %4935 }
0x1e02   :  { %v4938_v53 = vsub.f32 %v4930_v16, %v4936_v58 }
0x1e03   :  { %v4933_v51 = vpop.xlane.xlu0 %4932 }
0x1e04   :  { %v4937_v33 = vsub.f32 %v4929_v27, %v4933_v51  ;;  %v4941_v21 = vmul.f32 1.442695, %v4938_v53 }
0x1e05   :  { %v5304_v8 = vpop.permute.xlu1 %5303 }
0x1e06   :  { %v4939_v36 = vmul.f32 1.442695, %v4937_v33  ;;  %10143 = vmatprep.subr.mxu1 %v5304_v8  ;;  %5301 = vrot.lane.b32.xlu0 %v11908_v54, %s12540_s26 }
0x1e07   :  { %10144 = vmatpush3.msra.mxu1 %v5304_v8 }
0x1e08   :  { %10570 = vpow2.f32 %v4939_v36 }
0x1e09   :  { %10572 = vpow2.f32 %v4941_v21  ;;  %v5557_v28 = vpop.permute.xlu1 %5556 }
0x1e0a   :  { %5550 = vrot.lane.b32.xlu0 %v11845_v25, %s12542_s24 }
0x1e0d   :  { %v5555_v58 = vpop.permute.xlu1 %5554 }
0x1e11   :  { %v5553_v53 = vpop.permute.xlu1 %5552 }
0x1e15   :  { %v10571_v15 = vpop.eup %10570 }
0x1e16   :  { %v10573_v7 = vpop.eup %10572  ;;  %10119 = vmatprep.mubr.msk.f32.mxu0 %vm1112_vm2, %v10571_v15 }
0x1e17   :  { %10120 = vmatmul.mubr.msk.f32.vlgmr.msra.gmra.mxu0 %vm1112_vm2, %v10573_v7 }
0x1e18   :  { %10123 = vmatpush3.msra.mxu0 %v11863_v17 }
0x1e19   :  { %10124 = vmatprep.subr.mxu0 %v11908_v54 }
0x1e1a   :  { %10125 = vmatpush3.msra.mxu0 %v11908_v54 }
0x1e1b   :  { %10136 = vmatprep.subr.mxu0 %v10698_v41 }
0x1e75   :  { %v5204_v62 = vpop.xlane.xlu0 %5203 }
0x1e76   :  { %v5208_v43 = vsub.f32 %v5200_v6, %v5204_v62 }
0x1e78   :  { %v5210_v22 = vmul.f32 1.442695, %v5208_v43 }
0x1e79   :  { %v5207_v0 = vpop.xlane.xlu0 %5206 }
0x1e7a   :  { %v5209_v56 = vsub.f32 %v5201_v24, %v5207_v0 }
0x1e7c   :  { %v5212_v4 = vmul.f32 1.442695, %v5209_v56 }
0x1e7d   :  { %v5302_v26 = vpop.permute.xlu0 %5301 }
0x1e7e   :  { %10145 = vmatprep.subr.mxu1 %v5302_v26 }
0x1e7f   :  { %10146 = vmatpush3.msra.mxu1 %v5302_v26 }
0x1e80   :  { %10155 = vmatprep.subr.mxu1 %v11938_v12 }
0x1e81   :  { %v5551_v57 = vpop.permute.xlu0 %5550 }
0x1ed7   :  { %v10121_v47 = vpop.f32.mrf.mxu0 }
0x1ed8   :  { %10574 = vrcp.f32 %v10121_v47 }
0x1ed9   :  { %v5015_v11 = vpop.f32.mrf.mxu0 }
0x1eda   :  { %10576 = vrcp.f32 %v5015_v11 }
0x1edb   :  { %10578 = vpow2.f32 %v5210_v22 }
0x1edc   :  { %10580 = vpow2.f32 %v5212_v4 }
0x1ee5   :  { %v10575_v52 = vpop.eup %10574 }
0x1ee6   :  { %v5027_v38 = vmul.f32 %v10575_v52, %v10573_v7 }
0x1ee7   :  { %v10577_v48 = vpop.eup %10576 }
0x1ee8   :  { %v5026_v23 = vmul.f32 %v10577_v48, %v10571_v15  ;;  %v10579_v9 = vpop.eup %10578 }
0x1ee9   :  { %v10581_v20 = vpop.eup %10580 }
0x1eea   :  { %10126 = vmatprep.mubr.msk.f32.mxu0 %vm1112_vm2, %v5026_v23 }
0x1eeb   :  { %10127 = vmatmul.mubr.msk.f32.vlgmr.msra.gmra.mxu0 %vm1112_vm2, %v5027_v38 }
0x1eec   :  { %10137 = vmatpush3.msra.mxu0 %v10698_v41  ;;  %10140 = vmatprep.mubr.msk.f32.mxu0 %vm1112_vm2, %v10579_v9 }
0x1eed   :  { %10138 = vmatprep.subr.mxu0 %v10698_v41 }
0x1eee   :  { %10139 = vmatpush3.msra.mxu0 %v10698_v41 }
0x1eef   :  { %10150 = vmatprep.subr.mxu0 %v11927_v18  ;;  %10141 = vmatmul.mubr.msk.f32.vlgmr.msra.gmra.mxu0 %vm1112_vm2, %v10581_v20 }
0x1ef0   :  { %10151 = vmatpush3.msra.mxu0 %v11927_v18 }
0x1ef1   :  { %10160 = vmatprep.subr.msk.mxu0 %vm1024_vm1, %v5557_v28 }
0x1fab   :  { %v10128_v16 = vpop.f32.mrf.mxu0 }
0x1fad   :  { %v5100_v39 = vpop.f32.mrf.mxu0 }
0x1faf   :  { %v10142_v27 = vpop.f32.mrf.mxu0 }
0x1fb0   :  { %10582 = vrcp.f32 %v10142_v27 }
0x1fb1   :  { %v5286_v30 = vpop.f32.mrf.mxu0 }
0x1fb2   :  { %10584 = vrcp.f32 %v5286_v30  ;;  %v11994_v30 = vld [vmem:[%s12537_s1 + $0x30] sm:$0xff] }
0x1fbd   :  { %v10583_v31 = vpop.eup %10582 }
0x1fbe   :  { %v5298_v6 = vmul.f32 %v10583_v31, %v10581_v20 }
0x1fbf   :  { %v10585_v61 = vpop.eup %10584 }
0x1fc0   :  { %v5297_v5 = vmul.f32 %v10585_v61, %v10579_v9 }
0x1fc2   :  { %10147 = vmatprep.mubr.msk.f32.mxu1 %vm1112_vm2, %v5297_v5 }
0x1fc3   :  { %10148 = vmatmul.mubr.msk.f32.vlgmr.msra.gmra.mxu1 %vm1112_vm2, %v5298_v6 }
0x1fc4   :  { %10157 = vmatprep.mubr.msk.f32.mxu1 %vm1024_vm1, %v5100_v39  ;;  %10156 = vmatpush3.msra.mxu1 %v11938_v12 }
0x1fc5   :  { %10167 = vmatprep.subr.mxu1 %v10698_v41 }
0x1fc7   :  { %10158 = vmatmul.mubr.msk.f32.vlgmr.msra.gmra.mxu1 %vm1024_vm1, %v10128_v16 }
0x1fc8   :  { %10168 = vmatpush3.msra.mxu1 %v10698_v41 }
0x1fc9   :  { %10169 = vmatprep.subr.mxu1 %v10698_v41 }
0x1fca   :  { %10170 = vmatpush3.msra.mxu1 %v10698_v41 }
0x2083   :  { %v10149_v24 = vpop.f32.mrf.mxu1 }
0x2085   :  { %v5379_v37 = vpop.f32.mrf.mxu1 }
0x2086   :  { %10152 = vmatprep.mubr.msk.f32.mxu0 %vm1024_vm1, %v5379_v37 }
0x2087   :  { %10153 = vmatmul.mubr.msk.f32.vlgmr.msra.gmra.mxu0 %vm1024_vm1, %v10149_v24 }
0x2088   :  { %10161 = vmatpush3.xpose.msk.msra.mxu0 %vm1024_vm1, %v5557_v28  ;;  %10164 = vmatprep.mubr.msk.f32.mxu0 %vm1024_vm1, %v5551_v57 }
0x2089   :  { %10162 = vmatprep.subr.msk.mxu0 %vm1024_vm1, %v5555_v58 }
0x208c   :  { %10163 = vmatpush3.xpose.msk.msra.mxu0 %vm1024_vm1, %v5555_v58 }
0x208d   :  { %10181 = vmatprep.subr.mxu0 %v11994_v30 }
0x208f   :  { %10165 = vmatmul.mubr.msk.f32.vlgmr.msra.gmra.mxu0 %vm1024_vm1, %v5553_v53  ;;  %v4767_v53 = vadd.f32 %v11894_v32, %v11801_v3 }
0x2090   :  { %10182 = vmatpush3.msra.mxu0 %v11994_v30 }
0x2091   :  { %10193 = vmatprep.subr.mxu0 %v10698_v41 }
0x2147   :  { %v11957_v51 = vpop.f32.mrf.mxu0 }
0x2149   :  { %v11959_v33 = vpop.f32.mrf.mxu0 }
0x214f   :  { %v10166_v21 = vpop.f32.mrf.mxu0 }
0x2150   :  { %v5642_v8 = vmul.f32 %v11875_v19, %v10166_v21  ;;  %v4811_v21 = vmul.f32 %v4767_v53, %v11373_v50  ;;  %v4807_v50 = vmul.f32 %v4767_v53, %v11381_v49 }
0x2151   :  { %v5632_v36 = vpop.f32.mrf.mxu0 }
0x2152   :  { %v5641_v15 = vmul.f32 %v11881_v55, %v5632_v36  ;;  %v5646_v7 = vsel %vm1112_vm2, %v5642_v8, -inf }
0x2153   :  { %5647 = vmax.xlane.f32.xlu1 %v5646_v7 }
0x2154   :  { %v5643_v62 = vsel %vm1112_vm2, %v5641_v15, -inf }
0x2155   :  { %5644 = vmax.xlane.f32.xlu0 %v5643_v62 }
0x2164   :  { %5740 = vrot.lane.b32.xlu1 %v11908_v54, %s12542_s24 }
0x2168   :  { %5914 = vrot.lane.b32.xlu1 %v11815_v2, %s12543_s25 }
0x216b   :  { %5742 = vrot.lane.b32.xlu0 %v11863_v17, %s12542_s24 }
0x216c   :  { %5912 = vrot.lane.b32.xlu1 %v11835_v14, %s12538_s17 }
0x216f   :  { %5916 = vrot.lane.b32.xlu0 %v11820_v45, %s12543_s25 }
0x2173   :  { %5910 = vrot.lane.b32.xlu0 %v11845_v25, %s12538_s17  ;;  %v11980_v25 = vpop.f32.mrf.mxu1 }
0x2175   :  { %v11982_v52 = vpop.f32.mrf.mxu1 }
0x21dc   :  { %v5648_v0 = vpop.xlane.xlu1 %5647 }
0x21dd   :  { %v5650_v26 = vsub.f32 %v5642_v8, %v5648_v0  ;;  %v4773_v8 = vadd.f32 %v11898_v35, %v11801_v3 }
0x21de   :  { %v5645_v43 = vpop.xlane.xlu0 %5644 }
0x21df   :  { %v5649_v47 = vsub.f32 %v5641_v15, %v5645_v43  ;;  %v5653_v56 = vmul.f32 1.442695, %v5650_v26  ;;  %v4812_v36 = vmul.f32 %v4773_v8, %v11369_v59  ;;  %v4808_v35 = vmul.f32 %v4773_v8, %v11376_v60 }
0x21e0   :  { %v5741_v45 = vpop.permute.xlu1 %5740  ;;  %v4784_v49 = vmul.f32 %v4773_v8, %v11408_v1 }
0x21e1   :  { %v5651_v11 = vmul.f32 1.442695, %v5649_v47  ;;  %v4783_v47 = vmul.f32 %v4767_v53, %v11384_v63  ;;  %v5547_v63 = vadd.f32 %v11980_v25, %v11957_v51 }
0x21e2   :  { %v5743_v22 = vpop.permute.xlu0 %5742 }
0x21e3   :  { %10586 = vpow2.f32 %v5651_v11  ;;  %10174 = vmatprep.subr.mxu1 %v5743_v22 }
0x21e4   :  { %10588 = vpow2.f32 %v5653_v56  ;;  %v5915_v39 = vpop.permute.xlu1 %5914 }
0x21e6   :  { %v5917_v14 = vpop.permute.xlu0 %5916 }
0x21e8   :  { %v5913_v27 = vpop.permute.xlu1 %5912 }
0x21ea   :  { %v5911_v16 = vpop.permute.xlu0 %5910 }
0x21f0   :  { %v10587_v2 = vpop.eup %10586 }
0x21f1   :  { %v10589_v4 = vpop.eup %10588  ;;  %10171 = vmatprep.mubr.msk.f32.mxu1 %vm1112_vm2, %v10587_v2 }
0x21f2   :  { %10172 = vmatmul.mubr.msk.f32.vlgmr.msra.gmra.mxu1 %vm1112_vm2, %v10589_v4 }
0x21f3   :  { %10175 = vmatpush3.msra.mxu1 %v5743_v22 }
0x21f4   :  { %10176 = vmatprep.subr.mxu1 %v5741_v45 }
0x21f5   :  { %10177 = vmatpush3.msra.mxu1 %v5741_v45  ;;  %v10674_v45 = vld [vmem:[%s12485_s16 + $0x18] sm:$0xff] }
0x21f6   :  { %10186 = vmatprep.subr.msk.mxu1 %vm1024_vm1, %v5917_v14 }
0x22b2   :  { %v10173_v48 = vpop.f32.mrf.mxu1 }
0x22b3   :  { %10590 = vrcp.f32 %v10173_v48 }
0x22b4   :  { %v5727_v23 = vpop.f32.mrf.mxu1 }
0x22b5   :  { %10592 = vrcp.f32 %v5727_v23 }
0x22c0   :  { %v10591_v38 = vpop.eup %10590 }
0x22c1   :  { %v5739_v28 = vmul.f32 %v10591_v38, %v10589_v4  ;;  %v10675_v38 = vld [vmem:[%s12485_s16 + $0x10] sm:$0xff] }
0x22c2   :  { %v10593_v9 = vpop.eup %10592  ;;  %v4779_v51 = vmul.f32 %v10675_v38, %v4767_v53 }
0x22c3   :  { %v5738_v20 = vmul.f32 %v10593_v9, %v10587_v2 }
0x22c5   :  { %10178 = vmatprep.mubr.msk.f32.mxu1 %vm1112_vm2, %v5738_v20 }
0x22c6   :  { %10179 = vmatmul.mubr.msk.f32.vlgmr.msra.gmra.mxu1 %vm1112_vm2, %v5739_v28 }
0x22c7   :  { %10187 = vmatpush3.xpose.msk.msra.mxu1 %vm1024_vm1, %v5917_v14  ;;  %10190 = vmatprep.mubr.msk.f32.mxu1 %vm1024_vm1, %v5911_v16  ;;  %v4780_v14 = vmul.f32 %v10674_v45, %v4773_v8 }
0x22c8   :  { %10188 = vmatprep.subr.msk.mxu1 %vm1024_vm1, %v5915_v39 }
0x22cb   :  { %10189 = vmatpush3.xpose.msk.msra.mxu1 %vm1024_vm1, %v5915_v39 }
0x22ce   :  { %10191 = vmatmul.mubr.msk.f32.vlgmr.msra.gmra.mxu1 %vm1024_vm1, %v5913_v27 }
0x2386   :  { %v10180_v31 = vpop.f32.mrf.mxu1 }
0x2388   :  { %v5818_v61 = vpop.f32.mrf.mxu1 }
0x2389   :  { %10183 = vmatprep.mubr.msk.f32.mxu0 %vm1024_vm1, %v5818_v61 }
0x238a   :  { %10184 = vmatmul.mubr.msk.f32.vlgmr.msra.gmra.mxu0 %vm1024_vm1, %v10180_v31 }
0x238b   :  { %10194 = vmatpush3.msra.mxu0 %v10698_v41 }
0x238c   :  { %10195 = vmatprep.subr.mxu0 %v10698_v41 }
0x238d   :  { %10196 = vmatpush3.msra.mxu0 %v10698_v41 }
0x238e   :  { %v10192_v5 = vpop.f32.mrf.mxu1 }
0x238f   :  { %v6002_v6 = vmul.f32 %v11875_v19, %v10192_v5 }
0x2390   :  { %v5992_v24 = vpop.f32.mrf.mxu1 }
0x2391   :  { %v6001_v37 = vmul.f32 %v11881_v55, %v5992_v24  ;;  %v6006_v57 = vsel %vm1112_vm2, %v6002_v6, -inf }
0x2392   :  { %6007 = vmax.xlane.f32.xlu1 %v6006_v57  ;;  %v12081_v57 = vld [vmem:[%s12537_s1 + $0x38] sm:$0xff] }
0x2393   :  { %v6003_v58 = vsel %vm1112_vm2, %v6001_v37, -inf  ;;  %10207 = vmatprep.subr.mxu1 %v12081_v57 }
0x2394   :  { %6004 = vmax.xlane.f32.xlu0 %v6003_v58  ;;  %10208 = vmatpush3.msra.mxu1 %v12081_v57 }
0x2395   :  { %10219 = vmatprep.subr.mxu1 %v10698_v41 }
0x23a3   :  { %4821 = vrot.lane.b32.xlu1 %v4811_v21, %s12545_s0 }
0x23a7   :  { %6100 = vrot.lane.b32.xlu1 %v11908_v54, %s12538_s17 }
0x23aa   :  { %4823 = vrot.lane.b32.xlu0 %v4812_v36, %s12545_s0 }
0x23ae   :  { %6102 = vrot.lane.b32.xlu0 %v11863_v17, %s12538_s17 }
0x241b   :  { %v6008_v15 = vpop.xlane.xlu1 %6007 }
0x241c   :  { %v6010_v7 = vsub.f32 %v6002_v6, %v6008_v15 }
0x241d   :  { %v6005_v32 = vpop.xlane.xlu0 %6004 }
0x241e   :  { %v6009_v62 = vsub.f32 %v6001_v37, %v6005_v32  ;;  %v6013_v0 = vmul.f32 1.442695, %v6010_v7 }
0x241f   :  { %v4822_v26 = vpop.permute.xlu1 %4821 }
0x2420   :  { %v6011_v43 = vmul.f32 1.442695, %v6009_v62  ;;  %v12021_v3 = vadd.f32 %v4822_v26, %v4807_v50 }
0x2421   :  { %v4824_v54 = vpop.permute.xlu0 %4823 }
0x2422   :  { %10594 = vpow2.f32 %v6011_v43  ;;  %v12024_v59 = vadd.f32 %v4824_v54, %v4808_v35  ;;  %6272 = vrot.lane.b32.xlu1 %v12021_v3, %s12546_s29  ;;  %v12114_v35 = vadd.f32 %v11896_v40, %v11855_v34 }
0x2423   :  { %10596 = vpow2.f32 %v6013_v0  ;;  %v6101_v1 = vpop.permute.xlu1 %6100 }
0x2424   :  { %6274 = vrot.lane.b32.xlu0 %v12024_v59, %s12546_s29 }
0x2425   :  { %v6103_v17 = vpop.permute.xlu0 %6102 }
0x2426   :  { %10200 = vmatprep.subr.mxu0 %v6103_v17  ;;  %4795 = vrot.lane.b32.xlu1 %v4784_v49, %s12545_s0 }
0x2428   :  { %4793 = vrot.lane.b32.xlu0 %v4783_v47, %s12545_s0 }
0x242a   :  { %6545 = vrot.lane.b32.xlu1 %v12021_v3, %s12539_s5 }
0x242c   :  { %6547 = vrot.lane.b32.xlu0 %v12024_v59, %s12539_s5 }
0x242f   :  { %v10595_v60 = vpop.eup %10594 }
0x2430   :  { %v10597_v56 = vpop.eup %10596  ;;  %10197 = vmatprep.mubr.msk.f32.mxu0 %vm1112_vm2, %v10595_v60 }
0x2431   :  { %10198 = vmatmul.mubr.msk.f32.vlgmr.msra.gmra.mxu0 %vm1112_vm2, %v10597_v56 }
0x2432   :  { %10201 = vmatpush3.msra.mxu0 %v6103_v17 }
0x2433   :  { %10202 = vmatprep.subr.mxu0 %v6101_v1 }
0x2434   :  { %10203 = vmatpush3.msra.mxu0 %v6101_v1 }
0x244a   :  { %v10185_v11 = vpop.f32.mrf.mxu0 }
0x244b   :  { %v12042_v22 = vadd.f32 %v10185_v11, %v5547_v63 }
0x244c   :  { %v12059_v20 = vpop.f32.mrf.mxu0 }
0x2494   :  { %v6273_v2 = vpop.permute.xlu1 %6272 }
0x2496   :  { %v6275_v4 = vpop.permute.xlu0 %6274 }
0x2497   :  { %10212 = vmatprep.subr.msk.mxu0 %vm1024_vm1, %v6275_v4 }
0x2498   :  { %v4796_v48 = vpop.permute.xlu1 %4795 }
0x2499   :  { %v12048_v23 = vadd.f32 %v4796_v48, %v4780_v14 }
0x249a   :  { %v4794_v25 = vpop.permute.xlu0 %4793 }
0x249b   :  { %v12053_v9 = vadd.f32 %v4794_v25, %v4779_v51  ;;  %6543 = vrot.lane.b32.xlu1 %v12048_v23, %s12540_s26 }
0x249c   :  { %v6546_v6 = vpop.permute.xlu1 %6545 }
0x249d   :  { %6541 = vrot.lane.b32.xlu0 %v12053_v9, %s12540_s26 }
0x249e   :  { %v6548_v5 = vpop.permute.xlu0 %6547 }
0x24f1   :  { %v10199_v28 = vpop.f32.mrf.mxu0 }
0x24f2   :  { %10598 = vrcp.f32 %v10199_v28 }
0x24f3   :  { %v6087_v16 = vpop.f32.mrf.mxu0 }
0x24f4   :  { %10600 = vrcp.f32 %v6087_v16 }
0x24ff   :  { %v10599_v39 = vpop.eup %10598 }
0x2500   :  { %v6099_v61 = vmul.f32 %v10599_v39, %v10597_v56 }
0x2501   :  { %v10601_v27 = vpop.eup %10600 }
0x2502   :  { %v6098_v31 = vmul.f32 %v10601_v27, %v10595_v60 }
0x2504   :  { %10204 = vmatprep.mubr.msk.f32.mxu0 %vm1112_vm2, %v6098_v31 }
0x2505   :  { %10205 = vmatmul.mubr.msk.f32.vlgmr.msra.gmra.mxu0 %vm1112_vm2, %v6099_v61 }
0x2506   :  { %10213 = vmatpush3.xpose.msk.msra.mxu0 %vm1024_vm1, %v6275_v4  ;;  %10216 = vmatprep.mubr.msk.f32.mxu0 %vm1024_vm1, %v12053_v9 }
0x2507   :  { %10214 = vmatprep.subr.msk.mxu0 %vm1024_vm1, %v6273_v2 }
0x250a   :  { %10215 = vmatpush3.xpose.msk.msra.mxu0 %vm1024_vm1, %v6273_v2 }
0x250b   :  { %10233 = vmatprep.subr.msk.mxu0 %vm1024_vm1, %v6548_v5 }
0x250d   :  { %10217 = vmatmul.mubr.msk.f32.vlgmr.msra.gmra.mxu0 %vm1024_vm1, %v12048_v23  ;;  %v6544_v37 = vpop.permute.xlu1 %6543 }
0x250e   :  { %10234 = vmatpush3.xpose.msk.msra.mxu0 %vm1024_vm1, %v6548_v5 }
0x250f   :  { %10235 = vmatprep.subr.msk.mxu0 %vm1024_vm1, %v6546_v6  ;;  %v6542_v24 = vpop.permute.xlu0 %6541 }
0x2510   :  { %10237 = vmatprep.mubr.msk.f32.mxu0 %vm1024_vm1, %v6542_v24 }
0x2512   :  { %10236 = vmatpush3.xpose.msk.msra.mxu0 %vm1024_vm1, %v6546_v6 }
0x2513   :  { %10254 = vmatprep.subr.mxu0 %v11927_v18 }
0x2515   :  { %10238 = vmatmul.mubr.msk.f32.vlgmr.msra.gmra.mxu0 %vm1024_vm1, %v6544_v37 }
0x2516   :  { %10255 = vmatpush3.msra.mxu0 %v11927_v18  ;;  %v12091_v18 = vadd.f32 %v11900_v10, %v11855_v34 }
0x25c5   :  { %v10206_v58 = vpop.f32.mrf.mxu0 }
0x25c7   :  { %v6178_v53 = vpop.f32.mrf.mxu0 }
0x25c8   :  { %10209 = vmatprep.mubr.msk.f32.mxu1 %vm1024_vm1, %v6178_v53 }
0x25c9   :  { %10210 = vmatmul.mubr.msk.f32.vlgmr.msra.gmra.mxu1 %vm1024_vm1, %v10206_v58 }
0x25ca   :  { %10220 = vmatpush3.msra.mxu1 %v10698_v41 }
0x25cb   :  { %10221 = vmatprep.subr.mxu1 %v10698_v41 }
0x25cc   :  { %10222 = vmatpush3.msra.mxu1 %v10698_v41 }
0x25cd   :  { %v10218_v21 = vpop.f32.mrf.mxu0  ;;  %10226 = vmatprep.subr.mxu1 %v12091_v18 }
0x25ce   :  { %v6362_v8 = vmul.f32 %v11875_v19, %v10218_v21 }
0x25cf   :  { %v6352_v36 = vpop.f32.mrf.mxu0 }
0x25d0   :  { %v6361_v15 = vmul.f32 %v11881_v55, %v6352_v36  ;;  %v6366_v7 = vsel %vm1112_vm2, %v6362_v8, -inf }
0x25d1   :  { %6367 = vmax.xlane.f32.xlu1 %v6366_v7 }
0x25d2   :  { %v6363_v32 = vsel %vm1112_vm2, %v6361_v15, -inf }
0x25d3   :  { %6364 = vmax.xlane.f32.xlu0 %v6363_v32 }
0x25d5   :  { %v10239_v10 = vpop.f32.mrf.mxu0 }
0x25d6   :  { %v6633_v0 = vmul.f32 %v11875_v19, %v10239_v10 }
0x25d7   :  { %v6623_v62 = vpop.f32.mrf.mxu0 }
0x25d8   :  { %v6632_v50 = vmul.f32 %v11881_v55, %v6623_v62  ;;  %v6637_v43 = vsel %vm1112_vm2, %v6633_v0, -inf }
0x25da   :  { %v6634_v26 = vsel %vm1112_vm2, %v6632_v50, -inf }
0x25db   :  { %6635 = vmax.xlane.f32.xlu0 %v6634_v26 }
0x25df   :  { %6638 = vmax.xlane.f32.xlu0 %v6637_v43 }
0x25e2   :  { %6735 = vrot.lane.b32.xlu1 %v12091_v18, %s12540_s26 }
0x25e6   :  { %6988 = vrot.lane.b32.xlu1 %v12024_v59, %s12541_s4 }
0x25ea   :  { %6986 = vrot.lane.b32.xlu1 %v12021_v3, %s12541_s4 }
0x25ee   :  { %6984 = vrot.lane.b32.xlu1 %v12048_v23, %s12542_s24 }
0x25f5   :  { %6733 = vrot.lane.b32.xlu0 %v12114_v35, %s12540_s26  ;;  %s10711_s26 = smov [#allocation3]  }
0x25f6   :  { %s8969_s4 = sshll.u32 %s10711_s26, 4  ;;  %s8970_s4 = int_to_ptr.vmem [resolvable:$true] %s8969_s4 }
0x25f7   :  { %p10681_p1 = scmp.lt.s32.totalorder %s8970_s4, %s8970_s4 }
0x25f9   :  { %6982 = vrot.lane.b32.xlu0 %v12053_v9, %s12542_s24 }
0x265a   :  { %v6368_v54 = vpop.xlane.xlu1 %6367 }
0x265b   :  { %v6370_v49 = vsub.f32 %v6362_v8, %v6368_v54 }
0x265c   :  { %v6365_v17 = vpop.xlane.xlu0 %6364 }
0x265d   :  { %v6369_v47 = vsub.f32 %v6361_v15, %v6365_v17  ;;  %v6373_v60 = vmul.f32 1.442695, %v6370_v49 }
0x265e   :  { %v6736_v56 = vpop.permute.xlu1 %6735 }
0x265f   :  { %v6371_v1 = vmul.f32 1.442695, %v6369_v47 }
0x2661   :  { %10602 = vpow2.f32 %v6371_v1 }
0x2662   :  { %10604 = vpow2.f32 %v6373_v60  ;;  %v12120_v63 = vpop.permute.xlu1 %6988 }
0x2663   :  { %10264 = vmatprep.subr.msk.mxu0 %vm1024_vm1, %v12120_v63 }
0x2664   :  { %v6636_v4 = vpop.xlane.xlu0 %6635 }
0x2665   :  { %v6640_v14 = vsub.f32 %v6632_v50, %v6636_v4 }
0x2666   :  { %v6987_v62 = vpop.permute.xlu1 %6986 }
0x2667   :  { %v6642_v28 = vmul.f32 1.442695, %v6640_v14 }
0x2668   :  { %v6639_v48 = vpop.xlane.xlu0 %6638 }
0x2669   :  { %v6641_v51 = vsub.f32 %v6633_v0, %v6639_v48 }
0x266b   :  { %v6644_v16 = vmul.f32 1.442695, %v6641_v51 }
0x266c   :  { %v6734_v6 = vpop.permute.xlu0 %6733 }
0x266e   :  { %v10603_v34 = vpop.eup %10602 }
0x266f   :  { %v10605_v40 = vpop.eup %10604  ;;  %10223 = vmatprep.mubr.msk.f32.mxu1 %vm1112_vm2, %v10603_v34 }
0x2670   :  { %10224 = vmatmul.mubr.msk.f32.vlgmr.msra.gmra.mxu1 %vm1112_vm2, %v10605_v40  ;;  %v6983_v10 = vpop.permute.xlu0 %6982 }
0x2671   :  { %10227 = vmatpush3.msra.mxu1 %v12091_v18 }
0x2672   :  { %10228 = vmatprep.subr.mxu1 %v12114_v35 }
0x2673   :  { %10229 = vmatpush3.msra.mxu1 %v12114_v35 }
0x2674   :  { %10240 = vmatprep.subr.mxu1 %v10698_v41 }
0x2689   :  { %v10211_v11 = vpop.f32.mrf.mxu1 }
0x268a   :  { %v12131_v2 = vadd.f32 %v10211_v11, %v12042_v22 }
0x268b   :  { %v12133_v45 = vpop.f32.mrf.mxu1 }
0x2730   :  { %v10225_v38 = vpop.f32.mrf.mxu1 }
0x2731   :  { %10606 = vrcp.f32 %v10225_v38 }
0x2732   :  { %v6447_v25 = vpop.f32.mrf.mxu1 }
0x2733   :  { %10608 = vrcp.f32 %v6447_v25 }
0x2734   :  { %10610 = vpow2.f32 %v6642_v28 }
0x2735   :  { %10612 = vpow2.f32 %v6644_v16 }
0x273e   :  { %v10607_v39 = vpop.eup %10606 }
0x273f   :  { %v6459_v61 = vmul.f32 %v10607_v39, %v10605_v40 }
0x2740   :  { %v10609_v27 = vpop.eup %10608 }
0x2741   :  { %v6458_v31 = vmul.f32 %v10609_v27, %v10603_v34  ;;  %v10611_v22 = vpop.eup %10610 }
0x2742   :  { %v10613_v5 = vpop.eup %10612 }
0x2743   :  { %10230 = vmatprep.mubr.msk.f32.mxu1 %vm1112_vm2, %v6458_v31 }
0x2744   :  { %10231 = vmatmul.mubr.msk.f32.vlgmr.msra.gmra.mxu1 %vm1112_vm2, %v6459_v61 }
0x2745   :  { %10241 = vmatpush3.msra.mxu1 %v10698_v41  ;;  %10244 = vmatprep.mubr.msk.f32.mxu1 %vm1112_vm2, %v10611_v22 }
0x2746   :  { %10242 = vmatprep.subr.mxu1 %v10698_v41 }
0x2747   :  { %10243 = vmatpush3.msra.mxu1 %v10698_v41 }
0x2748   :  { %10247 = vmatprep.subr.mxu1 %v6736_v56  ;;  %10245 = vmatmul.mubr.msk.f32.vlgmr.msra.gmra.mxu1 %vm1112_vm2, %v10613_v5 }
0x2749   :  { %10248 = vmatpush3.msra.mxu1 %v6736_v56 }
0x274a   :  { %10249 = vmatprep.subr.mxu1 %v6734_v6 }
0x274b   :  { %10250 = vmatpush3.msra.mxu1 %v6734_v6 }
0x274c   :  { %10259 = vmatprep.subr.mxu1 %v11938_v12 }
0x2804   :  { %v10232_v24 = vpop.f32.mrf.mxu1 }
0x2806   :  { %v6532_v37 = vpop.f32.mrf.mxu1 }
0x2808   :  { %v10246_v58 = vpop.f32.mrf.mxu1 }
0x2809   :  { %10614 = vrcp.f32 %v10246_v58 }
0x280a   :  { %v6718_v53 = vpop.f32.mrf.mxu1 }
0x280b   :  { %10616 = vrcp.f32 %v6718_v53 }
0x2816   :  { %v10615_v21 = vpop.eup %10614 }
0x2817   :  { %v6730_v15 = vmul.f32 %v10615_v21, %v10613_v5 }
0x2818   :  { %v10617_v8 = vpop.eup %10616 }
0x2819   :  { %v6729_v36 = vmul.f32 %v10617_v8, %v10611_v22 }
0x281b   :  { %10251 = vmatprep.mubr.msk.f32.mxu1 %vm1112_vm2, %v6729_v36 }
0x281c   :  { %10252 = vmatmul.mubr.msk.f32.vlgmr.msra.gmra.mxu1 %vm1112_vm2, %v6730_v15 }
0x281d   :  { %10261 = vmatprep.mubr.msk.f32.mxu1 %vm1024_vm1, %v6532_v37  ;;  %10260 = vmatpush3.msra.mxu1 %v11938_v12  ;;  %v6985_v12 = vpop.permute.xlu1 %6984 }
0x281e   :  { %10271 = vmatprep.subr.mxu1 %v10698_v41 }
0x2820   :  { %10262 = vmatmul.mubr.msk.f32.vlgmr.msra.gmra.mxu1 %vm1024_vm1, %v10232_v24 }
0x2821   :  { %10272 = vmatpush3.msra.mxu1 %v10698_v41 }
0x2822   :  { %10273 = vmatprep.subr.mxu1 %v10698_v41 }
0x2823   :  { %10274 = vmatpush3.msra.mxu1 %v10698_v41 }
0x28dc   :  { %v10253_v7 = vpop.f32.mrf.mxu1 }
0x28de   :  { %v6811_v32 = vpop.f32.mrf.mxu1 }
0x28df   :  { %10256 = vmatprep.mubr.msk.f32.mxu0 %vm1024_vm1, %v6811_v32 }
0x28e0   :  { %10257 = vmatmul.mubr.msk.f32.vlgmr.msra.gmra.mxu0 %vm1024_vm1, %v10253_v7 }
0x28e1   :  { %10265 = vmatpush3.xpose.msk.msra.mxu0 %vm1024_vm1, %v12120_v63  ;;  %10268 = vmatprep.mubr.msk.f32.mxu0 %vm1024_vm1, %v6983_v10 }
0x28e2   :  { %10266 = vmatprep.subr.msk.mxu0 %vm1024_vm1, %v6987_v62 }
0x28e5   :  { %10267 = vmatpush3.xpose.msk.msra.mxu0 %vm1024_vm1, %v6987_v62 }
0x28e6   :  { %10285 = vmatprep.subr.mxu0 %v11994_v30 }
0x28e8   :  { %10269 = vmatmul.mubr.msk.f32.vlgmr.msra.gmra.mxu0 %vm1024_vm1, %v6985_v12 }
0x28e9   :  { %10286 = vmatpush3.msra.mxu0 %v11994_v30 }
0x28ea   :  { %10297 = vmatprep.subr.mxu0 %v10698_v41 }
0x29a0   :  { %v12163_v50 = vpop.f32.mrf.mxu0 }
0x29a2   :  { %v12165_v0 = vpop.f32.mrf.mxu0 }
0x29a8   :  { %v10270_v26 = vpop.f32.mrf.mxu0 }
0x29a9   :  { %v7074_v43 = vmul.f32 %v11875_v19, %v10270_v26 }
0x29aa   :  { %v7064_v54 = vpop.f32.mrf.mxu0 }
0x29ab   :  { %v7073_v49 = vmul.f32 %v11881_v55, %v7064_v54  ;;  %v7078_v17 = vsel %vm1112_vm2, %v7074_v43, -inf }
0x29ac   :  { %7079 = vmax.xlane.f32.xlu1 %v7078_v17 }
0x29ad   :  { %v7075_v47 = vsel %vm1112_vm2, %v7073_v49, -inf }
0x29ae   :  { %7076 = vmax.xlane.f32.xlu0 %v7075_v47 }
0x29bd   :  { %7172 = vrot.lane.b32.xlu1 %v12114_v35, %s12542_s24 }
0x29c1   :  { %7346 = vrot.lane.b32.xlu1 %v12021_v3, %s12543_s25 }
0x29c4   :  { %7174 = vrot.lane.b32.xlu0 %v12091_v18, %s12542_s24 }
0x29c5   :  { %7344 = vrot.lane.b32.xlu1 %v12048_v23, %s12538_s17 }
0x29c8   :  { %7348 = vrot.lane.b32.xlu0 %v12024_v59, %s12543_s25 }
0x29cc   :  { %7342 = vrot.lane.b32.xlu0 %v12053_v9, %s12538_s17  ;;  %v10263_v9 = vpop.f32.mrf.mxu1 }
0x29ce   :  { %v12186_v4 = vpop.f32.mrf.mxu1 }
0x2a35   :  { %v7080_v30 = vpop.xlane.xlu1 %7079 }
0x2a36   :  { %v7082_v60 = vsub.f32 %v7074_v43, %v7080_v30  ;;  %v5542_v43 = vadd.f32 %v11982_v52, %v11959_v33 }
0x2a37   :  { %v7077_v56 = vpop.xlane.xlu0 %7076 }
0x2a38   :  { %v7081_v1 = vsub.f32 %v7073_v49, %v7077_v56  ;;  %v7085_v63 = vmul.f32 1.442695, %v7082_v60  ;;  %v5908_v54 = vadd.f32 %v12059_v20, %v5542_v43  ;;  %v9238_v60 = vld [vmem:[%s12544_s27 + $0x1] ss:$0 sm:$0xff] }
0x2a39   :  { %v7173_v59 = vpop.permute.xlu1 %7172 }
0x2a3a   :  { %v7083_v34 = vmul.f32 1.442695, %v7081_v1  ;;  %v6268_v49 = vadd.f32 %v12133_v45, %v5908_v54 }
0x2a3b   :  { %v7175_v40 = vpop.permute.xlu0 %7174 }
0x2a3c   :  { %10618 = vpow2.f32 %v7083_v34  ;;  %10278 = vmatprep.subr.mxu1 %v7175_v40  ;;  %v7702_v47 = vadd.f32 %v6268_v49, %v11724_v42  ;;  %v7703_v42 = vadd.f32 %v12131_v2, %v11726_v46 }
0x2a3d   :  { %10620 = vpow2.f32 %v7085_v63  ;;  %v7347_v39 = vpop.permute.xlu1 %7346 }
0x2a3e   :  { %v12227_v1 = vadd.f32 %v9238_v60, %v7702_v47  ;;  %v12240_v33 = vadd.f32 %v9238_v60, %v7703_v42 }
0x2a3f   :  { %v7349_v23 = vpop.permute.xlu0 %7348 }
0x2a41   :  { %v7345_v27 = vpop.permute.xlu1 %7344 }
0x2a43   :  { %v7343_v16 = vpop.permute.xlu0 %7342 }
0x2a49   :  { %v10619_v3 = vpop.eup %10618 }
0x2a4a   :  { %v10621_v11 = vpop.eup %10620  ;;  %10275 = vmatprep.mubr.msk.f32.mxu1 %vm1112_vm2, %v10619_v3 }
0x2a4b   :  { %10276 = vmatmul.mubr.msk.f32.vlgmr.msra.gmra.mxu1 %vm1112_vm2, %v10621_v11 }
0x2a4c   :  { %10279 = vmatpush3.msra.mxu1 %v7175_v40 }
0x2a4d   :  { %10280 = vmatprep.subr.mxu1 %v7173_v59 }
0x2a4e   :  { %10281 = vmatpush3.msra.mxu1 %v7173_v59  ;;  %v9254_v59 = vld [vmem:[%s12479_s10 + $0x38] sm:$0xff] }
0x2a4f   :  { %10290 = vmatprep.subr.msk.mxu1 %vm1024_vm1, %v7349_v23 }
0x2b0b   :  { %v10277_v14 = vpop.f32.mrf.mxu1 }
0x2b0c   :  { %10622 = vrcp.f32 %v10277_v14  ;;  %v9251_v14 = vld [vmem:[%s12479_s10 + $0x20] sm:$0xff] }
0x2b0d   :  { %v7159_v48 = vpop.f32.mrf.mxu1 }
0x2b0e   :  { %10624 = vrcp.f32 %v7159_v48  ;;  %v6974_v48 = vadd.f32 %v12186_v4, %v12165_v0 }
0x2b19   :  { %v10623_v38 = vpop.eup %10622 }
0x2b1a   :  { %v7171_v28 = vmul.f32 %v10623_v38, %v10621_v11 }
0x2b1b   :  { %v10625_v51 = vpop.eup %10624 }
0x2b1c   :  { %v7170_v25 = vmul.f32 %v10625_v51, %v10619_v3 }
0x2b1e   :  { %10282 = vmatprep.mubr.msk.f32.mxu1 %vm1112_vm2, %v7170_v25 }
0x2b1f   :  { %10283 = vmatmul.mubr.msk.f32.vlgmr.msra.gmra.mxu1 %vm1112_vm2, %v7171_v28 }
0x2b20   :  { %10291 = vmatpush3.xpose.msk.msra.mxu1 %vm1024_vm1, %v7349_v23  ;;  %10294 = vmatprep.mubr.msk.f32.mxu1 %vm1024_vm1, %v7343_v16  ;;  %v9253_v23 = vld [vmem:[%s12479_s10 + $0x30] sm:$0xff] }
0x2b21   :  { %10292 = vmatprep.subr.msk.mxu1 %vm1024_vm1, %v7347_v39 }
0x2b24   :  { %10293 = vmatpush3.xpose.msk.msra.mxu1 %vm1024_vm1, %v7347_v39 }
0x2b25   :  { %10311 = vmatprep.subr.mxu1 %v12081_v57 }
0x2b27   :  { %10295 = vmatmul.mubr.msk.f32.vlgmr.msra.gmra.mxu1 %vm1024_vm1, %v7345_v27 }
0x2b28   :  { %10312 = vmatpush3.msra.mxu1 %v12081_v57 }
0x2b29   :  { %10330 = vmatprep.subr.mxu1 %v10698_v41 }
0x2bdf   :  { %v10284_v31 = vpop.f32.mrf.mxu1 }
0x2be1   :  { %v7250_v61 = vpop.f32.mrf.mxu1 }
0x2be2   :  { %10287 = vmatprep.mubr.msk.f32.mxu0 %vm1024_vm1, %v7250_v61 }
0x2be3   :  { %10288 = vmatmul.mubr.msk.f32.vlgmr.msra.gmra.mxu0 %vm1024_vm1, %v10284_v31 }
0x2be4   :  { %10298 = vmatpush3.msra.mxu0 %v10698_v41 }
0x2be5   :  { %10299 = vmatprep.subr.mxu0 %v10698_v41 }
0x2be6   :  { %10300 = vmatpush3.msra.mxu0 %v10698_v41 }
0x2be7   :  { %v10296_v22 = vpop.f32.mrf.mxu1 }
0x2be8   :  { %v7434_v5 = vmul.f32 %v11875_v19, %v10296_v22 }
0x2be9   :  { %v7424_v6 = vpop.f32.mrf.mxu1 }
0x2bea   :  { %v7433_v57 = vmul.f32 %v11881_v55, %v7424_v6  ;;  %v7438_v24 = vsel %vm1112_vm2, %v7434_v5, -inf }
0x2beb   :  { %7439 = vmax.xlane.f32.xlu1 %v7438_v24  ;;  %v12289_v24 = vld [vmem:[%s12477_s8 + $0x1] ss:$0 sm:$0xff] }
0x2bec   :  { %v7435_v37 = vsel %vm1112_vm2, %v7433_v57, -inf }
0x2bed   :  { %7436 = vmax.xlane.f32.xlu0 %v7435_v37 }
0x2bfc   :  { %7532 = vrot.lane.b32.xlu1 %v12114_v35, %s12538_s17 }
0x2c03   :  { %7534 = vrot.lane.b32.xlu0 %v12091_v18, %s12538_s17  ;;  %v6979_v18 = vadd.f32 %v10263_v9, %v12163_v50  ;;  %v9252_v9 = vld [vmem:[%s12479_s10 + $0x28] sm:$0xff]  ;;  %s12550_s17 = sld [smem:[#allocation17_spill]] }
0x2c74   :  { %v7440_v58 = vpop.xlane.xlu1 %7439 }
0x2c75   :  { %v7442_v53 = vsub.f32 %v7434_v5, %v7440_v58 }
0x2c76   :  { %v7437_v21 = vpop.xlane.xlu0 %7436 }
0x2c77   :  { %v7441_v8 = vsub.f32 %v7433_v57, %v7437_v21  ;;  %v7445_v19 = vmul.f32 1.442695, %v7442_v53  ;;  %v12295_v21 = vld [vmem:[%s12478_s9 + $0x1] ss:$0 sm:$0xff] }
0x2c78   :  { %v7533_v35 = vpop.permute.xlu1 %7532 }
0x2c79   :  { %v7443_v36 = vmul.f32 1.442695, %v7441_v8 }
0x2c7a   :  { %v7535_v15 = vpop.permute.xlu0 %7534 }
0x2c7b   :  { %10626 = vpow2.f32 %v7443_v36  ;;  %10304 = vmatprep.subr.mxu0 %v7535_v15 }
0x2c7c   :  { %10628 = vpow2.f32 %v7445_v19 }
0x2c88   :  { %v10627_v55 = vpop.eup %10626 }
0x2c89   :  { %v10629_v7 = vpop.eup %10628  ;;  %10301 = vmatprep.mubr.msk.f32.mxu0 %vm1112_vm2, %v10627_v55 }
0x2c8a   :  { %10302 = vmatmul.mubr.msk.f32.vlgmr.msra.gmra.mxu0 %vm1112_vm2, %v10629_v7 }
0x2c8b   :  { %10305 = vmatpush3.msra.mxu0 %v7535_v15  ;;  %v9268_v15 = vld [vmem:[%s12481_s12 + $0x78] sm:$0xff] }
0x2c8c   :  { %10306 = vmatprep.subr.mxu0 %v7533_v35 }
0x2c8d   :  { %10307 = vmatpush3.msra.mxu0 %v7533_v35  ;;  %v9265_v35 = vld [vmem:[%s12481_s12 + $0x60] sm:$0xff] }
0x2c8e   :  { %10316 = vmatprep.subr.mxu0 %v10698_v41 }
0x2ca3   :  { %v10289_v32 = vpop.f32.mrf.mxu0 }
0x2ca4   :  { %v12215_v10 = vadd.f32 %v10289_v32, %v6979_v18  ;;  %v9264_v18 = vld [vmem:[%s12481_s12 + $0x58] sm:$0xff]  ;;  %v9263_v32 = vld [vmem:[%s12481_s12 + $0x50] sm:$0xff] }
0x2ca5   :  { %v12217_v62 = vpop.f32.mrf.mxu0 }
0x2ca6   :  { %v7340_v51 = vadd.f32 %v12217_v62, %v6974_v48  ;;  %v9261_v62 = vld [vmem:[%s12481_s12 + $0x40] sm:$0xff] }
0x2d4a   :  { %v10303_v12 = vpop.f32.mrf.mxu0 }
0x2d4b   :  { %10630 = vrcp.f32 %v10303_v12 }
0x2d4c   :  { %v7519_v26 = vpop.f32.mrf.mxu0 }
0x2d4d   :  { %10632 = vrcp.f32 %v7519_v26 }
0x2d58   :  { %v10631_v17 = vpop.eup %10630 }
0x2d59   :  { %v7531_v56 = vmul.f32 %v10631_v17, %v10629_v7  ;;  %v9266_v7 = vld [vmem:[%s12481_s12 + $0x68] sm:$0xff] }
0x2d5a   :  { %v10633_v50 = vpop.eup %10632 }
0x2d5b   :  { %v7530_v30 = vmul.f32 %v10633_v50, %v10627_v55  ;;  %v9267_v55 = vld [vmem:[%s12481_s12 + $0x70] sm:$0xff] }
0x2d5d   :  { %10308 = vmatprep.mubr.msk.f32.mxu0 %vm1112_vm2, %v7530_v30  ;;  %v12341_v30 = vld [vmem:[%s12480_s11 + $0x1] ss:$0 sm:$0xff] }
0x2d5e   :  { %10309 = vmatmul.mubr.msk.f32.vlgmr.msra.gmra.mxu0 %vm1112_vm2, %v7531_v56 }
0x2d5f   :  { %10317 = vmatpush3.msra.mxu0 %v10698_v41  ;;  %10324 = vmatprep.mubr.msk.f32.mxu0 %vm117_vm0, %v12227_v1 }
0x2d60   :  { %10318 = vmatprep.subr.mxu0 %v10698_v41 }
0x2d61   :  { %10319 = vmatpush3.msra.mxu0 %v10698_v41 }
0x2d62   :  { %10320 = vmatprep.subr.mxu0 %v10698_v41 }
0x2d63   :  { %10321 = vmatpush3.msra.mxu0 %v10698_v41 }
0x2d64   :  { %10322 = vmatprep.subr.mxu0 %v10698_v41 }
0x2d65   :  { %10323 = vmatpush3.msra.mxu0 %v10698_v41 }
0x2d66   :  { %10325 = vmatmul.mubr.msk.f32.vlgmr.msra.gmra.mxu0 %vm117_vm0, %v12240_v33  ;;  %10344 = vmatprep.subr.mxu0 %v9254_v59 }
0x2d67   :  { %10345 = vmatpush3.msra.mxu0 %v9254_v59 }
0x2d68   :  { %10346 = vmatprep.subr.mxu0 %v9253_v23 }
0x2d69   :  { %10347 = vmatpush3.msra.mxu0 %v9253_v23 }
0x2d6a   :  { %10348 = vmatprep.subr.mxu0 %v9252_v9 }
0x2d6b   :  { %10349 = vmatpush3.msra.mxu0 %v9252_v9 }
0x2d6c   :  { %10350 = vmatprep.subr.mxu0 %v9251_v14 }
0x2d6d   :  { %10351 = vmatpush3.msra.mxu0 %v9251_v14 }
0x2d6e   :  { %10380 = vmatprep.subr.mxu0 %v10698_v41 }
0x2e1e   :  { %v10310_v52 = vpop.f32.mrf.mxu0 }
0x2e20   :  { %v7610_v20 = vpop.f32.mrf.mxu0 }
0x2e21   :  { %10313 = vmatprep.mubr.msk.f32.mxu1 %vm1024_vm1, %v7610_v20 }
0x2e22   :  { %10314 = vmatmul.mubr.msk.f32.vlgmr.msra.gmra.mxu1 %vm1024_vm1, %v10310_v52 }
0x2e23   :  { %10331 = vmatpush3.msra.mxu1 %v10698_v41 }
0x2e24   :  { %10332 = vmatprep.subr.mxu1 %v10698_v41 }
0x2e25   :  { %10333 = vmatpush3.msra.mxu1 %v10698_v41 }
0x2e26   :  { %v10326_v46 = vpop.f32.mrf.mxu0  ;;  %10334 = vmatprep.subr.mxu1 %v10698_v41 }
0x2e27   :  { %v7820_v2 = vmul.f32 0.03125, %v10326_v46  ;;  %10335 = vmatpush3.msra.mxu1 %v10698_v41 }
0x2e28   :  { %v7800_v45 = vpop.f32.mrf.mxu0  ;;  %10336 = vmatprep.subr.mxu1 %v10698_v41 }
0x2e29   :  { %v7819_v63 = vmul.f32 0.03125, %v7800_v45  ;;  %10337 = vmatpush3.msra.mxu1 %v10698_v41  ;;  %v7824_v34 = vsub.f32 %v12240_v33, %v7820_v2 }
0x2e2a   :  { %10358 = vmatprep.subr.mxu1 %v9268_v15 }
0x2e2b   :  { %v7823_v40 = vsub.f32 %v12227_v1, %v7819_v63  ;;  %v7828_v11 = vmul.f32 %v7824_v34, %v7824_v34 }
0x2e2d   :  { %v7827_v3 = vmul.f32 %v7823_v40, %v7823_v40 }
0x2e2f   :  { %10338 = vmatprep.mubr.msk.f32.mxu1 %vm117_vm0, %v7827_v3 }
0x2e30   :  { %10339 = vmatmul.mubr.msk.f32.vlgmr.msra.gmra.mxu1 %vm117_vm0, %v7828_v11 }
0x2e31   :  { %10359 = vmatpush3.msra.mxu1 %v9268_v15  ;;  %v9274_v15 = vld [vmem:[%s12482_s13 + $0x1] ss:$0 sm:$0xff] }
0x2e32   :  { %10360 = vmatprep.subr.mxu1 %v9267_v55 }
0x2e33   :  { %10361 = vmatpush3.msra.mxu1 %v9267_v55 }
0x2e34   :  { %10362 = vmatprep.subr.mxu1 %v9266_v7 }
0x2e35   :  { %10363 = vmatpush3.msra.mxu1 %v9266_v7 }
0x2e36   :  { %10364 = vmatprep.subr.mxu1 %v9265_v35 }
0x2e37   :  { %10365 = vmatpush3.msra.mxu1 %v9265_v35 }
0x2e38   :  { %10366 = vmatprep.subr.mxu1 %v9264_v18 }
0x2e39   :  { %10367 = vmatpush3.msra.mxu1 %v9264_v18 }
0x2e3a   :  { %10368 = vmatprep.subr.mxu1 %v9263_v32 }
0x2e3b   :  { %10369 = vmatpush3.msra.mxu1 %v9263_v32 }
0x2ee2   :  { %v10315_v38 = vpop.f32.mrf.mxu1 }
0x2ee3   :  { %v7701_v25 = vadd.f32 %v10315_v38, %v12215_v10  ;;  %v9262_v10 = vld [vmem:[%s12481_s12 + $0x48] sm:$0xff]  ;;  %s10676_s12 = scalar_lea.vmem %s8970_s4, 32 }
0x2ee4   :  { %v7691_v28 = vpop.f32.mrf.mxu1  ;;  %10370 = vmatprep.subr.mxu1 %v9262_v10  ;;  %p10677_p0 = scmp.ne.s32.totalorder %s8970_s4, %s10676_s12  ;;  %p10682_p2 = scmp.lt.s32.totalorder %s10676_s12, %s10676_s12 }
0x2ee5   :  { %v7700_v16 = vadd.f32 %v7691_v28, %v7340_v51  ;;  %v7705_v39 = vadd.f32 %v7701_v25, %v11750_v13  ;;  %10371 = vmatpush3.msra.mxu1 %v9262_v10 }
0x2ee6   :  { %10372 = vmatprep.subr.mxu1 %v9261_v62  ;;  %p10683_p3 = por %p10682_p2, %p10681_p1 }
0x2ee7   :  { %v7704_v27 = vadd.f32 %v7700_v16, %v11747_v29  ;;  %v12280_v61 = vadd.f32 %v9238_v60, %v7705_v39  ;;  %10373 = vmatpush3.msra.mxu1 %v9261_v62 }
0x2ee8   :  { %p10684_p4 = pnand %p10683_p3, %p10677_p0 }
0x2ee9   :  { %v12278_v31 = vadd.f32 %v9238_v60, %v7704_v27 }
0x2eeb   :  { %10327 = vmatprep.mubr.msk.f32.mxu0 %vm117_vm0, %v12278_v31 }
0x2eec   :  { %10328 = vmatmul.mubr.msk.f32.gmra.mxu0 %vm117_vm0, %v12280_v61 }
0x2ef0   :  { %v10340_v0 = vpop.f32.mrf.mxu1 }
0x2ef1   :  { %v7929_v4 = vmul.f32 0.03125, %v10340_v0 }
0x2ef2   :  { %v7909_v22 = vpop.f32.mrf.mxu1 }
0x2ef3   :  { %v7933_v5 = vadd.f32 1e-05, %v7929_v4  ;;  %v7928_v6 = vmul.f32 0.03125, %v7909_v22 }
0x2ef5   :  { %10634 = vrsqrt.f32 %v7933_v5  ;;  %v7932_v57 = vadd.f32 1e-05, %v7928_v6 }
0x2ef7   :  { %10636 = vrsqrt.f32 %v7932_v57 }
0x2f02   :  { %v10635_v13 = vpop.eup %10634 }
0x2f03   :  { %v7941_v29 = vmul.f32 %v10635_v13, %v7824_v34 }
0x2f04   :  { %v10637_v37 = vpop.eup %10636 }
0x2f05   :  { %v7940_v58 = vmul.f32 %v10637_v37, %v7823_v40  ;;  %v7951_v53 = vmul.f32 %v12289_v24, %v7941_v29 }
0x2f07   :  { %v7950_v8 = vmul.f32 %v12289_v24, %v7940_v58  ;;  %v7961_v36 = vadd.f32 %v12295_v21, %v7951_v53 }
0x2f09   :  { %v7960_v19 = vadd.f32 %v12295_v21, %v7950_v8 }
0x2f0b   :  { %10352 = vmatprep.mubr.msk.f32.mxu0 %vm117_vm0, %v7960_v19 }
0x2f0c   :  { %10353 = vmatmul.mubr.msk.f32.vlgmr.msra.gmra.mxu0 %vm117_vm0, %v7961_v36 }
0x2f0d   :  { %10381 = vmatpush3.msra.mxu0 %v10698_v41 }
0x2f0e   :  { %10382 = vmatprep.subr.mxu0 %v10698_v41 }
0x2f0f   :  { %10383 = vmatpush3.msra.mxu0 %v10698_v41 }
0x2f10   :  { %10384 = vmatprep.subr.mxu0 %v10698_v41 }
0x2f11   :  { %10385 = vmatpush3.msra.mxu0 %v10698_v41 }
0x2f12   :  { %10386 = vmatprep.subr.mxu0 %v10698_v41 }
0x2f13   :  { %10387 = vmatpush3.msra.mxu0 %v10698_v41 }
0x2f14   :  { %10394 = vmatprep.subr.mxu0 %v10698_v41 }
0x2fac   :  { %v10329_v12 = vpop.f32.mrf.mxu0 }
0x2fad   :  { %v7822_v26 = vmul.f32 0.03125, %v10329_v12 }
0x2fae   :  { %v7810_v43 = vpop.f32.mrf.mxu0 }
0x2faf   :  { %v7821_v54 = vmul.f32 0.03125, %v7810_v43  ;;  %v7826_v49 = vsub.f32 %v12280_v61, %v7822_v26 }
0x2fb1   :  { %v7825_v17 = vsub.f32 %v12278_v31, %v7821_v54  ;;  %v7830_v50 = vmul.f32 %v7826_v49, %v7826_v49 }
0x2fb3   :  { %v7829_v47 = vmul.f32 %v7825_v17, %v7825_v17 }
0x2fb5   :  { %10341 = vmatprep.mubr.msk.f32.mxu1 %vm117_vm0, %v7829_v47 }
0x2fb6   :  { %10342 = vmatmul.mubr.msk.f32.gmra.mxu1 %vm117_vm0, %v7830_v50 }
0x2fcc   :  { %v10354_v60 = vpop.f32.mrf.mxu0 }
0x2fcd   :  { %v8061_v56 = vadd.f32 %v10354_v60, %v12341_v30 }
0x2fce   :  { %v8055_v42 = vpop.f32.mrf.mxu0 }
0x2fcf   :  { %v8075_v52 = vmul.f32 %v8061_v56, %v8061_v56  ;;  %v8056_v20 = vadd.f32 %v12341_v30, %v8055_v42 }
0x2fd1   :  { %v8079_v46 = vmul.f32 %v8075_v52, %v8061_v56  ;;  %v8074_v2 = vmul.f32 %v8056_v20, %v8056_v20 }
0x2fd3   :  { %v8083_v45 = vmul.f32 0.044715, %v8079_v46  ;;  %v8078_v63 = vmul.f32 %v8074_v2, %v8056_v20 }
0x2fd5   :  { %v8087_v34 = vadd.f32 %v8083_v45, %v8061_v56  ;;  %v8082_v40 = vmul.f32 0.044715, %v8078_v63 }
0x2fd7   :  { %v8091_v3 = vmul.f32 0.7978846, %v8087_v34  ;;  %v8086_v11 = vadd.f32 %v8082_v40, %v8056_v20 }
0x2fd9   :  { %10638 = vtanh.f32 %v8091_v3  ;;  %v8090_v59 = vmul.f32 0.7978846, %v8086_v11 }
0x2fdb   :  { %10640 = vtanh.f32 %v8090_v59 }
0x2fe6   :  { %v10639_v23 = vpop.eup %10638 }
0x2fe7   :  { %v8099_v9 = vadd.f32 1.0, %v10639_v23 }
0x2fe8   :  { %v10641_v14 = vpop.eup %10640 }
0x2fe9   :  { %v8098_v48 = vadd.f32 1.0, %v10641_v14  ;;  %v8103_v38 = vmul.f32 0.5, %v8099_v9 }
0x2feb   :  { %v8102_v51 = vmul.f32 0.5, %v8098_v48  ;;  %v8107_v28 = vmul.f32 %v8103_v38, %v8061_v56 }
0x2fed   :  { %v8106_v25 = vmul.f32 %v8102_v51, %v8056_v20  ;;  %v8477_v51 = vld [vmem:[%s12488_s19 + $0x8] sm:$0xff] }
0x2fef   :  { %10374 = vmatprep.mubr.msk.f32.mxu1 %vm4295_vm3, %v8106_v25  ;;  %v8476_v25 = vld [vmem:[%s12488_s19] sm:$0xff] }
0x2ff0   :  { %10375 = vmatmul.mubr.msk.f32.vlgmr.msra.gmra.mxu1 %vm4295_vm3, %v8107_v28 }
0x3076   :  { %v10343_v16 = vpop.f32.mrf.mxu1 }
0x3077   :  { %v7931_v39 = vmul.f32 0.03125, %v10343_v16 }
0x3078   :  { %v7919_v27 = vpop.f32.mrf.mxu1 }
0x3079   :  { %v7935_v0 = vadd.f32 1e-05, %v7931_v39  ;;  %v7930_v4 = vmul.f32 0.03125, %v7919_v27 }
0x307b   :  { %10642 = vrsqrt.f32 %v7935_v0  ;;  %v7934_v22 = vadd.f32 1e-05, %v7930_v4 }
0x307d   :  { %10644 = vrsqrt.f32 %v7934_v22 }
0x3088   :  { %v10643_v5 = vpop.eup %10642 }
0x3089   :  { %v7943_v6 = vmul.f32 %v10643_v5, %v7826_v49 }
0x308a   :  { %v10645_v57 = vpop.eup %10644 }
0x308b   :  { %v7942_v13 = vmul.f32 %v10645_v57, %v7825_v17  ;;  %v7953_v29 = vmul.f32 %v12289_v24, %v7943_v6 }
0x308d   :  { %v7952_v37 = vmul.f32 %v12289_v24, %v7942_v13  ;;  %v7963_v53 = vadd.f32 %v12295_v21, %v7953_v29 }
0x308f   :  { %v7962_v58 = vadd.f32 %v12295_v21, %v7952_v37 }
0x3091   :  { %10355 = vmatprep.mubr.msk.f32.mxu0 %vm117_vm0, %v7962_v58 }
0x3092   :  { %10356 = vmatmul.mubr.msk.f32.gmra.mxu0 %vm117_vm0, %v7963_v53 }
0x30b0   :  { %v10376_v8 = vpop.f32.mrf.mxu1 }
0x30b1   :  { %v8217_v19 = vadd.f32 %v10376_v8, %v12240_v33 }
0x30b2   :  { %v8197_v36 = vpop.f32.mrf.mxu1 }
0x30b3   :  { %v8216_v55 = vadd.f32 %v8197_v36, %v12227_v1  ;;  %v8229_v24 = vadd.f32 %v9274_v15, %v8217_v19  ;;  %v9283_v19 = vld [vmem:[%s12547_s18] ss:$0 sm:$0xff] }
0x30b5   :  { %v8228_v7 = vadd.f32 %v9274_v15, %v8216_v55 }
0x30b7   :  { %10388 = vmatprep.mubr.msk.f32.mxu0 %vm117_vm0, %v8228_v7 }
0x30b8   :  { %10389 = vmatmul.mubr.msk.f32.vlgmr.msra.gmra.mxu0 %vm117_vm0, %v8229_v24 }
0x30b9   :  { %10395 = vmatpush3.msra.mxu0 %v10698_v41 }
0x30ba   :  { %10396 = vmatprep.subr.mxu0 %v10698_v41 }
0x30bb   :  { %10397 = vmatpush3.msra.mxu0 %v10698_v41 }
0x30bc   :  { %10398 = vmatprep.subr.mxu0 %v10698_v41 }
0x30bd   :  { %10399 = vmatpush3.msra.mxu0 %v10698_v41 }
0x30be   :  { %10400 = vmatprep.subr.mxu0 %v10698_v41 }
0x30bf   :  { %10401 = vmatpush3.msra.mxu0 %v10698_v41 }
0x30c0   :  { %10422 = vmatprep.subr.mxu0 %v10699_v44 }
0x3152   :  { %v10357_v1 = vpop.f32.mrf.mxu0 }
0x3153   :  { %v8071_v33 = vadd.f32 %v10357_v1, %v12341_v30 }
0x3154   :  { %v8065_v21 = vpop.f32.mrf.mxu0 }
0x3155   :  { %v8077_v35 = vmul.f32 %v8071_v33, %v8071_v33  ;;  %v8066_v18 = vadd.f32 %v12341_v30, %v8065_v21  ;;  %v10709_v21 = vmov 0  }
0x3156   :  { %10473 = vset.pattern.permute.xlu1 %v10709_v21  ;;  %10472 = vset.pattern.permute.xlu0 %v10709_v21 }
0x3157   :  { %v8081_v32 = vmul.f32 %v8077_v35, %v8071_v33  ;;  %v8076_v10 = vmul.f32 %v8066_v18, %v8066_v18 }
0x3159   :  { %v8085_v62 = vmul.f32 0.044715, %v8081_v32  ;;  %v8080_v12 = vmul.f32 %v8076_v10, %v8066_v18 }
0x315b   :  { %v8089_v26 = vadd.f32 %v8085_v62, %v8071_v33  ;;  %v8084_v43 = vmul.f32 0.044715, %v8080_v12 }
0x315d   :  { %v8093_v54 = vmul.f32 0.7978846, %v8089_v26  ;;  %v8088_v49 = vadd.f32 %v8084_v43, %v8066_v18 }
0x315f   :  { %10646 = vtanh.f32 %v8093_v54  ;;  %v8092_v17 = vmul.f32 0.7978846, %v8088_v49  ;;  %v9285_v49 = vld [vmem:[#allocation2] ss:$0 sm:$0xff] }
0x3161   :  { %10648 = vtanh.f32 %v8092_v17 }
0x316c   :  { %v10647_v47 = vpop.eup %10646 }
0x316d   :  { %v8101_v50 = vadd.f32 1.0, %v10647_v47 }
0x316e   :  { %v10649_v60 = vpop.eup %10648 }
0x316f   :  { %v8100_v56 = vadd.f32 1.0, %v10649_v60  ;;  %v8105_v42 = vmul.f32 0.5, %v8101_v50 }
0x3171   :  { %v8104_v52 = vmul.f32 0.5, %v8100_v56  ;;  %v8109_v46 = vmul.f32 %v8105_v42, %v8071_v33 }
0x3173   :  { %v8108_v20 = vmul.f32 %v8104_v52, %v8066_v18 }
0x3175   :  { %10377 = vmatprep.mubr.msk.f32.mxu1 %vm4295_vm3, %v8108_v20 }
0x3176   :  { %10378 = vmatmul.mubr.msk.f32.gmra.mxu1 %vm4295_vm3, %v8109_v46 }
0x3178   :  { %v10390_v30 = vpop.f32.mrf.mxu0 }
0x3179   :  { %v8332_v34 = vmul.f32 0.03125, %v10390_v30 }
0x317a   :  { %v8312_v2 = vpop.f32.mrf.mxu0 }
0x317b   :  { %v8331_v45 = vmul.f32 0.03125, %v8312_v2  ;;  %v8336_v9 = vsub.f32 %v8229_v24, %v8332_v34 }
0x317d   :  { %v8335_v11 = vsub.f32 %v8228_v7, %v8331_v45  ;;  %v8340_v38 = vmul.f32 %v8336_v9, %v8336_v9  ;;  %v9284_v7 = vld [vmem:[%s12548_s7] ss:$0 sm:$0xff] }
0x317f   :  { %v8339_v48 = vmul.f32 %v8335_v11, %v8335_v11 }
0x3236   :  { %v10379_v63 = vpop.f32.mrf.mxu1 }
0x3237   :  { %v8219_v40 = vadd.f32 %v10379_v63, %v12280_v61  ;;  %v8479_v61 = vld [vmem:[%s12488_s19 + $0x18] sm:$0xff] }
0x3238   :  { %v8207_v3 = vpop.f32.mrf.mxu1  ;;  %10408 = vmatprep.subr.mxu1 %v8479_v61 }
0x3239   :  { %v8218_v59 = vadd.f32 %v8207_v3, %v12278_v31  ;;  %v8231_v14 = vadd.f32 %v9274_v15, %v8219_v40  ;;  %v8478_v31 = vld [vmem:[%s12488_s19 + $0x10] sm:$0xff]  ;;  %10409 = vmatpush3.msra.mxu1 %v8479_v61 }
0x323a   :  { %10410 = vmatprep.subr.mxu1 %v8478_v31 }
0x323b   :  { %v8230_v23 = vadd.f32 %v9274_v15, %v8218_v59  ;;  %10411 = vmatpush3.msra.mxu1 %v8478_v31 }
0x323c   :  { %10412 = vmatprep.subr.mxu1 %v8477_v51 }
0x323d   :  { %10391 = vmatprep.mubr.msk.f32.mxu0 %vm117_vm0, %v8230_v23  ;;  %10413 = vmatpush3.msra.mxu1 %v8477_v51 }
0x323e   :  { %10392 = vmatmul.mubr.msk.f32.gmra.mxu0 %vm117_vm0, %v8231_v14  ;;  %10414 = vmatprep.subr.mxu1 %v8476_v25 }
0x323f   :  { %10402 = vmatprep.mubr.msk.f32.mxu0 %vm117_vm0, %v8339_v48  ;;  %10415 = vmatpush3.msra.mxu1 %v8476_v25 }
0x3240   :  { %10429 = vmatprep.subr.mxu1 %v10699_v44 }
0x3242   :  { %10403 = vmatmul.mubr.msk.f32.vlgmr.msra.gmra.mxu0 %vm117_vm0, %v8340_v38 }
0x32fe   :  { %v10393_v28 = vpop.f32.mrf.mxu0 }
0x32ff   :  { %v8334_v16 = vmul.f32 0.03125, %v10393_v28 }
0x3300   :  { %v8322_v39 = vpop.f32.mrf.mxu0 }
0x3301   :  { %v8333_v27 = vmul.f32 0.03125, %v8322_v39  ;;  %v8338_v0 = vsub.f32 %v8231_v14, %v8334_v16 }
0x3302   :  { %v10404_v4 = vpop.f32.mrf.mxu0 }
0x3303   :  { %v8337_v22 = vsub.f32 %v8230_v23, %v8333_v27  ;;  %v8441_v5 = vmul.f32 0.03125, %v10404_v4  ;;  %v8342_v37 = vmul.f32 %v8338_v0, %v8338_v0 }
0x3304   :  { %v8421_v6 = vpop.f32.mrf.mxu0 }
0x3305   :  { %v8341_v57 = vmul.f32 %v8337_v22, %v8337_v22  ;;  %v8445_v13 = vadd.f32 1e-05, %v8441_v5  ;;  %v8440_v29 = vmul.f32 0.03125, %v8421_v6 }
0x3307   :  { %10650 = vrsqrt.f32 %v8445_v13  ;;  %v8444_v58 = vadd.f32 1e-05, %v8440_v29  ;;  %10405 = vmatprep.mubr.msk.f32.mxu0 %vm117_vm0, %v8341_v57 }
0x3308   :  { %10406 = vmatmul.mubr.msk.f32.gmra.mxu0 %vm117_vm0, %v8342_v37 }
0x3309   :  { %10652 = vrsqrt.f32 %v8444_v58  ;;  %10426 = vmatprep.mubr.msk.f32.mxu0 %vm10710_vm5, %v10699_v44 }
0x3314   :  { %v10651_v53 = vpop.eup %10650 }
0x3315   :  { %v8453_v8 = vmul.f32 %v10651_v53, %v8336_v9 }
0x3316   :  { %v10653_v36 = vpop.eup %10652 }
0x3317   :  { %v8452_v15 = vmul.f32 %v10653_v36, %v8335_v11  ;;  %v8463_v55 = vmul.f32 %v9283_v19, %v8453_v8 }
0x3319   :  { %v8462_v24 = vmul.f32 %v9283_v19, %v8452_v15  ;;  %v12401_v33 = vadd.f32 %v9284_v7, %v8463_v55 }
0x331b   :  { %v12399_v1 = vadd.f32 %v9284_v7, %v8462_v24 }
0x331d   :  { %10416 = vmatprep.mubr.msk.f32.mxu1 %vm117_vm0, %v12399_v1 }
0x331e   :  { %10417 = vmatmul.mubr.msk.f32.vlgmr.msra.gmra.mxu1 %vm117_vm0, %v12401_v33 }
0x33c8   :  { %v10407_v35 = vpop.f32.mrf.mxu0 }
0x33c9   :  { %v8443_v18 = vmul.f32 0.03125, %v10407_v35 }
0x33ca   :  { %v8431_v32 = vpop.f32.mrf.mxu0 }
0x33cb   :  { %v8447_v10 = vadd.f32 1e-05, %v8443_v18  ;;  %v8442_v62 = vmul.f32 0.03125, %v8431_v32 }
0x33cd   :  { %10654 = vrsqrt.f32 %v8447_v10  ;;  %v8446_v12 = vadd.f32 1e-05, %v8442_v62 }
0x33cf   :  { %10656 = vrsqrt.f32 %v8446_v12 }
0x33da   :  { %v10655_v26 = vpop.eup %10654 }
0x33db   :  { %v8455_v43 = vmul.f32 %v10655_v26, %v8338_v0 }
0x33dc   :  { %v10657_v54 = vpop.eup %10656 }
0x33dd   :  { %v8454_v17 = vmul.f32 %v10657_v54, %v8337_v22  ;;  %v8465_v50 = vmul.f32 %v9283_v19, %v8455_v43 }
0x33de   :  { %v10418_v47 = vpop.f32.mrf.mxu1 }
0x33df   :  { %v8571_v60 = vadd.f32 %v10418_v47, %v9285_v49  ;;  %v8464_v56 = vmul.f32 %v9283_v19, %v8454_v17  ;;  %v12409_v46 = vadd.f32 %v9284_v7, %v8465_v50 }
0x33e0   :  { %v8565_v42 = vpop.f32.mrf.mxu1 }
0x33e1   :  { %v8566_v52 = vadd.f32 %v9285_v49, %v8565_v42  ;;  %v12407_v20 = vadd.f32 %v9284_v7, %v8464_v56  ;;  %v8586_v30 = vsel %vm8584_vm4, %v8571_v60, -inf }
0x33e3   :  { %v8585_v2 = vsel %vm8584_vm4, %v8566_v52, -inf  ;;  %10419 = vmatprep.mubr.msk.f32.mxu1 %vm117_vm0, %v12407_v20 }
0x33e4   :  { %v8587_v45 = vmax.f32 %v8585_v2, %v8586_v30  ;;  %10420 = vmatmul.mubr.msk.f32.gmra.mxu1 %vm117_vm0, %v12409_v46 }
0x33e5   :  { %10437 = vmatprep.mubr.msk.f32.mxu1 %vm10710_vm5, %v10699_v44 }
0x33e6   :  { %v8588_v63 = vrot.slane %v8587_v45, 4 }
0x33e8   :  { %v8589_v34 = vmax.f32 %v8587_v45, %v8588_v63  ;;  %v8700_v45 = vld [vmem:[%s12549_s28 + $0x18] sm:$0xff]  ;;  %v8699_v63 = vld [vmem:[%s12549_s28 + $0x10] sm:$0xff] }
0x33e9   :  { %10430 = vmatpush3.msra.mxu1 %v8700_v45 }
0x33ea   :  { %v8590_v40 = vrot.slane %v8589_v34, 2  ;;  %10431 = vmatprep.subr.mxu1 %v10699_v44 }
0x33eb   :  { %10432 = vmatpush3.msra.mxu1 %v8699_v63 }
0x33ec   :  { %v8591_v3 = vmax.f32 %v8589_v34, %v8590_v40  ;;  %v8698_v34 = vld [vmem:[%s12549_s28 + $0x8] sm:$0xff]  ;;  %10433 = vmatprep.subr.mxu1 %v10699_v44  ;;  %v8697_v40 = vld [vmem:[%s12549_s28] sm:$0xff] }
0x33ed   :  { %10434 = vmatpush3.msra.mxu1 %v8698_v34 }
0x33ee   :  { %v8592_v11 = vrot.slane %v8591_v3, 1  ;;  %10435 = vmatprep.subr.mxu1 %v10699_v44 }
0x33ef   :  { %10436 = vmatpush3.msra.mxu1 %v8697_v40 }
0x33f0   :  { %v8593_v59 = vmax.f32 %v8591_v3, %v8592_v11  ;;  %10447 = vmatprep.subr.mxu1 %v10699_v44 }
0x33f2   :  { %v8594_v23 = vsub.f32 %v8566_v52, %v8593_v59  ;;  %v8595_v9 = vsub.f32 %v8571_v60, %v8593_v59 }
0x33f4   :  { %v8596_v14 = vmul.f32 1.442695, %v8594_v23  ;;  %v8598_v48 = vmul.f32 1.442695, %v8595_v9 }
0x33f6   :  { %10658 = vpow2.f32 %v8596_v14 }
0x33f7   :  { %10660 = vpow2.f32 %v8598_v48 }
0x3403   :  { %v10659_v38 = vpop.eup %10658 }
0x3404   :  { %v10661_v61 = vpop.eup %10660  ;;  %v8600_v31 = vsel %vm8584_vm4, %v10659_v38, 0.0 }
0x3405   :  { %v8601_v51 = vsel %vm8584_vm4, %v10661_v61, 0.0 }
0x3406   :  { %v8602_v25 = vadd.f32 %v8601_v51, %v8600_v31 }
0x3408   :  { %v8603_v28 = vrot.slane %v8602_v25, 4 }
0x340a   :  { %v8604_v16 = vadd.f32 %v8603_v28, %v8602_v25 }
0x340c   :  { %v8605_v39 = vrot.slane %v8604_v16, 2 }
0x340e   :  { %v8606_v27 = vadd.f32 %v8605_v39, %v8604_v16 }
0x3410   :  { %v8607_v0 = vrot.slane %v8606_v27, 1 }
0x3412   :  { %v8608_v4 = vadd.f32 %v8607_v0, %v8606_v27 }
0x3414   :  { %10662 = vrcp.f32 %v8608_v4 }
0x3421   :  { %v10663_v22 = vpop.eup %10662 }
0x3422   :  { %v8611_v5 = vmul.f32 %v10663_v22, %v10661_v61  ;;  %v8610_v6 = vmul.f32 %v10663_v22, %v10659_v38  ;;  %v8701_v61 = vld [vmem:[%s12550_s17] sm:$0x1] }
0x3424   :  { %8619 = vperm.xlu0 %10472, %v8611_v5   ;;  %8614 = vperm.xlu1 %10473, %v8610_v6  }
0x349f   :  { %v8620_v57 = vpop.permute.xlu0 %8619  ;;  %v8615_v13 = vpop.permute.xlu1 %8614 }
0x34a0   :  { %v8623_v29 = vmul.f32 %v8620_v57, %v12401_v33  ;;  %v8622_v37 = vmul.f32 %v8615_v13, %v12399_v1 }
0x34a2   :  { %10423 = vmatpush3.msra.mxu0 %v8623_v29 }
0x34a3   :  { %10424 = vmatprep.subr.mxu0 %v10699_v44 }
0x34a4   :  { %10425 = vmatpush3.msra.mxu0 %v8622_v37  ;;  %v10421_v58 = vpop.f32.mrf.mxu1 }
0x34a5   :  { %v8581_v53 = vadd.f32 %v10421_v58, %v9285_v49  ;;  %10427 = vmatmul.mubr.msk.f32.vlgmr.msra.gmra.mxu0 %vm1112_vm2, %v10698_v41  ;;  %10440 = vmatprep.subr.mxu0 %v10699_v44 }
0x34a6   :  { %v8575_v8 = vpop.f32.mrf.mxu1  ;;  %10444 = vmatprep.mubr.msk.f32.mxu0 %vm10710_vm5, %v10699_v44 }
0x34a7   :  { %v8576_v19 = vadd.f32 %v9285_v49, %v8575_v8  ;;  %v8776_v36 = vsel %vm8584_vm4, %v8581_v53, -inf }
0x34a9   :  { %v8775_v15 = vsel %vm8584_vm4, %v8576_v19, -inf }
0x34aa   :  { %v8777_v55 = vmax.f32 %v8775_v15, %v8776_v36 }
0x34ac   :  { %v8778_v7 = vrot.slane %v8777_v55, 4 }
0x34ae   :  { %v8779_v24 = vmax.f32 %v8777_v55, %v8778_v7 }
0x34b0   :  { %v8780_v1 = vrot.slane %v8779_v24, 2 }
0x34b2   :  { %v8781_v33 = vmax.f32 %v8779_v24, %v8780_v1 }
0x34b4   :  { %v8782_v21 = vrot.slane %v8781_v33, 1 }
0x34b6   :  { %v8783_v35 = vmax.f32 %v8781_v33, %v8782_v21 }
0x34b8   :  { %v8784_v18 = vsub.f32 %v8576_v19, %v8783_v35  ;;  %v8785_v32 = vsub.f32 %v8581_v53, %v8783_v35 }
0x34ba   :  { %v8786_v10 = vmul.f32 1.442695, %v8784_v18  ;;  %v8788_v62 = vmul.f32 1.442695, %v8785_v32 }
0x34bc   :  { %10664 = vpow2.f32 %v8786_v10 }
0x34bd   :  { %10666 = vpow2.f32 %v8788_v62 }
0x34c9   :  { %v10665_v12 = vpop.eup %10664 }
0x34ca   :  { %v10667_v26 = vpop.eup %10666  ;;  %v8790_v43 = vsel %vm8584_vm4, %v10665_v12, 0.0 }
0x34cb   :  { %v8791_v54 = vsel %vm8584_vm4, %v10667_v26, 0.0 }
0x34cc   :  { %v8792_v49 = vadd.f32 %v8791_v54, %v8790_v43 }
0x34ce   :  { %v8793_v17 = vrot.slane %v8792_v49, 4 }
0x34d0   :  { %v8794_v47 = vadd.f32 %v8793_v17, %v8792_v49 }
0x34d2   :  { %v8795_v50 = vrot.slane %v8794_v47, 2 }
0x34d4   :  { %v8796_v60 = vadd.f32 %v8795_v50, %v8794_v47 }
0x34d6   :  { %v8797_v56 = vrot.slane %v8796_v60, 1 }
0x34d8   :  { %v8798_v42 = vadd.f32 %v8797_v56, %v8796_v60 }
0x34da   :  { %10668 = vrcp.f32 %v8798_v42 }
0x34e7   :  { %v10669_v52 = vpop.eup %10668 }
0x34e8   :  { %v8801_v30 = vmul.f32 %v10669_v52, %v10667_v26  ;;  %v8800_v2 = vmul.f32 %v10669_v52, %v10665_v12 }
0x34ea   :  { %8809 = vperm.xlu1 %10473, %v8801_v30   ;;  %8804 = vperm.xlu0 %10472, %v8800_v2  }
0x3565   :  { %v8810_v3 = vpop.permute.xlu1 %8809  ;;  %v8805_v11 = vpop.permute.xlu0 %8804 }
0x3566   :  { %v8813_v59 = vmul.f32 %v8810_v3, %v12409_v46  ;;  %v8693_v23 = vpop.f32.mrf.mxu0  ;;  %v8812_v9 = vmul.f32 %v8805_v11, %v12407_v20 }
0x3567   :  { %10438 = vmatmul.mubr.msk.f32.vlgmr.msra.gmra.mxu1 %vm117_vm0, %v8693_v23 }
0x3568   :  { %10441 = vmatpush3.msra.mxu0 %v8813_v59  ;;  %10448 = vmatpush3.msra.mxu1 %v8700_v45  ;;  %v10428_v14 = vpop.f32.mrf.mxu0 }
0x3569   :  { %10442 = vmatprep.subr.mxu0 %v10699_v44  ;;  %10449 = vmatprep.subr.mxu1 %v10699_v44 }
0x356a   :  { %10443 = vmatpush3.msra.mxu0 %v8812_v9  ;;  %10450 = vmatpush3.msra.mxu1 %v8699_v63 }
0x356b   :  { %10445 = vmatmul.mubr.msk.f32.vlgmr.msra.gmra.mxu0 %vm1112_vm2, %v10698_v41  ;;  %10451 = vmatprep.subr.mxu1 %v10699_v44 }
0x356c   :  { %10452 = vmatpush3.msra.mxu1 %v8698_v34  ;;  %10455 = vmatprep.mubr.msk.f32.mxu1 %vm10710_vm5, %v10699_v44 }
0x356d   :  { %10453 = vmatprep.subr.mxu1 %v10699_v44 }
0x356e   :  { %10454 = vmatpush3.msra.mxu1 %v8697_v40 }
0x3627   :  { %v8771_v20 = vpop.f32.mrf.mxu1 }
0x3628   :  { %v8772_v25 = vadd.f32 %v8771_v20, %v8701_v61 }
0x3629   :  { %v10439_v46 = vpop.f32.mrf.mxu1 }
0x362b   :  { %v8880_v48 = vpop.f32.mrf.mxu0 }
0x362c   :  { %10456 = vmatmul.mubr.msk.f32.vlgmr.msra.gmra.mxu1 %vm117_vm0, %v8880_v48 }
0x362d   :  { %v10446_v38 = vpop.f32.mrf.mxu0 }
0x36ec   :  { %v8953_v41 = vpop.f32.mrf.mxu1 }
0x36ed   :  { %v8954_v31 = vadd.f32 %v8953_v41, %v8701_v61 }
0x36ee   :  { %v10457_v51 = vpop.f32.mrf.mxu1 }
0x36ef   :  { %v8958_v28 = vrot.slane %v8954_v31, 7 }
0x36f1   :  { %v8961_v44 = vsel %vm8960_vm6, %v8772_v25, %v8958_v28 }
0x36f2   :  { %8962 = vst [vmem:[#allocation3] sm:$0x3] %v8961_v44 }
0x36f3   :  { %10687 = shalt.err (!%p10684_p4)
}
0x36f4   :  { %s12551_s13 = sld [smem:[#allocation18_spill]] }
0x36fa   :  { %8972 = dma.vmem_to_hbm [thread:$0]  %s8970_s4, 32, %s12551_s13, [#allocation4]  }
0x36fb   :  { %10696 = dma.done.wait [#allocation4], 32  }
0x36fc   :  { %10697 = vsyncadd [#allocation4], 4294967264 }
0x36fd   :  { %8976 = vsyncpa [#allocation4], 1 }

</bundles_post_ra>
